<compile_context>
chip_gen: v5e
topology: v5e:2x2
jax: 0.10.0
libtpu: 0.0.40
codegen_flags: <defaults>
</compile_context>

<pallas_src>
import functools

import jax
import jax.numpy as jnp
from jax.experimental import pallas as pl
from jax.experimental.pallas import tpu as pltpu

_LANE = 128


def _round_up(x, m):
    return ((x + m - 1) // m) * m


def fnn_kernel(alpha_ref,                 # (3,) f32 in SMEM: PReLU alphas
               x_ref,
               w1_ref, b1_ref,
               w2_ref, b2_ref,
               w3_ref, b3_ref,
               w4_ref, b4_ref,
               o_ref):
    cdt = w1_ref.dtype  # MXU operand dtype (bf16 on the fast path, f32 otherwise)

    def layer(h, w_ref, b_ref, alpha_idx):
        # MXU matmul with f32 accumulation; bias add + PReLU in f32 on the VPU
        # (these ride in spare VALU slots under the matmuls).
        acc = jnp.dot(h, w_ref[...], preferred_element_type=jnp.float32)
        acc = acc + b_ref[...]
        a = alpha_ref[alpha_idx]          # scalar read from SMEM
        return jnp.where(acc > 0, acc, a * acc)

    h = x_ref[...]
    h = layer(h, w1_ref, b1_ref, 0).astype(cdt)
    h = layer(h, w2_ref, b2_ref, 1).astype(cdt)
    h = layer(h, w3_ref, b3_ref, 2).astype(cdt)

    out = jnp.dot(h, w4_ref[...], preferred_element_type=jnp.float32)
    out = out + b4_ref[...]
    o_ref[...] = out.astype(o_ref.dtype)  # lane-dense (padded to 128 cols) store


def prepare_params(params, *, compute_dtype=jnp.float32):
    """One-time weight preparation, kept OUT of the per-call path.

    Casts MXU operands to compute_dtype, pads w1 rows (K) and w4/b4 columns
    (classes) to 128-lane multiples, and packs the three PReLU alphas into a
    single (3,) f32 array destined for SMEM.
    Assumes nn.PReLU(num_parameters=1) (scalar alpha), as in the PyTorch module.
    Returns (prepared_dict, n_classes).
    """
    in_feats = params["w1"].shape[0]
    n_classes = params["w4"].shape[1]
    Kp = _round_up(in_feats, _LANE)
    Np = _round_up(n_classes, _LANE)

    w1 = jnp.pad(params["w1"], ((0, Kp - in_feats), (0, 0)))
    w4 = jnp.pad(params["w4"], ((0, 0), (0, Np - n_classes)))
    b4 = jnp.pad(params["b4"], ((0, 0), (0, Np - n_classes)))

    prepared = dict(
        alphas=jnp.stack([params["a1"].reshape(()),
                          params["a2"].reshape(()),
                          params["a3"].reshape(())]).astype(jnp.float32),
        w1=w1.astype(compute_dtype),          b1=params["b1"].astype(jnp.float32),
        w2=params["w2"].astype(compute_dtype), b2=params["b2"].astype(jnp.float32),
        w3=params["w3"].astype(compute_dtype), b3=params["b3"].astype(jnp.float32),
        w4=w4.astype(compute_dtype),           b4=b4.astype(jnp.float32),
    )
    return prepared, n_classes


def _pick_tile_b(batch, tile_b):
    """Clamp tile to the real batch; keep >=2 tiles for megacore when possible."""
    bp = _round_up(batch, _LANE)       # minimal MXU-friendly padded batch
    t = min(tile_b, bp)                # never pad tiny batches up to tile_b
    # If the batch spans >1 minimal tile but would collapse to a single grid
    # tile, split it so the "parallel" axis can shard across both v7x TCs.
    if bp > _LANE and t >= bp:
        t = _round_up(bp // 2, _LANE)
    return t


@functools.partial(jax.jit, static_argnames=("n_classes", "tile_b"))
def fnn_forward(x, prepared, *, n_classes, tile_b=256):
    """x: (B, in_feats) f32. prepared: output of prepare_params()."""
    B, in_feats = x.shape
    alphas = prepared["alphas"]
    w1, b1 = prepared["w1"], prepared["b1"]
    w2, b2 = prepared["w2"], prepared["b2"]
    w3, b3 = prepared["w3"], prepared["b3"]
    w4, b4 = prepared["w4"], prepared["b4"]
    Kp = w1.shape[0]          # lane-padded in_feats
    Np = w4.shape[1]          # lane-padded n_classes
    cdt = w1.dtype            # MXU operand dtype chosen at prepare time

    tb = _pick_tile_b(B, tile_b)
    n_tiles = -(-B // tb)
    Bp = n_tiles * tb

    # Per-call work on x only: pad rows to the tile grid, pad cols to 128 lanes
    # (lane-dense DMA + lane-aligned K for layer 1), single cast to cdt.
    xc = jnp.pad(x, ((0, Bp - B), (0, Kp - in_feats))).astype(cdt)

    # Weights/biases: constant block index across the grid -> single-buffered
    # resident VMEM blocks (halves weight VMEM vs default double-buffering).
    def const(arr):
        return pl.BlockSpec(arr.shape, lambda i: (0, 0),
                            pipeline_mode=pl.Buffered(1))

    smem_spec = pl.BlockSpec(memory_space=pltpu.MemorySpace.SMEM)

    grid_spec = pltpu.PrefetchScalarGridSpec(
        num_scalar_prefetch=0,
        grid=(n_tiles,),
        in_specs=[
            smem_spec,                                     # alphas (SMEM)
            pl.BlockSpec((tb, Kp), lambda i: (i, 0)),      # x (batch-tiled)
            const(w1), const(b1),
            const(w2), const(b2),
            const(w3), const(b3),
            const(w4), const(b4),
        ],
        out_specs=pl.BlockSpec((tb, Np), lambda i: (i, 0)),
    )

    out = pl.pallas_call(
        fnn_kernel,
        out_shape=jax.ShapeDtypeStruct((Bp, Np), jnp.float32),
        grid_spec=grid_spec,
        compiler_params=pltpu.CompilerParams(
            dimension_semantics=("parallel",),   # batch tiles shard across TCs
            vmem_limit_bytes=32 << 20,           # headroom if hidden is scaled up
        ),
    )(alphas, xc, w1, b1, w2, b2, w3, b3, w4, b4)

    return out[:B, :n_classes]


def init_params(key, in_feats, n_classes, hidden):
    """Deterministic synthetic init mimicking nn.Linear / nn.PReLU shapes."""
    def linear(k, fan_in, fan_out):
        kw, kb = jax.random.split(k)
        bound = 1.0 / jnp.sqrt(fan_in)
        w = jax.random.uniform(kw, (fan_in, fan_out), jnp.float32, -bound, bound)
        b = jax.random.uniform(kb, (1, fan_out), jnp.float32, -bound, bound)
        return w, b

    k1, k2, k3, k4 = jax.random.split(key, 4)
    w1, b1 = linear(k1, in_feats, hidden)
    w2, b2 = linear(k2, hidden, hidden)
    w3, b3 = linear(k3, hidden, hidden)
    w4, b4 = linear(k4, hidden, n_classes)
    alpha = jnp.full((1, 1), 0.25, jnp.float32)  # nn.PReLU() default init
    return dict(w1=w1, b1=b1, a1=alpha,
                w2=w2, b2=b2, a2=alpha,
                w3=w3, b3=b3, a3=alpha,
                w4=w4, b4=b4)


def fnn_reference(x, p):
    h = x @ p["w1"] + p["b1"]
    h = jnp.where(h > 0, h, p["a1"][0, 0] * h)
    h = h @ p["w2"] + p["b2"]
    h = jnp.where(h > 0, h, p["a2"][0, 0] * h)
    h = h @ p["w3"] + p["b3"]
    h = jnp.where(h > 0, h, p["a3"][0, 0] * h)
    return h @ p["w4"] + p["b4"]


if __name__ == "__main__":
    key = jax.random.PRNGKey(0)
    kx, kp = jax.random.split(key)

    # predict_hidden_feats=512 matches the PyTorch module default.
    B, in_feats, hidden, n_classes = 8, 32, 512, 8
    x = jax.random.normal(kx, (B, in_feats), jnp.float32)
    params = init_params(kp, in_feats, n_classes, hidden)

    ref = fnn_reference(x, params)

    # Default path: f32 MXU operands — exact PyTorch-module semantics.
    prep_f32, nc = prepare_params(params)                       # one-time prep
    out_f32 = jax.block_until_ready(fnn_forward(x, prep_f32, n_classes=nc))
    assert out_f32.shape == (B, n_classes)
    assert jnp.allclose(out_f32, ref, atol=1e-3, rtol=1e-3)

    # Opt-in fast path: bf16 MXU operands with f32 accumulation.
    prep_bf16, _ = prepare_params(params, compute_dtype=jnp.bfloat16)
    out_bf16 = jax.block_until_ready(fnn_forward(x, prep_bf16, n_classes=nc))
    assert out_bf16.shape == (B, n_classes)
    assert float(jnp.max(jnp.abs(out_bf16 - ref))) < 0.1

    # Larger (non-multiple) batch exercises the multi-tile "parallel" grid path.
    xb = jax.random.normal(kx, (300, in_feats), jnp.float32)
    refb = fnn_reference(xb, params)
    outb = jax.block_until_ready(fnn_forward(xb, prep_f32, n_classes=nc))
    assert outb.shape == (300, n_classes)
    assert jnp.allclose(outb, refb, atol=1e-3, rtol=1e-3)

    print("KERNEL_OK")
</pallas_src>

<mosaic_0001>
module attributes {stable_mosaic.version = 11 : i64} {
  func.func @fnn_kernel(%arg0: i32, %arg1: memref<3xf32, #tpu.memory_space<smem>>, %arg2: memref<128x128xf32, #tpu.memory_space<vmem>>, %arg3: memref<128x512xf32, #tpu.memory_space<vmem>>, %arg4: memref<1x512xf32, #tpu.memory_space<vmem>>, %arg5: memref<512x512xf32, #tpu.memory_space<vmem>>, %arg6: memref<1x512xf32, #tpu.memory_space<vmem>>, %arg7: memref<512x512xf32, #tpu.memory_space<vmem>>, %arg8: memref<1x512xf32, #tpu.memory_space<vmem>>, %arg9: memref<512x128xf32, #tpu.memory_space<vmem>>, %arg10: memref<1x128xf32, #tpu.memory_space<vmem>>, %arg11: memref<128x128xf32, #tpu.memory_space<vmem>>) attributes {dimension_semantics = [#tpu.dimension_semantics<parallel>], iteration_bounds = array<i64: 1>, scalar_prefetch = 0 : i64, scratch_operands = 0 : i64, tpu.core_type = #tpu.core_type<tc>, window_params = [{transform_indices = @transform_0, window_bounds = array<i64: 3>}, {transform_indices = @transform_1, window_bounds = array<i64: 128, 128>}, {pipeline_mode = #tpu.pipeline_mode<synchronous>, transform_indices = @transform_2, window_bounds = array<i64: 128, 512>}, {pipeline_mode = #tpu.pipeline_mode<synchronous>, transform_indices = @transform_3, window_bounds = array<i64: 1, 512>}, {pipeline_mode = #tpu.pipeline_mode<synchronous>, transform_indices = @transform_4, window_bounds = array<i64: 512, 512>}, {pipeline_mode = #tpu.pipeline_mode<synchronous>, transform_indices = @transform_5, window_bounds = array<i64: 1, 512>}, {pipeline_mode = #tpu.pipeline_mode<synchronous>, transform_indices = @transform_6, window_bounds = array<i64: 512, 512>}, {pipeline_mode = #tpu.pipeline_mode<synchronous>, transform_indices = @transform_7, window_bounds = array<i64: 1, 512>}, {pipeline_mode = #tpu.pipeline_mode<synchronous>, transform_indices = @transform_8, window_bounds = array<i64: 512, 128>}, {pipeline_mode = #tpu.pipeline_mode<synchronous>, transform_indices = @transform_9, window_bounds = array<i64: 1, 128>}, {transform_indices = @transform_10, window_bounds = array<i64: 128, 128>}]} {
    %c0 = arith.constant 0 : index
    %c0_0 = arith.constant 0 : index
    %0 = vector.load %arg2[%c0, %c0_0] : memref<128x128xf32, #tpu.memory_space<vmem>>, vector<128x128xf32>
    %c0_1 = arith.constant 0 : index
    %c0_2 = arith.constant 0 : index
    %1 = vector.load %arg3[%c0_1, %c0_2] : memref<128x512xf32, #tpu.memory_space<vmem>>, vector<128x512xf32>
    %cst = arith.constant dense<0.000000e+00> : vector<128x512xf32>
    %2 = tpu.matmul %0, %1, %cst {dimension_numbers = #tpu.dot_dimension_numbers<[1], [0], [0], [1], [0, 0, 1, 1], [], []>} : vector<128x128xf32>, vector<128x512xf32>, vector<128x512xf32> -> vector<128x512xf32>
    %c0_3 = arith.constant 0 : index
    %c0_4 = arith.constant 0 : index
    %3 = vector.load %arg4[%c0_3, %c0_4] : memref<1x512xf32, #tpu.memory_space<vmem>>, vector<1x512xf32>
    %4 = vector.broadcast %3 : vector<1x512xf32> to vector<128x512xf32>
    %5 = arith.addf %2, %4 : vector<128x512xf32>
    %c0_5 = arith.constant 0 : index
    %6 = memref.load %arg1[%c0_5] : memref<3xf32, #tpu.memory_space<smem>>
    %cst_6 = arith.constant 0.000000e+00 : f32
    %7 = vector.broadcast %cst_6 : f32 to vector<128x512xf32>
    %8 = arith.cmpf ogt, %5, %7 : vector<128x512xf32>
    %9 = vector.broadcast %6 : f32 to vector<128x512xf32>
    %10 = arith.mulf %9, %5 : vector<128x512xf32>
    %11 = arith.select %8, %5, %10 : vector<128x512xi1>, vector<128x512xf32>
    %c0_7 = arith.constant 0 : index
    %c0_8 = arith.constant 0 : index
    %12 = vector.load %arg5[%c0_7, %c0_8] : memref<512x512xf32, #tpu.memory_space<vmem>>, vector<512x512xf32>
    %cst_9 = arith.constant dense<0.000000e+00> : vector<128x512xf32>
    %13 = tpu.matmul %11, %12, %cst_9 {dimension_numbers = #tpu.dot_dimension_numbers<[1], [0], [0], [1], [0, 0, 1, 1], [], []>} : vector<128x512xf32>, vector<512x512xf32>, vector<128x512xf32> -> vector<128x512xf32>
    %c0_10 = arith.constant 0 : index
    %c0_11 = arith.constant 0 : index
    %14 = vector.load %arg6[%c0_10, %c0_11] : memref<1x512xf32, #tpu.memory_space<vmem>>, vector<1x512xf32>
    %15 = vector.broadcast %14 : vector<1x512xf32> to vector<128x512xf32>
    %16 = arith.addf %13, %15 : vector<128x512xf32>
    %c1 = arith.constant 1 : index
    %17 = memref.load %arg1[%c1] : memref<3xf32, #tpu.memory_space<smem>>
    %cst_12 = arith.constant 0.000000e+00 : f32
    %18 = vector.broadcast %cst_12 : f32 to vector<128x512xf32>
    %19 = arith.cmpf ogt, %16, %18 : vector<128x512xf32>
    %20 = vector.broadcast %17 : f32 to vector<128x512xf32>
    %21 = arith.mulf %20, %16 : vector<128x512xf32>
    %22 = arith.select %19, %16, %21 : vector<128x512xi1>, vector<128x512xf32>
    %c0_13 = arith.constant 0 : index
    %c0_14 = arith.constant 0 : index
    %23 = vector.load %arg7[%c0_13, %c0_14] : memref<512x512xf32, #tpu.memory_space<vmem>>, vector<512x512xf32>
    %cst_15 = arith.constant dense<0.000000e+00> : vector<128x512xf32>
    %24 = tpu.matmul %22, %23, %cst_15 {dimension_numbers = #tpu.dot_dimension_numbers<[1], [0], [0], [1], [0, 0, 1, 1], [], []>} : vector<128x512xf32>, vector<512x512xf32>, vector<128x512xf32> -> vector<128x512xf32>
    %c0_16 = arith.constant 0 : index
    %c0_17 = arith.constant 0 : index
    %25 = vector.load %arg8[%c0_16, %c0_17] : memref<1x512xf32, #tpu.memory_space<vmem>>, vector<1x512xf32>
    %26 = vector.broadcast %25 : vector<1x512xf32> to vector<128x512xf32>
    %27 = arith.addf %24, %26 : vector<128x512xf32>
    %c2 = arith.constant 2 : index
    %28 = memref.load %arg1[%c2] : memref<3xf32, #tpu.memory_space<smem>>
    %cst_18 = arith.constant 0.000000e+00 : f32
    %29 = vector.broadcast %cst_18 : f32 to vector<128x512xf32>
    %30 = arith.cmpf ogt, %27, %29 : vector<128x512xf32>
    %31 = vector.broadcast %28 : f32 to vector<128x512xf32>
    %32 = arith.mulf %31, %27 : vector<128x512xf32>
    %33 = arith.select %30, %27, %32 : vector<128x512xi1>, vector<128x512xf32>
    %c0_19 = arith.constant 0 : index
    %c0_20 = arith.constant 0 : index
    %34 = vector.load %arg9[%c0_19, %c0_20] : memref<512x128xf32, #tpu.memory_space<vmem>>, vector<512x128xf32>
    %cst_21 = arith.constant dense<0.000000e+00> : vector<128x128xf32>
    %35 = tpu.matmul %33, %34, %cst_21 {dimension_numbers = #tpu.dot_dimension_numbers<[1], [0], [0], [1], [0, 0, 1, 1], [], []>} : vector<128x512xf32>, vector<512x128xf32>, vector<128x128xf32> -> vector<128x128xf32>
    %c0_22 = arith.constant 0 : index
    %c0_23 = arith.constant 0 : index
    %36 = vector.load %arg10[%c0_22, %c0_23] : memref<1x128xf32, #tpu.memory_space<vmem>>, vector<1x128xf32>
    %37 = vector.broadcast %36 : vector<1x128xf32> to vector<128x128xf32>
    %38 = arith.addf %35, %37 : vector<128x128xf32>
    %c0_24 = arith.constant 0 : index
    %c0_25 = arith.constant 0 : index
    %39 = vector.load %arg11[%c0_24, %c0_25] : memref<128x128xf32, #tpu.memory_space<vmem>>, vector<128x128xf32>
    tpu.vector_store %arg11[%c0_24, %c0_25], %38 {strides = array<i32>} : memref<128x128xf32, #tpu.memory_space<vmem>>, vector<128x128xf32>,
    return
  }
  func.func @transform_0(%arg0: i32) -> i32 {
    %c0_i32 = arith.constant 0 : i32
    %c0_i32_0 = arith.constant 0 : i32
    return %c0_i32 : i32
  }
  func.func @transform_1(%arg0: i32) -> (i32, i32) {
    %c0_i32 = arith.constant 0 : i32
    %c0_i32_0 = arith.constant 0 : i32
    return %arg0, %c0_i32 : i32, i32
  }
  func.func @transform_2(%arg0: i32) -> (i32, i32) {
    %c0_i32 = arith.constant 0 : i32
    %c0_i32_0 = arith.constant 0 : i32
    %c0_i32_1 = arith.constant 0 : i32
    return %c0_i32, %c0_i32_0 : i32, i32
  }
  func.func @transform_3(%arg0: i32) -> (i32, i32) {
    %c0_i32 = arith.constant 0 : i32
    %c0_i32_0 = arith.constant 0 : i32
    %c0_i32_1 = arith.constant 0 : i32
    return %c0_i32, %c0_i32_0 : i32, i32
  }
  func.func @transform_4(%arg0: i32) -> (i32, i32) {
    %c0_i32 = arith.constant 0 : i32
    %c0_i32_0 = arith.constant 0 : i32
    %c0_i32_1 = arith.constant 0 : i32
    return %c0_i32, %c0_i32_0 : i32, i32
  }
  func.func @transform_5(%arg0: i32) -> (i32, i32) {
    %c0_i32 = arith.constant 0 : i32
    %c0_i32_0 = arith.constant 0 : i32
    %c0_i32_1 = arith.constant 0 : i32
    return %c0_i32, %c0_i32_0 : i32, i32
  }
  func.func @transform_6(%arg0: i32) -> (i32, i32) {
    %c0_i32 = arith.constant 0 : i32
    %c0_i32_0 = arith.constant 0 : i32
    %c0_i32_1 = arith.constant 0 : i32
    return %c0_i32, %c0_i32_0 : i32, i32
  }
  func.func @transform_7(%arg0: i32) -> (i32, i32) {
    %c0_i32 = arith.constant 0 : i32
    %c0_i32_0 = arith.constant 0 : i32
    %c0_i32_1 = arith.constant 0 : i32
    return %c0_i32, %c0_i32_0 : i32, i32
  }
  func.func @transform_8(%arg0: i32) -> (i32, i32) {
    %c0_i32 = arith.constant 0 : i32
    %c0_i32_0 = arith.constant 0 : i32
    %c0_i32_1 = arith.constant 0 : i32
    return %c0_i32, %c0_i32_0 : i32, i32
  }
  func.func @transform_9(%arg0: i32) -> (i32, i32) {
    %c0_i32 = arith.constant 0 : i32
    %c0_i32_0 = arith.constant 0 : i32
    %c0_i32_1 = arith.constant 0 : i32
    return %c0_i32, %c0_i32_0 : i32, i32
  }
  func.func @transform_10(%arg0: i32) -> (i32, i32) {
    %c0_i32 = arith.constant 0 : i32
    %c0_i32_0 = arith.constant 0 : i32
    return %arg0, %c0_i32 : i32, i32
  }
}

</mosaic_0001>

<bundles_post_ra>
// kernel: fnn_forward.1
= control target key start
LH: loop header
LB: loop body
LE: loop exit
PB: predicated region body
PF: predicated region fallthrough
CT: control target
= control target key end

     0   :  { %15 = vsyncpa [#allocation4], 0  ;;  %s6046_s0 = inlined_call_operand.vmem [shape: f32[3], index: 0, kind: input, shape index: {}]   ;;  %s6047_s1 = inlined_call_operand.vmem [shape: f32[128,128], index: 1, kind: input, shape index: {}]   ;;  %s6048_s2 = inlined_call_operand.hbm [shape: f32[128,512], index: 2, kind: input, shape index: {}]   ;;  %s6049_s3 = inlined_call_operand.vmem [shape: f32[1,512], index: 3, kind: input, shape index: {}]   ;;  %s6050_s4 = inlined_call_operand.hbm [shape: f32[512,512], index: 4, kind: input, shape index: {}]   ;;  %s6051_s5 = inlined_call_operand.vmem [shape: f32[1,512], index: 5, kind: input, shape index: {}]   ;;  %s6052_s6 = inlined_call_operand.hbm [shape: f32[512,512], index: 6, kind: input, shape index: {}]   ;;  %s6053_s7 = inlined_call_operand.vmem [shape: f32[1,512], index: 7, kind: input, shape index: {}]   ;;  %s6054_s8 = inlined_call_operand.hbm [shape: f32[512,128], index: 8, kind: input, shape index: {}]   ;;  %s6055_s9 = inlined_call_operand.vmem [shape: f32[1,128], index: 9, kind: input, shape index: {}]   ;;  %s6056_s10 = inlined_call_operand.vmem [shape: f32[128,128], index: 10, kind: output, shape index: {}]  }
   0x1   :  { %16 = vsyncpa [#allocation3], 0 }
   0x2   :  { %17 = vsyncpa [#allocation7], 0 }
   0x3   :  { %18 = vsyncpa [#allocation10], 0  ;;  %s49_s15 = sshll.u32 %s6050_s4, 4  ;;  %s4137_s16 = smov [#allocation6]   ;;  %s50_s15 = int_to_ptr.hbm [resolvable:$true] %s49_s15 }
   0x4   :  { %s51_s17 = sshll.u32 %s4137_s16, 4  ;;  %s24_s20 = sshll.u32 %s6046_s0, 4  ;;  %s52_s17 = int_to_ptr.vmem [resolvable:$true] %s51_s17  ;;  %s25_s20 = int_to_ptr.vmem [resolvable:$true] %s24_s20 }
   0x5   :  { %s4138_s21 = smov 512   ;;  %s4139_s22 = smov 32  }
   0x6   :  { %57 = dma.hbm_to_vmem [thread:$0]  %s50_s15, 32768, %s52_s17, [#allocation7], %s4138_s21, %s4138_s21, %s4139_s22  }
   0x7   :  { %s4140_s23 = smov [#allocation2]   ;;  %s34_s26 = sshll.u32 %s6048_s2, 4  ;;  %s35_s26 = int_to_ptr.hbm [resolvable:$true] %s34_s26 }
   0x8   :  { %27 = dma.vmem_to_smem %s25_s20, 16, %s4140_s23, [#allocation4]  }
   0x9   :  { %s4141_s4 = smov [#allocation5]   ;;  %s64_s30 = sshll.u32 %s6052_s6, 4  ;;  %s65_s30 = int_to_ptr.hbm [resolvable:$true] %s64_s30 }
   0xa   :  { %s36_s27 = sshll.u32 %s4141_s4, 4  ;;  %s4142_s0 = smov [#allocation8]   ;;  %s37_s27 = int_to_ptr.vmem [resolvable:$true] %s36_s27 }
   0xb   :  { %42 = dma.hbm_to_vmem [thread:$0]  %s35_s26, 8192, %s37_s27, [#allocation3], %s4138_s21, %s4138_s21, %s4139_s22  }
   0xc   :  { %s66_s11 = sshll.u32 %s4142_s0, 4  ;;  %s79_s14 = sshll.u32 %s6054_s8, 4  ;;  %s67_s11 = int_to_ptr.vmem [resolvable:$true] %s66_s11  ;;  %s80_s14 = int_to_ptr.hbm [resolvable:$true] %s79_s14 }
   0xd   :  { %72 = dma.hbm_to_vmem [thread:$0]  %s65_s30, 32768, %s67_s11, [#allocation7], %s4138_s21, %s4138_s21, %s4139_s22  }
   0xe   :  { %s4143_s2 = smov [#allocation9]   ;;  %s4144_s16 = smov 128  }
   0xf   :  { %s81_s15 = sshll.u32 %s4143_s2, 4  ;;  %s4145_s17 = smov 8   ;;  %s82_s15 = int_to_ptr.vmem [resolvable:$true] %s81_s15 }
  0x10   :  { %87 = dma.hbm_to_vmem [thread:$0]  %s80_s14, 8192, %s82_s15, [#allocation10], %s4144_s16, %s4144_s16, %s4145_s17  }
  0x11   :  { %4129 = dma.done.wait [#allocation4], 16  }
  0x12   :  { %4130 = vsyncadd [#allocation4], 4294967280 }
  0x13   :  { %4131 = dma.done.wait [#allocation3], 8192  }
  0x14   :  { %4132 = vsyncadd [#allocation3], 4294959104 }
  0x15   :  { %4133 = dma.done.wait [#allocation7], 65536  }
  0x16   :  { %4134 = vsyncadd [#allocation7], 4294901760 }
  0x17   :  { %4135 = dma.done.wait [#allocation10], 8192  }
  0x18   :  { %4136 = vsyncadd [#allocation10], 4294959104 }
  0x19   :  { %110 = sfence }
  0x1a   :  { %v187_v0 = vld [vmem:[#allocation5 + $0x1e0] sm:$0xff]  ;;  %v188_v1 = vld [vmem:[#allocation5 + $0x1e8] sm:$0xff]  ;;  %v189_v2 = vld [vmem:[#allocation5 + $0x1f0] sm:$0xff]  ;;  %s461_s23 = sld [smem:[#allocation2]] }
  0x1b   :  { %201 = vmatpush.msra.mxu0 %v187_v0  ;;  %266 = vmatpush.msra.mxu1 %v188_v1  ;;  %v190_v3 = vld [vmem:[#allocation5 + $0x1f8] sm:$0xff]  ;;  %v183_v4 = vld [vmem:[#allocation5 + $0x1c0] sm:$0xff]  ;;  %v184_v5 = vld [vmem:[#allocation5 + $0x1c8] sm:$0xff] }
  0x1c   :  { %331 = vmatpush.msra.mxu2 %v189_v2  ;;  %396 = vmatpush.msra.mxu3 %v190_v3  ;;  %v185_v6 = vld [vmem:[#allocation5 + $0x1d0] sm:$0xff]  ;;  %v186_v7 = vld [vmem:[#allocation5 + $0x1d8] sm:$0xff]  ;;  %v179_v8 = vld [vmem:[#allocation5 + $0x1a0] sm:$0xff] }
  0x1d   :  { %202 = vmatpush.msra.mxu0 %v183_v4  ;;  %267 = vmatpush.msra.mxu1 %v184_v5  ;;  %v180_v9 = vld [vmem:[#allocation5 + $0x1a8] sm:$0xff]  ;;  %v181_v10 = vld [vmem:[#allocation5 + $0x1b0] sm:$0xff]  ;;  %v182_v11 = vld [vmem:[#allocation5 + $0x1b8] sm:$0xff] }
  0x1e   :  { %332 = vmatpush.msra.mxu2 %v185_v6  ;;  %397 = vmatpush.msra.mxu3 %v186_v7  ;;  %v175_v12 = vld [vmem:[#allocation5 + $0x180] sm:$0xff]  ;;  %v176_v13 = vld [vmem:[#allocation5 + $0x188] sm:$0xff]  ;;  %v177_v14 = vld [vmem:[#allocation5 + $0x190] sm:$0xff] }
  0x1f   :  { %203 = vmatpush.msra.mxu0 %v179_v8  ;;  %268 = vmatpush.msra.mxu1 %v180_v9  ;;  %v178_v15 = vld [vmem:[#allocation5 + $0x198] sm:$0xff]  ;;  %v171_v16 = vld [vmem:[#allocation5 + $0x160] sm:$0xff]  ;;  %v172_v17 = vld [vmem:[#allocation5 + $0x168] sm:$0xff] }
  0x20   :  { %333 = vmatpush.msra.mxu2 %v181_v10  ;;  %398 = vmatpush.msra.mxu3 %v182_v11  ;;  %v173_v18 = vld [vmem:[#allocation5 + $0x170] sm:$0xff]  ;;  %v174_v19 = vld [vmem:[#allocation5 + $0x178] sm:$0xff]  ;;  %v167_v20 = vld [vmem:[#allocation5 + $0x140] sm:$0xff] }
  0x21   :  { %204 = vmatpush.msra.mxu0 %v175_v12  ;;  %269 = vmatpush.msra.mxu1 %v176_v13  ;;  %v168_v21 = vld [vmem:[#allocation5 + $0x148] sm:$0xff]  ;;  %v169_v22 = vld [vmem:[#allocation5 + $0x150] sm:$0xff]  ;;  %v170_v23 = vld [vmem:[#allocation5 + $0x158] sm:$0xff] }
  0x22   :  { %334 = vmatpush.msra.mxu2 %v177_v14  ;;  %399 = vmatpush.msra.mxu3 %v178_v15  ;;  %v163_v24 = vld [vmem:[#allocation5 + $0x120] sm:$0xff]  ;;  %v164_v25 = vld [vmem:[#allocation5 + $0x128] sm:$0xff]  ;;  %v165_v26 = vld [vmem:[#allocation5 + $0x130] sm:$0xff] }
  0x23   :  { %205 = vmatpush.msra.mxu0 %v171_v16  ;;  %270 = vmatpush.msra.mxu1 %v172_v17  ;;  %v166_v27 = vld [vmem:[#allocation5 + $0x138] sm:$0xff]  ;;  %v159_v28 = vld [vmem:[#allocation5 + $0x100] sm:$0xff]  ;;  %v160_v29 = vld [vmem:[#allocation5 + $0x108] sm:$0xff] }
  0x24   :  { %335 = vmatpush.msra.mxu2 %v173_v18  ;;  %400 = vmatpush.msra.mxu3 %v174_v19  ;;  %v161_v30 = vld [vmem:[#allocation5 + $0x110] sm:$0xff]  ;;  %v162_v31 = vld [vmem:[#allocation5 + $0x118] sm:$0xff]  ;;  %v155_v32 = vld [vmem:[#allocation5 + $0xe0] sm:$0xff] }
  0x25   :  { %206 = vmatpush.msra.mxu0 %v167_v20  ;;  %271 = vmatpush.msra.mxu1 %v168_v21  ;;  %v156_v33 = vld [vmem:[#allocation5 + $0xe8] sm:$0xff]  ;;  %v157_v34 = vld [vmem:[#allocation5 + $0xf0] sm:$0xff]  ;;  %v158_v35 = vld [vmem:[#allocation5 + $0xf8] sm:$0xff] }
  0x26   :  { %336 = vmatpush.msra.mxu2 %v169_v22  ;;  %401 = vmatpush.msra.mxu3 %v170_v23  ;;  %v151_v36 = vld [vmem:[#allocation5 + $0xc0] sm:$0xff]  ;;  %v152_v37 = vld [vmem:[#allocation5 + $0xc8] sm:$0xff]  ;;  %v153_v38 = vld [vmem:[#allocation5 + $0xd0] sm:$0xff] }
  0x27   :  { %207 = vmatpush.msra.mxu0 %v163_v24  ;;  %272 = vmatpush.msra.mxu1 %v164_v25  ;;  %v154_v39 = vld [vmem:[#allocation5 + $0xd8] sm:$0xff]  ;;  %v147_v40 = vld [vmem:[#allocation5 + $0xa0] sm:$0xff]  ;;  %v148_v41 = vld [vmem:[#allocation5 + $0xa8] sm:$0xff] }
  0x28   :  { %337 = vmatpush.msra.mxu2 %v165_v26  ;;  %402 = vmatpush.msra.mxu3 %v166_v27  ;;  %v149_v42 = vld [vmem:[#allocation5 + $0xb0] sm:$0xff]  ;;  %v150_v43 = vld [vmem:[#allocation5 + $0xb8] sm:$0xff]  ;;  %v143_v44 = vld [vmem:[#allocation5 + $0x80] sm:$0xff] }
  0x29   :  { %208 = vmatpush.msra.mxu0 %v159_v28  ;;  %273 = vmatpush.msra.mxu1 %v160_v29  ;;  %v144_v45 = vld [vmem:[#allocation5 + $0x88] sm:$0xff]  ;;  %v145_v46 = vld [vmem:[#allocation5 + $0x90] sm:$0xff]  ;;  %v146_v47 = vld [vmem:[#allocation5 + $0x98] sm:$0xff] }
  0x2a   :  { %338 = vmatpush.msra.mxu2 %v161_v30  ;;  %403 = vmatpush.msra.mxu3 %v162_v31  ;;  %v139_v48 = vld [vmem:[#allocation5 + $0x60] sm:$0xff]  ;;  %v140_v49 = vld [vmem:[#allocation5 + $0x68] sm:$0xff]  ;;  %v141_v50 = vld [vmem:[#allocation5 + $0x70] sm:$0xff] }
  0x2b   :  { %209 = vmatpush.msra.mxu0 %v155_v32  ;;  %274 = vmatpush.msra.mxu1 %v156_v33  ;;  %v142_v51 = vld [vmem:[#allocation5 + $0x78] sm:$0xff]  ;;  %v135_v52 = vld [vmem:[#allocation5 + $0x40] sm:$0xff]  ;;  %v136_v53 = vld [vmem:[#allocation5 + $0x48] sm:$0xff] }
  0x2c   :  { %339 = vmatpush.msra.mxu2 %v157_v34  ;;  %404 = vmatpush.msra.mxu3 %v158_v35  ;;  %v137_v54 = vld [vmem:[#allocation5 + $0x50] sm:$0xff]  ;;  %v138_v55 = vld [vmem:[#allocation5 + $0x58] sm:$0xff]  ;;  %v131_v56 = vld [vmem:[#allocation5 + $0x20] sm:$0xff] }
  0x2d   :  { %210 = vmatpush.msra.mxu0 %v151_v36  ;;  %275 = vmatpush.msra.mxu1 %v152_v37  ;;  %v132_v57 = vld [vmem:[#allocation5 + $0x28] sm:$0xff]  ;;  %v133_v58 = vld [vmem:[#allocation5 + $0x30] sm:$0xff]  ;;  %v134_v59 = vld [vmem:[#allocation5 + $0x38] sm:$0xff] }
  0x2e   :  { %340 = vmatpush.msra.mxu2 %v153_v38  ;;  %405 = vmatpush.msra.mxu3 %v154_v39  ;;  %v127_v60 = vld [vmem:[#allocation5] sm:$0xff]  ;;  %v128_v61 = vld [vmem:[#allocation5 + $0x8] sm:$0xff]  ;;  %v129_v62 = vld [vmem:[#allocation5 + $0x10] sm:$0xff] }
  0x2f   :  { %211 = vmatpush.msra.mxu0 %v147_v40  ;;  %276 = vmatpush.msra.mxu1 %v148_v41  ;;  %v130_v63 = vld [vmem:[#allocation5 + $0x18] sm:$0xff]  ;;  %v111_v0 = vld [vmem:[%s6047_s1] sm:$0xff]  ;;  %v112_v13 = vld [vmem:[%s6047_s1 + $0x8] sm:$0xff] }
  0x30   :  { %341 = vmatpush.msra.mxu2 %v149_v42  ;;  %406 = vmatpush.msra.mxu3 %v150_v43  ;;  %v843_v1 = vld [vmem:[#allocation6 + $0x5e0] sm:$0xff]  ;;  %v113_v22 = vld [vmem:[%s6047_s1 + $0x10] sm:$0xff]  ;;  %v114_v27 = vld [vmem:[%s6047_s1 + $0x18] sm:$0xff] }
  0x31   :  { %212 = vmatpush.msra.mxu0 %v143_v44  ;;  %277 = vmatpush.msra.mxu1 %v144_v45  ;;  %v715_v2 = vld [vmem:[#allocation6 + $0x1e0] sm:$0xff]  ;;  %v116_v37 = vld [vmem:[%s6047_s1 + $0x28] sm:$0xff]  ;;  %v117_v42 = vld [vmem:[%s6047_s1 + $0x30] sm:$0xff] }
  0x32   :  { %342 = vmatpush.msra.mxu2 %v145_v46  ;;  %407 = vmatpush.msra.mxu3 %v146_v47  ;;  %v907_v3 = vld [vmem:[#allocation6 + $0x7e0] sm:$0xff]  ;;  %v118_v47 = vld [vmem:[%s6047_s1 + $0x38] sm:$0xff] }
  0x33   :  { %213 = vmatpush.msra.mxu0 %v139_v48  ;;  %278 = vmatpush.msra.mxu1 %v140_v49  ;;  %v779_v4 = vld [vmem:[#allocation6 + $0x3e0] sm:$0xff] }
  0x34   :  { %343 = vmatpush.msra.mxu2 %v141_v50  ;;  %408 = vmatpush.msra.mxu3 %v142_v51  ;;  %v839_v5 = vld [vmem:[#allocation6 + $0x5c0] sm:$0xff] }
  0x35   :  { %214 = vmatpush.msra.mxu0 %v135_v52  ;;  %279 = vmatpush.msra.mxu1 %v136_v53  ;;  %v711_v6 = vld [vmem:[#allocation6 + $0x1c0] sm:$0xff] }
  0x36   :  { %344 = vmatpush.msra.mxu2 %v137_v54  ;;  %409 = vmatpush.msra.mxu3 %v138_v55  ;;  %v903_v7 = vld [vmem:[#allocation6 + $0x7c0] sm:$0xff] }
  0x37   :  { %215 = vmatpush.msra.mxu0 %v131_v56  ;;  %280 = vmatpush.msra.mxu1 %v132_v57  ;;  %v775_v8 = vld [vmem:[#allocation6 + $0x3c0] sm:$0xff]  ;;  %v120_v57 = vld [vmem:[%s6047_s1 + $0x48] sm:$0xff] }
  0x38   :  { %345 = vmatpush.msra.mxu2 %v133_v58  ;;  %410 = vmatpush.msra.mxu3 %v134_v59  ;;  %v835_v9 = vld [vmem:[#allocation6 + $0x5a0] sm:$0xff] }
  0x39   :  { %216 = vmatpush.msra.mxu0 %v127_v60  ;;  %281 = vmatpush.msra.mxu1 %v128_v61  ;;  %v707_v10 = vld [vmem:[#allocation6 + $0x1a0] sm:$0xff] }
  0x3a   :  { %346 = vmatpush.msra.mxu2 %v129_v62  ;;  %411 = vmatpush.msra.mxu3 %v130_v63  ;;  %v899_v11 = vld [vmem:[#allocation6 + $0x7a0] sm:$0xff]  ;;  %v121_v62 = vld [vmem:[%s6047_s1 + $0x50] sm:$0xff] }
  0x3b   :  { %217 = vmatmul.f32.vlgmr.msra.gmra.mxu0 %v111_v0  ;;  %282 = vmatmul.f32.vlgmr.msra.gmra.mxu1 %v111_v0  ;;  %v771_v12 = vld [vmem:[#allocation6 + $0x3a0] sm:$0xff] }
  0x3c   :  { %347 = vmatmul.f32.vlgmr.msra.gmra.mxu2 %v111_v0  ;;  %412 = vmatmul.f32.vlgmr.msra.gmra.mxu3 %v111_v0  ;;  %v831_v14 = vld [vmem:[#allocation6 + $0x580] sm:$0xff] }
  0x3d   :  { %1051 = vmatpush.msrb.mxu2 %v843_v1  ;;  %921 = vmatpush.msrb.mxu0 %v715_v2  ;;  %v703_v15 = vld [vmem:[#allocation6 + $0x180] sm:$0xff] }
  0x3e   :  { %1116 = vmatpush.msrb.mxu3 %v907_v3  ;;  %986 = vmatpush.msrb.mxu1 %v779_v4  ;;  %v895_v16 = vld [vmem:[#allocation6 + $0x780] sm:$0xff]  ;;  %v122_v3 = vld [vmem:[%s6047_s1 + $0x58] sm:$0xff] }
  0x3f   :  { %1052 = vmatpush.msrb.mxu2 %v839_v5  ;;  %922 = vmatpush.msrb.mxu0 %v711_v6  ;;  %v767_v17 = vld [vmem:[#allocation6 + $0x380] sm:$0xff] }
  0x40   :  { %1117 = vmatpush.msrb.mxu3 %v903_v7  ;;  %987 = vmatpush.msrb.mxu1 %v775_v8  ;;  %v827_v18 = vld [vmem:[#allocation6 + $0x560] sm:$0xff] }
  0x41   :  { %1053 = vmatpush.msrb.mxu2 %v835_v9  ;;  %923 = vmatpush.msrb.mxu0 %v707_v10  ;;  %v699_v19 = vld [vmem:[#allocation6 + $0x160] sm:$0xff] }
  0x42   :  { %1118 = vmatpush.msrb.mxu3 %v899_v11  ;;  %988 = vmatpush.msrb.mxu1 %v771_v12  ;;  %v891_v20 = vld [vmem:[#allocation6 + $0x760] sm:$0xff]  ;;  %v124_v12 = vld [vmem:[%s6047_s1 + $0x68] sm:$0xff] }
  0x43   :  { %220 = vmatmul.f32.gmra.mxu0 %v112_v13  ;;  %285 = vmatmul.f32.gmra.mxu1 %v112_v13  ;;  %v763_v21 = vld [vmem:[#allocation6 + $0x360] sm:$0xff] }
  0x44   :  { %350 = vmatmul.f32.gmra.mxu2 %v112_v13  ;;  %415 = vmatmul.f32.gmra.mxu3 %v112_v13  ;;  %v823_v23 = vld [vmem:[#allocation6 + $0x540] sm:$0xff] }
  0x45   :  { %1054 = vmatpush.msrb.mxu2 %v831_v14  ;;  %924 = vmatpush.msrb.mxu0 %v703_v15  ;;  %v695_v24 = vld [vmem:[#allocation6 + $0x140] sm:$0xff]  ;;  %v844_v14 = vld [vmem:[#allocation6 + $0x5e8] sm:$0xff]  ;;  %v125_v15 = vld [vmem:[%s6047_s1 + $0x70] sm:$0xff] }
  0x46   :  { %1119 = vmatpush.msrb.mxu3 %v895_v16  ;;  %989 = vmatpush.msrb.mxu1 %v767_v17  ;;  %v887_v25 = vld [vmem:[#allocation6 + $0x740] sm:$0xff]  ;;  %v716_v16 = vld [vmem:[#allocation6 + $0x1e8] sm:$0xff] }
  0x47   :  { %1055 = vmatpush.msrb.mxu2 %v827_v18  ;;  %925 = vmatpush.msrb.mxu0 %v699_v19  ;;  %v759_v26 = vld [vmem:[#allocation6 + $0x340] sm:$0xff]  ;;  %v908_v17 = vld [vmem:[#allocation6 + $0x7e8] sm:$0xff] }
  0x48   :  { %1120 = vmatpush.msrb.mxu3 %v891_v20  ;;  %990 = vmatpush.msrb.mxu1 %v763_v21  ;;  %v819_v28 = vld [vmem:[#allocation6 + $0x520] sm:$0xff]  ;;  %v780_v18 = vld [vmem:[#allocation6 + $0x3e8] sm:$0xff]  ;;  %v126_v20 = vld [vmem:[%s6047_s1 + $0x78] sm:$0xff] }
  0x49   :  { %1056 = vmatpush.msrb.mxu2 %v823_v23  ;;  %926 = vmatpush.msrb.mxu0 %v695_v24  ;;  %v691_v29 = vld [vmem:[#allocation6 + $0x120] sm:$0xff]  ;;  %v840_v19 = vld [vmem:[#allocation6 + $0x5c8] sm:$0xff] }
  0x4a   :  { %1121 = vmatpush.msrb.mxu3 %v887_v25  ;;  %991 = vmatpush.msrb.mxu1 %v759_v26  ;;  %v883_v30 = vld [vmem:[#allocation6 + $0x720] sm:$0xff]  ;;  %v904_v23 = vld [vmem:[#allocation6 + $0x7c8] sm:$0xff] }
  0x4b   :  { %223 = vmatmul.f32.gmra.mxu0 %v113_v22  ;;  %288 = vmatmul.f32.gmra.mxu1 %v113_v22  ;;  %v755_v31 = vld [vmem:[#allocation6 + $0x320] sm:$0xff]  ;;  %v776_v24 = vld [vmem:[#allocation6 + $0x3c8] sm:$0xff] }
  0x4c   :  { %353 = vmatmul.f32.gmra.mxu2 %v113_v22  ;;  %418 = vmatmul.f32.gmra.mxu3 %v113_v22  ;;  %v115_v32 = vld [vmem:[%s6047_s1 + $0x20] sm:$0xff]  ;;  %v712_v22 = vld [vmem:[#allocation6 + $0x1c8] sm:$0xff] }
  0x4d   :  { %1057 = vmatpush.msrb.mxu2 %v819_v28  ;;  %927 = vmatpush.msrb.mxu0 %v691_v29  ;;  %v815_v33 = vld [vmem:[#allocation6 + $0x500] sm:$0xff]  ;;  %v4271_v29 = vstv %s461_s23 }
  0x4e   :  { %1122 = vmatpush.msrb.mxu3 %v883_v30  ;;  %992 = vmatpush.msrb.mxu1 %v755_v31  ;;  %v687_v34 = vld [vmem:[#allocation6 + $0x100] sm:$0xff] }
  0x4f   :  { %v879_v35 = vld [vmem:[#allocation6 + $0x700] sm:$0xff]  ;;  %1058 = vmatpush.msrb.mxu2 %v815_v33  ;;  %928 = vmatpush.msrb.mxu0 %v687_v34  ;;  %v708_v33 = vld [vmem:[#allocation6 + $0x1a8] sm:$0xff] }
  0x50   :  { %v751_v36 = vld [vmem:[#allocation6 + $0x300] sm:$0xff]  ;;  %1123 = vmatpush.msrb.mxu3 %v879_v35  ;;  %v900_v34 = vld [vmem:[#allocation6 + $0x7a8] sm:$0xff] }
  0x51   :  { %993 = vmatpush.msrb.mxu1 %v751_v36  ;;  %v811_v38 = vld [vmem:[#allocation6 + $0x4e0] sm:$0xff] }
  0x52   :  { %v683_v39 = vld [vmem:[#allocation6 + $0xe0] sm:$0xff]  ;;  %1059 = vmatpush.msrb.mxu2 %v811_v38 }
  0x53   :  { %226 = vmatmul.f32.gmra.mxu0 %v114_v27  ;;  %291 = vmatmul.f32.gmra.mxu1 %v114_v27  ;;  %v875_v40 = vld [vmem:[#allocation6 + $0x6e0] sm:$0xff] }
  0x54   :  { %356 = vmatmul.f32.gmra.mxu2 %v114_v27  ;;  %421 = vmatmul.f32.gmra.mxu3 %v114_v27  ;;  %v747_v41 = vld [vmem:[#allocation6 + $0x2e0] sm:$0xff]  ;;  %v836_v27 = vld [vmem:[#allocation6 + $0x5a8] sm:$0xff] }
  0x55   :  { %929 = vmatpush.msrb.mxu0 %v683_v39  ;;  %1124 = vmatpush.msrb.mxu3 %v875_v40  ;;  %v807_v43 = vld [vmem:[#allocation6 + $0x4c0] sm:$0xff] }
  0x56   :  { %994 = vmatpush.msrb.mxu1 %v747_v41  ;;  %v679_v44 = vld [vmem:[#allocation6 + $0xc0] sm:$0xff]  ;;  %1060 = vmatpush.msrb.mxu2 %v807_v43 }
  0x57   :  { %v871_v45 = vld [vmem:[#allocation6 + $0x6c0] sm:$0xff]  ;;  %930 = vmatpush.msrb.mxu0 %v679_v44 }
  0x58   :  { %v743_v46 = vld [vmem:[#allocation6 + $0x2c0] sm:$0xff]  ;;  %1125 = vmatpush.msrb.mxu3 %v871_v45 }
  0x59   :  { %995 = vmatpush.msrb.mxu1 %v743_v46  ;;  %v803_v48 = vld [vmem:[#allocation6 + $0x4a0] sm:$0xff] }
  0x5a   :  { %v675_v49 = vld [vmem:[#allocation6 + $0xa0] sm:$0xff]  ;;  %1061 = vmatpush.msrb.mxu2 %v803_v48 }
  0x5b   :  { %229 = vmatmul.f32.gmra.mxu0 %v115_v32  ;;  %294 = vmatmul.f32.gmra.mxu1 %v115_v32  ;;  %v867_v50 = vld [vmem:[#allocation6 + $0x6a0] sm:$0xff] }
  0x5c   :  { %359 = vmatmul.f32.gmra.mxu2 %v115_v32  ;;  %424 = vmatmul.f32.gmra.mxu3 %v115_v32  ;;  %v739_v51 = vld [vmem:[#allocation6 + $0x2a0] sm:$0xff] }
  0x5d   :  { %931 = vmatpush.msrb.mxu0 %v675_v49  ;;  %1126 = vmatpush.msrb.mxu3 %v867_v50  ;;  %v119_v52 = vld [vmem:[%s6047_s1 + $0x40] sm:$0xff] }
  0x5e   :  { %996 = vmatpush.msrb.mxu1 %v739_v51  ;;  %v799_v53 = vld [vmem:[#allocation6 + $0x480] sm:$0xff] }
  0x5f   :  { %v671_v54 = vld [vmem:[#allocation6 + $0x80] sm:$0xff]  ;;  %1062 = vmatpush.msrb.mxu2 %v799_v53  ;;  %v704_v53 = vld [vmem:[#allocation6 + $0x188] sm:$0xff] }
  0x60   :  { %v863_v55 = vld [vmem:[#allocation6 + $0x680] sm:$0xff]  ;;  %932 = vmatpush.msrb.mxu0 %v671_v54  ;;  %v896_v54 = vld [vmem:[#allocation6 + $0x788] sm:$0xff] }
  0x61   :  { %v735_v56 = vld [vmem:[#allocation6 + $0x280] sm:$0xff]  ;;  %1127 = vmatpush.msrb.mxu3 %v863_v55 }
  0x62   :  { %997 = vmatpush.msrb.mxu1 %v735_v56  ;;  %v795_v58 = vld [vmem:[#allocation6 + $0x460] sm:$0xff] }
  0x63   :  { %232 = vmatmul.f32.gmra.mxu0 %v116_v37  ;;  %297 = vmatmul.f32.gmra.mxu1 %v116_v37  ;;  %v667_v59 = vld [vmem:[#allocation6 + $0x60] sm:$0xff] }
  0x64   :  { %362 = vmatmul.f32.gmra.mxu2 %v116_v37  ;;  %427 = vmatmul.f32.gmra.mxu3 %v116_v37  ;;  %v859_v60 = vld [vmem:[#allocation6 + $0x660] sm:$0xff]  ;;  %v772_v37 = vld [vmem:[#allocation6 + $0x3a8] sm:$0xff] }
  0x65   :  { %1063 = vmatpush.msrb.mxu2 %v795_v58  ;;  %933 = vmatpush.msrb.mxu0 %v667_v59  ;;  %v731_v61 = vld [vmem:[#allocation6 + $0x260] sm:$0xff] }
  0x66   :  { %1128 = vmatpush.msrb.mxu3 %v859_v60  ;;  %998 = vmatpush.msrb.mxu1 %v731_v61  ;;  %v791_v63 = vld [vmem:[#allocation6 + $0x440] sm:$0xff] }
  0x67   :  { %v663_v0 = vld [vmem:[#allocation6 + $0x40] sm:$0xff]  ;;  %1064 = vmatpush.msrb.mxu2 %v791_v63 }
  0x68   :  { %v855_v1 = vld [vmem:[#allocation6 + $0x640] sm:$0xff]  ;;  %934 = vmatpush.msrb.mxu0 %v663_v0 }
  0x69   :  { %v727_v2 = vld [vmem:[#allocation6 + $0x240] sm:$0xff]  ;;  %1129 = vmatpush.msrb.mxu3 %v855_v1 }
  0x6a   :  { %999 = vmatpush.msrb.mxu1 %v727_v2  ;;  %v787_v4 = vld [vmem:[#allocation6 + $0x420] sm:$0xff] }
  0x6b   :  { %235 = vmatmul.f32.gmra.mxu0 %v117_v42  ;;  %300 = vmatmul.f32.gmra.mxu1 %v117_v42  ;;  %v659_v5 = vld [vmem:[#allocation6 + $0x20] sm:$0xff] }
  0x6c   :  { %365 = vmatmul.f32.gmra.mxu2 %v117_v42  ;;  %430 = vmatmul.f32.gmra.mxu3 %v117_v42  ;;  %v851_v6 = vld [vmem:[#allocation6 + $0x620] sm:$0xff]  ;;  %v832_v42 = vld [vmem:[#allocation6 + $0x588] sm:$0xff] }
  0x6d   :  { %1065 = vmatpush.msrb.mxu2 %v787_v4  ;;  %935 = vmatpush.msrb.mxu0 %v659_v5  ;;  %v123_v7 = vld [vmem:[%s6047_s1 + $0x60] sm:$0xff] }
  0x6e   :  { %1130 = vmatpush.msrb.mxu3 %v851_v6  ;;  %v723_v8 = vld [vmem:[#allocation6 + $0x220] sm:$0xff] }
  0x6f   :  { %v783_v9 = vld [vmem:[#allocation6 + $0x400] sm:$0xff]  ;;  %1000 = vmatpush.msrb.mxu1 %v723_v8 }
  0x70   :  { %v655_v10 = vld [vmem:[#allocation6] sm:$0xff]  ;;  %1066 = vmatpush.msrb.mxu2 %v783_v9  ;;  %v700_v9 = vld [vmem:[#allocation6 + $0x168] sm:$0xff] }
  0x71   :  { %v719_v11 = vld [vmem:[#allocation6 + $0x200] sm:$0xff]  ;;  %936 = vmatpush.msrb.mxu0 %v655_v10  ;;  %v892_v10 = vld [vmem:[#allocation6 + $0x768] sm:$0xff] }
  0x72   :  { %1001 = vmatpush.msrb.mxu1 %v719_v11  ;;  %v847_v13 = vld [vmem:[#allocation6 + $0x600] sm:$0xff]  ;;  %1311 = vmatpush.msra.mxu2 %v844_v14 }
  0x73   :  { %238 = vmatmul.f32.gmra.mxu0 %v118_v47  ;;  %303 = vmatmul.f32.gmra.mxu1 %v118_v47  ;;  %v191_v21 = vld [vmem:[%s6049_s3] sm:$0xf] }
  0x74   :  { %368 = vmatmul.f32.gmra.mxu2 %v118_v47  ;;  %433 = vmatmul.f32.gmra.mxu3 %v118_v47  ;;  %v4267_v25 = vperm.slane %v191_v21, 0  ;;  %v4269_v26 = vperm.slane %v191_v21, 1  ;;  %v4277_v38 = vperm.slane %v191_v21, 2  ;;  %v4279_v39 = vperm.slane %v191_v21, 3 }
  0x75   :  { %1131 = vmatpush.msrb.mxu3 %v847_v13  ;;  %1181 = vmatpush.msra.mxu0 %v716_v16  ;;  %v764_v13 = vld [vmem:[#allocation6 + $0x368] sm:$0xff] }
  0x76   :  { %1246 = vmatpush.msra.mxu1 %v780_v18  ;;  %1312 = vmatpush.msra.mxu2 %v840_v19  ;;  %v824_v18 = vld [vmem:[#allocation6 + $0x548] sm:$0xff] }
  0x77   :  { %1376 = vmatpush.msra.mxu3 %v908_v17  ;;  %1182 = vmatpush.msra.mxu0 %v712_v22 }
  0x78   :  { %1247 = vmatpush.msra.mxu1 %v776_v24  ;;  %1313 = vmatpush.msra.mxu2 %v836_v27 }
  0x79   :  { %1377 = vmatpush.msra.mxu3 %v904_v23  ;;  %1183 = vmatpush.msra.mxu0 %v708_v33  ;;  %v888_v33 = vld [vmem:[#allocation6 + $0x748] sm:$0xff] }
  0x7a   :  { %1248 = vmatpush.msra.mxu1 %v772_v37  ;;  %1314 = vmatpush.msra.mxu2 %v832_v42 }
  0x7b   :  { %241 = vmatmul.f32.gmra.mxu0 %v119_v52  ;;  %306 = vmatmul.f32.gmra.mxu1 %v119_v52 }
  0x7c   :  { %371 = vmatmul.f32.gmra.mxu2 %v119_v52  ;;  %436 = vmatmul.f32.gmra.mxu3 %v119_v52 }
  0x7d   :  { %1378 = vmatpush.msra.mxu3 %v900_v34  ;;  %1184 = vmatpush.msra.mxu0 %v704_v53 }
  0x7f   :  { %1379 = vmatpush.msra.mxu3 %v896_v54  ;;  %1185 = vmatpush.msra.mxu0 %v700_v9 }
  0x81   :  { %1380 = vmatpush.msra.mxu3 %v892_v10 }
  0x83   :  { %244 = vmatmul.f32.gmra.mxu0 %v120_v57  ;;  %309 = vmatmul.f32.gmra.mxu1 %v120_v57 }
  0x84   :  { %374 = vmatmul.f32.gmra.mxu2 %v120_v57  ;;  %439 = vmatmul.f32.gmra.mxu3 %v120_v57  ;;  %v768_v57 = vld [vmem:[#allocation6 + $0x388] sm:$0xff] }
  0x85   :  { %1249 = vmatpush.msra.mxu1 %v768_v57  ;;  %1381 = vmatpush.msra.mxu3 %v888_v33  ;;  %v884_v57 = vld [vmem:[#allocation6 + $0x728] sm:$0xff] }
  0x87   :  { %1250 = vmatpush.msra.mxu1 %v764_v13  ;;  %1382 = vmatpush.msra.mxu3 %v884_v57 }
  0x8b   :  { %247 = vmatmul.f32.gmra.mxu0 %v121_v62  ;;  %312 = vmatmul.f32.gmra.mxu1 %v121_v62 }
  0x8c   :  { %377 = vmatmul.f32.gmra.mxu2 %v121_v62  ;;  %442 = vmatmul.f32.gmra.mxu3 %v121_v62  ;;  %v828_v62 = vld [vmem:[#allocation6 + $0x568] sm:$0xff] }
  0x8d   :  { %1315 = vmatpush.msra.mxu2 %v828_v62 }
  0x8f   :  { %1316 = vmatpush.msra.mxu2 %v824_v18 }
  0x93   :  { %250 = vmatmul.f32.gmra.mxu0 %v122_v3  ;;  %315 = vmatmul.f32.gmra.mxu1 %v122_v3 }
  0x94   :  { %380 = vmatmul.f32.gmra.mxu2 %v122_v3  ;;  %445 = vmatmul.f32.gmra.mxu3 %v122_v3 }
  0x9b   :  { %253 = vmatmul.f32.gmra.mxu0 %v123_v7  ;;  %318 = vmatmul.f32.gmra.mxu1 %v123_v7 }
  0x9c   :  { %383 = vmatmul.f32.gmra.mxu2 %v123_v7  ;;  %448 = vmatmul.f32.gmra.mxu3 %v123_v7 }
  0xa3   :  { %256 = vmatmul.f32.gmra.mxu0 %v124_v12  ;;  %321 = vmatmul.f32.gmra.mxu1 %v124_v12 }
  0xa4   :  { %386 = vmatmul.f32.gmra.mxu2 %v124_v12  ;;  %451 = vmatmul.f32.gmra.mxu3 %v124_v12 }
  0xab   :  { %259 = vmatmul.f32.gmra.mxu0 %v125_v15  ;;  %324 = vmatmul.f32.gmra.mxu1 %v125_v15 }
  0xac   :  { %389 = vmatmul.f32.gmra.mxu2 %v125_v15  ;;  %454 = vmatmul.f32.gmra.mxu3 %v125_v15 }
  0xb3   :  { %262 = vmatmul.f32.gmra.mxu0 %v126_v20  ;;  %327 = vmatmul.f32.gmra.mxu1 %v126_v20 }
  0xb4   :  { %392 = vmatmul.f32.gmra.mxu2 %v126_v20  ;;  %457 = vmatmul.f32.gmra.mxu3 %v126_v20 }
  0xb8   :  { %v218_v28 = vpop.f32.mrf.mxu0  ;;  %v283_v30 = vpop.f32.mrf.mxu1 }
  0xb9   :  { %v219_v31 = vadd.f32 %v218_v28, %v4267_v25  ;;  %v284_v32 = vadd.f32 %v283_v30, %v4269_v26 }
  0xbb   :  { %v527_v35 = vmul.f32 %v4271_v29, %v219_v31  ;;  %v528_v36 = vmul.f32 %v4271_v29, %v284_v32  ;;  %vm462_vm0 = vcmp.gt.f32.partialorder %v219_v31, 0.0  ;;  %vm463_vm1 = vcmp.gt.f32.partialorder %v284_v32, 0.0 }
  0xbd   :  { %v4281_v40 = vsel %vm462_vm0, %v219_v31, %v527_v35  ;;  %v4283_v41 = vsel %vm463_vm1, %v284_v32, %v528_v36  ;;  %v696_v32 = vld [vmem:[#allocation6 + $0x148] sm:$0xff] }
  0xbe   :  { %6233 = vst [vmem:[#allocation15_spill] sm:$0xff] %v4281_v40  ;;  %937 = vmatmul.f32.vlgmr.msrb.gmra.mxu0 %v4281_v40  ;;  %1002 = vmatmul.f32.vlgmr.msrb.gmra.mxu1 %v4283_v41  ;;  %v760_v36 = vld [vmem:[#allocation6 + $0x348] sm:$0xff] }
  0xbf   :  { %6234 = vst [vmem:[#allocation16_spill] sm:$0xff] %v4283_v41  ;;  %v348_v43 = vpop.f32.mrf.mxu2  ;;  %v413_v44 = vpop.f32.mrf.mxu3  ;;  %1186 = vmatpush.msra.mxu0 %v696_v32  ;;  %1251 = vmatpush.msra.mxu1 %v760_v36  ;;  %v812_v32 = vld [vmem:[#allocation6 + $0x4e8] sm:$0xff] }
  0xc0   :  { %v349_v45 = vadd.f32 %v348_v43, %v4277_v38  ;;  %v414_v46 = vadd.f32 %v413_v44, %v4279_v39  ;;  %v221_v47 = vpop.f32.mrf.mxu0  ;;  %v286_v48 = vpop.f32.mrf.mxu1 }
  0xc1   :  { %v222_v49 = vadd.f32 %v221_v47, %v4267_v25  ;;  %v287_v50 = vadd.f32 %v286_v48, %v4269_v26 }
  0xc2   :  { %v529_v51 = vmul.f32 %v4271_v29, %v349_v45  ;;  %v530_v52 = vmul.f32 %v4271_v29, %v414_v46  ;;  %vm464_vm2 = vcmp.gt.f32.partialorder %v349_v45, 0.0  ;;  %vm465_vm3 = vcmp.gt.f32.partialorder %v414_v46, 0.0 }
  0xc3   :  { %v531_v55 = vmul.f32 %v4271_v29, %v222_v49  ;;  %v532_v56 = vmul.f32 %v4271_v29, %v287_v50  ;;  %vm466_vm4 = vcmp.gt.f32.partialorder %v222_v49, 0.0  ;;  %vm467_vm5 = vcmp.gt.f32.partialorder %v287_v50, 0.0 }
  0xc4   :  { %v4295_v58 = vsel %vm464_vm2, %v349_v45, %v529_v51  ;;  %v4297_v59 = vsel %vm465_vm3, %v414_v46, %v530_v52  ;;  %v820_v45 = vld [vmem:[#allocation6 + $0x528] sm:$0xff] }
  0xc5   :  { %6235 = vst [vmem:[#allocation17_spill] sm:$0xff] %v4295_v58  ;;  %1067 = vmatmul.f32.vlgmr.msrb.gmra.mxu2 %v4295_v58  ;;  %1132 = vmatmul.f32.vlgmr.msrb.gmra.mxu3 %v4297_v59  ;;  %v4301_v60 = vsel %vm466_vm4, %v222_v49, %v531_v55  ;;  %v4303_v61 = vsel %vm467_vm5, %v287_v50, %v532_v56  ;;  %v692_v56 = vld [vmem:[#allocation6 + $0x128] sm:$0xff] }
  0xc6   :  { %6236 = vst [vmem:[#allocation18_spill] sm:$0xff] %v4297_v59  ;;  %940 = vmatmul.f32.gmra.mxu0 %v4301_v60  ;;  %1005 = vmatmul.f32.gmra.mxu1 %v4303_v61 }
  0xc7   :  { %6237 = vst [vmem:[#allocation19_spill] sm:$0xff] %v4303_v61  ;;  %v351_v63 = vpop.f32.mrf.mxu2  ;;  %v416_v0 = vpop.f32.mrf.mxu3  ;;  %1317 = vmatpush.msra.mxu2 %v820_v45  ;;  %1187 = vmatpush.msra.mxu0 %v692_v56 }
  0xc8   :  { %v352_v1 = vadd.f32 %v351_v63, %v4277_v38  ;;  %v417_v2 = vadd.f32 %v416_v0, %v4279_v39  ;;  %v224_v3 = vpop.f32.mrf.mxu0  ;;  %v289_v4 = vpop.f32.mrf.mxu1  ;;  %v756_v0 = vld [vmem:[#allocation6 + $0x328] sm:$0xff] }
  0xc9   :  { %v225_v5 = vadd.f32 %v224_v3, %v4267_v25  ;;  %v290_v6 = vadd.f32 %v289_v4, %v4269_v26  ;;  %1252 = vmatpush.msra.mxu1 %v756_v0  ;;  %v808_v0 = vld [vmem:[#allocation6 + $0x4c8] sm:$0xff] }
  0xca   :  { %v533_v7 = vmul.f32 %v4271_v29, %v352_v1  ;;  %v534_v8 = vmul.f32 %v4271_v29, %v417_v2  ;;  %vm468_vm6 = vcmp.gt.f32.partialorder %v352_v1, 0.0  ;;  %vm469_vm7 = vcmp.gt.f32.partialorder %v417_v2, 0.0 }
  0xcb   :  { %v535_v11 = vmul.f32 %v4271_v29, %v225_v5  ;;  %v536_v12 = vmul.f32 %v4271_v29, %v290_v6  ;;  %vm470_vm8 = vcmp.gt.f32.partialorder %v225_v5, 0.0  ;;  %vm471_vm9 = vcmp.gt.f32.partialorder %v290_v6, 0.0 }
  0xcc   :  { %v4315_v14 = vsel %vm468_vm6, %v352_v1, %v533_v7  ;;  %v4317_v15 = vsel %vm469_vm7, %v417_v2, %v534_v8 }
  0xcd   :  { %1070 = vmatmul.f32.gmra.mxu2 %v4315_v14  ;;  %1135 = vmatmul.f32.gmra.mxu3 %v4317_v15  ;;  %v4321_v16 = vsel %vm470_vm8, %v225_v5, %v535_v11  ;;  %v4323_v17 = vsel %vm471_vm9, %v290_v6, %v536_v12  ;;  %v816_v5 = vld [vmem:[#allocation6 + $0x508] sm:$0xff] }
  0xce   :  { %943 = vmatmul.f32.gmra.mxu0 %v4321_v16  ;;  %1008 = vmatmul.f32.gmra.mxu1 %v4323_v17 }
  0xcf   :  { %v354_v19 = vpop.f32.mrf.mxu2  ;;  %v419_v20 = vpop.f32.mrf.mxu3  ;;  %1318 = vmatpush.msra.mxu2 %v816_v5 }
  0xd0   :  { %v355_v21 = vadd.f32 %v354_v19, %v4277_v38  ;;  %v420_v22 = vadd.f32 %v419_v20, %v4279_v39  ;;  %v227_v23 = vpop.f32.mrf.mxu0  ;;  %v292_v24 = vpop.f32.mrf.mxu1  ;;  %v688_v20 = vld [vmem:[#allocation6 + $0x108] sm:$0xff] }
  0xd1   :  { %v228_v27 = vadd.f32 %v227_v23, %v4267_v25  ;;  %v293_v28 = vadd.f32 %v292_v24, %v4269_v26  ;;  %1188 = vmatpush.msra.mxu0 %v688_v20  ;;  %v752_v24 = vld [vmem:[#allocation6 + $0x308] sm:$0xff]  ;;  %1319 = vmatpush.msra.mxu2 %v812_v32 }
  0xd2   :  { %v537_v30 = vmul.f32 %v4271_v29, %v355_v21  ;;  %v538_v31 = vmul.f32 %v4271_v29, %v420_v22  ;;  %vm472_vm10 = vcmp.gt.f32.partialorder %v355_v21, 0.0  ;;  %vm473_vm11 = vcmp.gt.f32.partialorder %v420_v22, 0.0  ;;  %1253 = vmatpush.msra.mxu1 %v752_v24  ;;  %v872_v20 = vld [vmem:[#allocation6 + $0x6c8] sm:$0xff] }
  0xd3   :  { %v539_v34 = vmul.f32 %v4271_v29, %v228_v27  ;;  %v540_v35 = vmul.f32 %v4271_v29, %v293_v28  ;;  %vm474_vm12 = vcmp.gt.f32.partialorder %v228_v27, 0.0  ;;  %vm475_vm13 = vcmp.gt.f32.partialorder %v293_v28, 0.0  ;;  %1320 = vmatpush.msra.mxu2 %v808_v0 }
  0xd4   :  { %v4335_v37 = vsel %vm472_vm10, %v355_v21, %v537_v30  ;;  %v4337_v42 = vsel %vm473_vm11, %v420_v22, %v538_v31  ;;  %v880_v21 = vld [vmem:[#allocation6 + $0x708] sm:$0xff] }
  0xd5   :  { %1073 = vmatmul.f32.gmra.mxu2 %v4335_v37  ;;  %1138 = vmatmul.f32.gmra.mxu3 %v4337_v42  ;;  %v4341_v43 = vsel %vm474_vm12, %v228_v27, %v539_v34  ;;  %v4343_v44 = vsel %vm475_vm13, %v293_v28, %v540_v35 }
  0xd6   :  { %946 = vmatmul.f32.gmra.mxu0 %v4341_v43  ;;  %1011 = vmatmul.f32.gmra.mxu1 %v4343_v44 }
  0xd7   :  { %v357_v46 = vpop.f32.mrf.mxu2  ;;  %v422_v47 = vpop.f32.mrf.mxu3  ;;  %1383 = vmatpush.msra.mxu3 %v880_v21 }
  0xd8   :  { %v358_v48 = vadd.f32 %v357_v46, %v4277_v38  ;;  %v423_v49 = vadd.f32 %v422_v47, %v4279_v39  ;;  %v230_v50 = vpop.f32.mrf.mxu0  ;;  %v295_v51 = vpop.f32.mrf.mxu1 }
  0xd9   :  { %v231_v52 = vadd.f32 %v230_v50, %v4267_v25  ;;  %v296_v53 = vadd.f32 %v295_v51, %v4269_v26  ;;  %v684_v51 = vld [vmem:[#allocation6 + $0xe8] sm:$0xff] }
  0xda   :  { %v541_v54 = vmul.f32 %v4271_v29, %v358_v48  ;;  %v542_v55 = vmul.f32 %v4271_v29, %v423_v49  ;;  %vm476_vm14 = vcmp.gt.f32.partialorder %v358_v48, 0.0  ;;  %vm477_vm15 = vcmp.gt.f32.partialorder %v423_v49, 0.0  ;;  %1189 = vmatpush.msra.mxu0 %v684_v51 }
  0xdb   :  { %v543_v62 = vmul.f32 %v4271_v29, %v231_v52  ;;  %v544_v63 = vmul.f32 %v4271_v29, %v296_v53  ;;  %vm478_vm0 = vcmp.gt.f32.partialorder %v231_v52, 0.0  ;;  %vm479_vm1 = vcmp.gt.f32.partialorder %v296_v53, 0.0 }
  0xdc   :  { %v4355_v1 = vsel %vm476_vm14, %v358_v48, %v541_v54  ;;  %v4357_v2 = vsel %vm477_vm15, %v423_v49, %v542_v55  ;;  %v748_v55 = vld [vmem:[#allocation6 + $0x2e8] sm:$0xff] }
  0xdd   :  { %1076 = vmatmul.f32.gmra.mxu2 %v4355_v1  ;;  %1141 = vmatmul.f32.gmra.mxu3 %v4357_v2  ;;  %v4361_v3 = vsel %vm478_vm0, %v231_v52, %v543_v62  ;;  %v4363_v4 = vsel %vm479_vm1, %v296_v53, %v544_v63  ;;  %v876_v52 = vld [vmem:[#allocation6 + $0x6e8] sm:$0xff] }
  0xde   :  { %949 = vmatmul.f32.gmra.mxu0 %v4361_v3  ;;  %1014 = vmatmul.f32.gmra.mxu1 %v4363_v4 }
  0xdf   :  { %v360_v6 = vpop.f32.mrf.mxu2  ;;  %v425_v7 = vpop.f32.mrf.mxu3  ;;  %1384 = vmatpush.msra.mxu3 %v876_v52  ;;  %1254 = vmatpush.msra.mxu1 %v748_v55  ;;  %v868_v55 = vld [vmem:[#allocation6 + $0x6a8] sm:$0xff] }
  0xe0   :  { %v361_v8 = vadd.f32 %v360_v6, %v4277_v38  ;;  %v426_v9 = vadd.f32 %v425_v7, %v4279_v39  ;;  %v233_v10 = vpop.f32.mrf.mxu0  ;;  %v298_v11 = vpop.f32.mrf.mxu1 }
  0xe1   :  { %v234_v12 = vadd.f32 %v233_v10, %v4267_v25  ;;  %v299_v13 = vadd.f32 %v298_v11, %v4269_v26  ;;  %1385 = vmatpush.msra.mxu3 %v872_v20 }
  0xe2   :  { %v545_v18 = vmul.f32 %v4271_v29, %v361_v8  ;;  %v546_v19 = vmul.f32 %v4271_v29, %v426_v9  ;;  %vm480_vm2 = vcmp.gt.f32.partialorder %v361_v8, 0.0  ;;  %vm481_vm3 = vcmp.gt.f32.partialorder %v426_v9, 0.0 }
  0xe3   :  { %v547_v22 = vmul.f32 %v4271_v29, %v234_v12  ;;  %v548_v23 = vmul.f32 %v4271_v29, %v299_v13  ;;  %vm482_vm4 = vcmp.gt.f32.partialorder %v234_v12, 0.0  ;;  %vm483_vm5 = vcmp.gt.f32.partialorder %v299_v13, 0.0  ;;  %1386 = vmatpush.msra.mxu3 %v868_v55 }
  0xe4   :  { %v4375_v27 = vsel %vm480_vm2, %v361_v8, %v545_v18  ;;  %v4377_v28 = vsel %vm481_vm3, %v426_v9, %v546_v19  ;;  %v680_v19 = vld [vmem:[#allocation6 + $0xc8] sm:$0xff] }
  0xe5   :  { %1079 = vmatmul.f32.gmra.mxu2 %v4375_v27  ;;  %1144 = vmatmul.f32.gmra.mxu3 %v4377_v28  ;;  %v4381_v30 = vsel %vm482_vm4, %v234_v12, %v547_v22  ;;  %v4383_v31 = vsel %vm483_vm5, %v299_v13, %v548_v23  ;;  %v744_v23 = vld [vmem:[#allocation6 + $0x2c8] sm:$0xff] }
  0xe6   :  { %952 = vmatmul.f32.gmra.mxu0 %v4381_v30  ;;  %1017 = vmatmul.f32.gmra.mxu1 %v4383_v31 }
  0xe7   :  { %v363_v33 = vpop.f32.mrf.mxu2  ;;  %v428_v34 = vpop.f32.mrf.mxu3  ;;  %1190 = vmatpush.msra.mxu0 %v680_v19  ;;  %1255 = vmatpush.msra.mxu1 %v744_v23 }
  0xe8   :  { %v364_v35 = vadd.f32 %v363_v33, %v4277_v38  ;;  %v429_v36 = vadd.f32 %v428_v34, %v4279_v39  ;;  %v236_v45 = vpop.f32.mrf.mxu0  ;;  %v301_v46 = vpop.f32.mrf.mxu1 }
  0xe9   :  { %v237_v47 = vadd.f32 %v236_v45, %v4267_v25  ;;  %v302_v48 = vadd.f32 %v301_v46, %v4269_v26 }
  0xea   :  { %v549_v49 = vmul.f32 %v4271_v29, %v364_v35  ;;  %v550_v50 = vmul.f32 %v4271_v29, %v429_v36  ;;  %vm484_vm6 = vcmp.gt.f32.partialorder %v364_v35, 0.0  ;;  %vm485_vm7 = vcmp.gt.f32.partialorder %v429_v36, 0.0 }
  0xeb   :  { %v551_v53 = vmul.f32 %v4271_v29, %v237_v47  ;;  %v552_v54 = vmul.f32 %v4271_v29, %v302_v48  ;;  %vm486_vm8 = vcmp.gt.f32.partialorder %v237_v47, 0.0  ;;  %vm487_vm9 = vcmp.gt.f32.partialorder %v302_v48, 0.0 }
  0xec   :  { %v4395_v56 = vsel %vm484_vm6, %v364_v35, %v549_v49  ;;  %v4397_v57 = vsel %vm485_vm7, %v429_v36, %v550_v50  ;;  %v804_v35 = vld [vmem:[#allocation6 + $0x4a8] sm:$0xff] }
  0xed   :  { %1082 = vmatmul.f32.gmra.mxu2 %v4395_v56  ;;  %1147 = vmatmul.f32.gmra.mxu3 %v4397_v57  ;;  %v4401_v62 = vsel %vm486_vm8, %v237_v47, %v551_v53  ;;  %v4403_v63 = vsel %vm487_vm9, %v302_v48, %v552_v54  ;;  %v676_v54 = vld [vmem:[#allocation6 + $0xa8] sm:$0xff] }
  0xee   :  { %955 = vmatmul.f32.gmra.mxu0 %v4401_v62  ;;  %1020 = vmatmul.f32.gmra.mxu1 %v4403_v63 }
  0xef   :  { %v366_v5 = vpop.f32.mrf.mxu2  ;;  %v431_v6 = vpop.f32.mrf.mxu3  ;;  %1321 = vmatpush.msra.mxu2 %v804_v35  ;;  %1191 = vmatpush.msra.mxu0 %v676_v54  ;;  %v796_v54 = vld [vmem:[#allocation6 + $0x468] sm:$0xff] }
  0xf0   :  { %v367_v7 = vadd.f32 %v366_v5, %v4277_v38  ;;  %v432_v8 = vadd.f32 %v431_v6, %v4279_v39  ;;  %v239_v9 = vpop.f32.mrf.mxu0  ;;  %v304_v10 = vpop.f32.mrf.mxu1  ;;  %v740_v6 = vld [vmem:[#allocation6 + $0x2a8] sm:$0xff] }
  0xf1   :  { %v240_v11 = vadd.f32 %v239_v9, %v4267_v25  ;;  %v305_v12 = vadd.f32 %v304_v10, %v4269_v26  ;;  %1256 = vmatpush.msra.mxu1 %v740_v6 }
  0xf2   :  { %v553_v13 = vmul.f32 %v4271_v29, %v367_v7  ;;  %v554_v18 = vmul.f32 %v4271_v29, %v432_v8  ;;  %vm488_vm10 = vcmp.gt.f32.partialorder %v367_v7, 0.0  ;;  %vm489_vm11 = vcmp.gt.f32.partialorder %v432_v8, 0.0 }
  0xf3   :  { %v555_v21 = vmul.f32 %v4271_v29, %v240_v11  ;;  %v556_v22 = vmul.f32 %v4271_v29, %v305_v12  ;;  %vm490_vm12 = vcmp.gt.f32.partialorder %v240_v11, 0.0  ;;  %vm491_vm13 = vcmp.gt.f32.partialorder %v305_v12, 0.0 }
  0xf4   :  { %v4415_v24 = vsel %vm488_vm10, %v367_v7, %v553_v13  ;;  %v4417_v32 = vsel %vm489_vm11, %v432_v8, %v554_v18 }
  0xf5   :  { %1085 = vmatmul.f32.gmra.mxu2 %v4415_v24  ;;  %1150 = vmatmul.f32.gmra.mxu3 %v4417_v32  ;;  %v4421_v33 = vsel %vm490_vm12, %v240_v11, %v555_v21  ;;  %v4423_v34 = vsel %vm491_vm13, %v305_v12, %v556_v22  ;;  %v800_v11 = vld [vmem:[#allocation6 + $0x488] sm:$0xff] }
  0xf6   :  { %958 = vmatmul.f32.gmra.mxu0 %v4421_v33  ;;  %1023 = vmatmul.f32.gmra.mxu1 %v4423_v34 }
  0xf7   :  { %v369_v36 = vpop.f32.mrf.mxu2  ;;  %v434_v45 = vpop.f32.mrf.mxu3  ;;  %1322 = vmatpush.msra.mxu2 %v800_v11 }
  0xf8   :  { %v370_v46 = vadd.f32 %v369_v36, %v4277_v38  ;;  %v435_v47 = vadd.f32 %v434_v45, %v4279_v39  ;;  %v242_v48 = vpop.f32.mrf.mxu0  ;;  %v307_v49 = vpop.f32.mrf.mxu1  ;;  %v672_v45 = vld [vmem:[#allocation6 + $0x88] sm:$0xff] }
  0xf9   :  { %v243_v50 = vadd.f32 %v242_v48, %v4267_v25  ;;  %v308_v51 = vadd.f32 %v307_v49, %v4269_v26  ;;  %1192 = vmatpush.msra.mxu0 %v672_v45  ;;  %v736_v49 = vld [vmem:[#allocation6 + $0x288] sm:$0xff]  ;;  %1323 = vmatpush.msra.mxu2 %v796_v54 }
  0xfa   :  { %v557_v52 = vmul.f32 %v4271_v29, %v370_v46  ;;  %v558_v53 = vmul.f32 %v4271_v29, %v435_v47  ;;  %vm492_vm14 = vcmp.gt.f32.partialorder %v370_v46, 0.0  ;;  %vm493_vm15 = vcmp.gt.f32.partialorder %v435_v47, 0.0  ;;  %1257 = vmatpush.msra.mxu1 %v736_v49  ;;  %v792_v49 = vld [vmem:[#allocation6 + $0x448] sm:$0xff] }
  0xfb   :  { %v559_v0 = vmul.f32 %v4271_v29, %v243_v50  ;;  %v560_v5 = vmul.f32 %v4271_v29, %v308_v51  ;;  %vm494_vm0 = vcmp.gt.f32.partialorder %v243_v50, 0.0  ;;  %vm495_vm1 = vcmp.gt.f32.partialorder %v308_v51, 0.0  ;;  %1324 = vmatpush.msra.mxu2 %v792_v49 }
  0xfc   :  { %v4435_v7 = vsel %vm492_vm14, %v370_v46, %v557_v52  ;;  %v4437_v8 = vsel %vm493_vm15, %v435_v47, %v558_v53  ;;  %v864_v46 = vld [vmem:[#allocation6 + $0x688] sm:$0xff] }
  0xfd   :  { %1088 = vmatmul.f32.gmra.mxu2 %v4435_v7  ;;  %1153 = vmatmul.f32.gmra.mxu3 %v4437_v8  ;;  %v4441_v9 = vsel %vm494_vm0, %v243_v50, %v559_v0  ;;  %v4443_v10 = vsel %vm495_vm1, %v308_v51, %v560_v5 }
  0xfe   :  { %961 = vmatmul.f32.gmra.mxu0 %v4441_v9  ;;  %1026 = vmatmul.f32.gmra.mxu1 %v4443_v10 }
  0xff   :  { %v372_v12 = vpop.f32.mrf.mxu2  ;;  %v437_v13 = vpop.f32.mrf.mxu3  ;;  %1387 = vmatpush.msra.mxu3 %v864_v46 }
 0x100   :  { %v373_v18 = vadd.f32 %v372_v12, %v4277_v38  ;;  %v438_v19 = vadd.f32 %v437_v13, %v4279_v39  ;;  %v245_v20 = vpop.f32.mrf.mxu0  ;;  %v310_v21 = vpop.f32.mrf.mxu1 }
 0x101   :  { %v246_v22 = vadd.f32 %v245_v20, %v4267_v25  ;;  %v311_v23 = vadd.f32 %v310_v21, %v4269_v26  ;;  %v668_v21 = vld [vmem:[#allocation6 + $0x68] sm:$0xff] }
 0x102   :  { %v561_v35 = vmul.f32 %v4271_v29, %v373_v18  ;;  %v562_v36 = vmul.f32 %v4271_v29, %v438_v19  ;;  %vm496_vm2 = vcmp.gt.f32.partialorder %v373_v18, 0.0  ;;  %vm497_vm3 = vcmp.gt.f32.partialorder %v438_v19, 0.0  ;;  %1193 = vmatpush.msra.mxu0 %v668_v21  ;;  %v856_v21 = vld [vmem:[#allocation6 + $0x648] sm:$0xff] }
 0x103   :  { %v563_v47 = vmul.f32 %v4271_v29, %v246_v22  ;;  %v564_v48 = vmul.f32 %v4271_v29, %v311_v23  ;;  %vm498_vm4 = vcmp.gt.f32.partialorder %v246_v22, 0.0  ;;  %vm499_vm5 = vcmp.gt.f32.partialorder %v311_v23, 0.0 }
 0x104   :  { %v4455_v50 = vsel %vm496_vm2, %v373_v18, %v561_v35  ;;  %v4457_v51 = vsel %vm497_vm3, %v438_v19, %v562_v36  ;;  %v732_v36 = vld [vmem:[#allocation6 + $0x268] sm:$0xff] }
 0x105   :  { %1091 = vmatmul.f32.gmra.mxu2 %v4455_v50  ;;  %1156 = vmatmul.f32.gmra.mxu3 %v4457_v51  ;;  %v4461_v52 = vsel %vm498_vm4, %v246_v22, %v563_v47  ;;  %v4463_v53 = vsel %vm499_vm5, %v311_v23, %v564_v48  ;;  %v860_v22 = vld [vmem:[#allocation6 + $0x668] sm:$0xff] }
 0x106   :  { %6238 = vst [vmem:[#allocation20_spill] sm:$0xff] %v4461_v52  ;;  %964 = vmatmul.f32.gmra.mxu0 %v4461_v52  ;;  %1029 = vmatmul.f32.gmra.mxu1 %v4463_v53 }
 0x107   :  { %6239 = vst [vmem:[#allocation21_spill] sm:$0xff] %v4463_v53  ;;  %v375_v55 = vpop.f32.mrf.mxu2  ;;  %v440_v0 = vpop.f32.mrf.mxu3  ;;  %1388 = vmatpush.msra.mxu3 %v860_v22  ;;  %1258 = vmatpush.msra.mxu1 %v732_v36 }
 0x108   :  { %v376_v5 = vadd.f32 %v375_v55, %v4277_v38  ;;  %v441_v6 = vadd.f32 %v440_v0, %v4279_v39  ;;  %v248_v11 = vpop.f32.mrf.mxu0  ;;  %v313_v12 = vpop.f32.mrf.mxu1 }
 0x109   :  { %v249_v13 = vadd.f32 %v248_v11, %v4267_v25  ;;  %v314_v18 = vadd.f32 %v313_v12, %v4269_v26  ;;  %1389 = vmatpush.msra.mxu3 %v856_v21 }
 0x10a   :  { %v565_v19 = vmul.f32 %v4271_v29, %v376_v5  ;;  %v566_v20 = vmul.f32 %v4271_v29, %v441_v6  ;;  %vm500_vm6 = vcmp.gt.f32.partialorder %v376_v5, 0.0  ;;  %vm501_vm7 = vcmp.gt.f32.partialorder %v441_v6, 0.0 }
 0x10b   :  { %v567_v23 = vmul.f32 %v4271_v29, %v249_v13  ;;  %v568_v35 = vmul.f32 %v4271_v29, %v314_v18  ;;  %vm502_vm8 = vcmp.gt.f32.partialorder %v249_v13, 0.0  ;;  %vm503_vm9 = vcmp.gt.f32.partialorder %v314_v18, 0.0 }
 0x10c   :  { %v4475_v45 = vsel %vm500_vm6, %v376_v5, %v565_v19  ;;  %v4477_v46 = vsel %vm501_vm7, %v441_v6, %v566_v20  ;;  %v664_v20 = vld [vmem:[#allocation6 + $0x48] sm:$0xff] }
 0x10d   :  { %6240 = vst [vmem:[#allocation22_spill] sm:$0xff] %v4477_v46  ;;  %1094 = vmatmul.f32.gmra.mxu2 %v4475_v45  ;;  %1159 = vmatmul.f32.gmra.mxu3 %v4477_v46  ;;  %v4481_v47 = vsel %vm502_vm8, %v249_v13, %v567_v23  ;;  %v4483_v48 = vsel %vm503_vm9, %v314_v18, %v568_v35  ;;  %v728_v35 = vld [vmem:[#allocation6 + $0x248] sm:$0xff] }
 0x10e   :  { %6241 = vst [vmem:[#allocation23_spill] sm:$0xff] %v4481_v47  ;;  %967 = vmatmul.f32.gmra.mxu0 %v4481_v47  ;;  %1032 = vmatmul.f32.gmra.mxu1 %v4483_v48 }
 0x10f   :  { %6242 = vst [vmem:[#allocation24_spill] sm:$0xff] %v4483_v48  ;;  %v378_v54 = vpop.f32.mrf.mxu2  ;;  %v443_v55 = vpop.f32.mrf.mxu3  ;;  %1194 = vmatpush.msra.mxu0 %v664_v20  ;;  %1259 = vmatpush.msra.mxu1 %v728_v35  ;;  %v852_v35 = vld [vmem:[#allocation6 + $0x628] sm:$0xff] }
 0x110   :  { %v379_v0 = vadd.f32 %v378_v54, %v4277_v38  ;;  %v444_v5 = vadd.f32 %v443_v55, %v4279_v39  ;;  %v251_v6 = vpop.f32.mrf.mxu0  ;;  %v316_v11 = vpop.f32.mrf.mxu1  ;;  %1390 = vmatpush.msra.mxu3 %v852_v35 }
 0x111   :  { %v252_v12 = vadd.f32 %v251_v6, %v4267_v25  ;;  %v317_v13 = vadd.f32 %v316_v11, %v4269_v26  ;;  %v788_v6 = vld [vmem:[#allocation6 + $0x428] sm:$0xff] }
 0x112   :  { %v569_v18 = vmul.f32 %v4271_v29, %v379_v0  ;;  %v570_v19 = vmul.f32 %v4271_v29, %v444_v5  ;;  %vm504_vm10 = vcmp.gt.f32.partialorder %v379_v0, 0.0  ;;  %vm505_vm11 = vcmp.gt.f32.partialorder %v444_v5, 0.0  ;;  %1325 = vmatpush.msra.mxu2 %v788_v6 }
 0x113   :  { %v571_v22 = vmul.f32 %v4271_v29, %v252_v12  ;;  %v572_v23 = vmul.f32 %v4271_v29, %v317_v13  ;;  %vm506_vm12 = vcmp.gt.f32.partialorder %v252_v12, 0.0  ;;  %vm507_vm13 = vcmp.gt.f32.partialorder %v317_v13, 0.0 }
 0x114   :  { %v4495_v36 = vsel %vm504_vm10, %v379_v0, %v569_v18  ;;  %v4497_v49 = vsel %vm505_vm11, %v444_v5, %v570_v19 }
 0x115   :  { %6243 = vst [vmem:[#allocation25_spill] sm:$0xff] %v4495_v36  ;;  %1097 = vmatmul.f32.gmra.mxu2 %v4495_v36  ;;  %1162 = vmatmul.f32.gmra.mxu3 %v4497_v49  ;;  %v4501_v54 = vsel %vm506_vm12, %v252_v12, %v571_v22  ;;  %v4503_v55 = vsel %vm507_vm13, %v317_v13, %v572_v23  ;;  %v660_v23 = vld [vmem:[#allocation6 + $0x28] sm:$0xff] }
 0x116   :  { %6244 = vst [vmem:[#allocation26_spill] sm:$0xff] %v4497_v49  ;;  %970 = vmatmul.f32.gmra.mxu0 %v4501_v54  ;;  %1035 = vmatmul.f32.gmra.mxu1 %v4503_v55  ;;  %v656_v49 = vld [vmem:[#allocation6 + $0x8] sm:$0xff] }
 0x117   :  { %6245 = vst [vmem:[#allocation27_spill] sm:$0xff] %v4501_v54  ;;  %v381_v11 = vpop.f32.mrf.mxu2  ;;  %v446_v20 = vpop.f32.mrf.mxu3  ;;  %1195 = vmatpush.msra.mxu0 %v660_v23  ;;  %v720_v36 = vld [vmem:[#allocation6 + $0x208] sm:$0xff] }
 0x118   :  { %6246 = vst [vmem:[#allocation28_spill] sm:$0xff] %v4503_v55  ;;  %v382_v0 = vadd.f32 %v381_v11, %v4277_v38  ;;  %v447_v5 = vadd.f32 %v446_v20, %v4279_v39  ;;  %v254_v18 = vpop.f32.mrf.mxu0  ;;  %v319_v19 = vpop.f32.mrf.mxu1  ;;  %v724_v55 = vld [vmem:[#allocation6 + $0x228] sm:$0xff] }
 0x119   :  { %v255_v21 = vadd.f32 %v254_v18, %v4267_v25  ;;  %v320_v12 = vadd.f32 %v319_v19, %v4269_v26  ;;  %1260 = vmatpush.msra.mxu1 %v724_v55  ;;  %v784_v23 = vld [vmem:[#allocation6 + $0x408] sm:$0xff]  ;;  %1196 = vmatpush.msra.mxu0 %v656_v49 }
 0x11a   :  { %v573_v13 = vmul.f32 %v4271_v29, %v382_v0  ;;  %v574_v22 = vmul.f32 %v4271_v29, %v447_v5  ;;  %vm508_vm14 = vcmp.gt.f32.partialorder %v382_v0, 0.0  ;;  %vm509_vm15 = vcmp.gt.f32.partialorder %v447_v5, 0.0  ;;  %1326 = vmatpush.msra.mxu2 %v784_v23 }
 0x11b   :  { %v575_v6 = vmul.f32 %v4271_v29, %v255_v21  ;;  %v576_v11 = vmul.f32 %v4271_v29, %v320_v12  ;;  %vm510_vm0 = vcmp.gt.f32.partialorder %v255_v21, 0.0  ;;  %vm511_vm1 = vcmp.gt.f32.partialorder %v320_v12, 0.0  ;;  %1261 = vmatpush.msra.mxu1 %v720_v36 }
 0x11c   :  { %v4515_v20 = vsel %vm508_vm14, %v382_v0, %v573_v13  ;;  %v4517_v18 = vsel %vm509_vm15, %v447_v5, %v574_v22  ;;  %v848_v0 = vld [vmem:[#allocation6 + $0x608] sm:$0xff] }
 0x11d   :  { %6247 = vst [vmem:[#allocation29_spill] sm:$0xff] %v4515_v20  ;;  %1100 = vmatmul.f32.gmra.mxu2 %v4515_v20  ;;  %1165 = vmatmul.f32.gmra.mxu3 %v4517_v18  ;;  %v4521_v19 = vsel %vm510_vm0, %v255_v21, %v575_v6  ;;  %v4523_v54 = vsel %vm511_vm1, %v320_v12, %v576_v11 }
 0x11e   :  { %6248 = vst [vmem:[#allocation30_spill] sm:$0xff] %v4517_v18  ;;  %973 = vmatmul.f32.gmra.mxu0 %v4521_v19  ;;  %1038 = vmatmul.f32.gmra.mxu1 %v4523_v54 }
 0x11f   :  { %6249 = vst [vmem:[#allocation31_spill] sm:$0xff] %v4521_v19  ;;  %v384_v13 = vpop.f32.mrf.mxu2  ;;  %v449_v5 = vpop.f32.mrf.mxu3  ;;  %1391 = vmatpush.msra.mxu3 %v848_v0  ;;  %v909_v19 = vld [vmem:[#allocation6 + $0x7f0] sm:$0xff] }
 0x120   :  { %6250 = vst [vmem:[#allocation32_spill] sm:$0xff] %v4523_v54  ;;  %v385_v55 = vadd.f32 %v384_v13, %v4277_v38  ;;  %v450_v22 = vadd.f32 %v449_v5, %v4279_v39  ;;  %v257_v21 = vpop.f32.mrf.mxu0  ;;  %v322_v35 = vpop.f32.mrf.mxu1 }
 0x121   :  { %v258_v12 = vadd.f32 %v257_v21, %v4267_v25  ;;  %v323_v6 = vadd.f32 %v322_v35, %v4269_v26  ;;  %v845_v21 = vld [vmem:[#allocation6 + $0x5f0] sm:$0xff]  ;;  %1636 = vmatpush.msrb.mxu3 %v909_v19 }
 0x122   :  { %v577_v11 = vmul.f32 %v4271_v29, %v385_v55  ;;  %v578_v54 = vmul.f32 %v4271_v29, %v450_v22  ;;  %vm512_vm2 = vcmp.gt.f32.partialorder %v385_v55, 0.0  ;;  %vm513_vm3 = vcmp.gt.f32.partialorder %v450_v22, 0.0  ;;  %v717_v35 = vld [vmem:[#allocation6 + $0x1f0] sm:$0xff]  ;;  %1571 = vmatpush.msrb.mxu2 %v845_v21 }
 0x123   :  { %v579_v49 = vmul.f32 %v4271_v29, %v258_v12  ;;  %v580_v23 = vmul.f32 %v4271_v29, %v323_v6  ;;  %vm514_vm4 = vcmp.gt.f32.partialorder %v258_v12, 0.0  ;;  %vm515_vm5 = vcmp.gt.f32.partialorder %v323_v6, 0.0  ;;  %1441 = vmatpush.msrb.mxu0 %v717_v35 }
 0x124   :  { %v4535_v13 = vsel %vm512_vm2, %v385_v55, %v577_v11  ;;  %v4537_v36 = vsel %vm513_vm3, %v450_v22, %v578_v54 }
 0x125   :  { %6251 = vst [vmem:[#allocation33_spill] sm:$0xff] %v4535_v13  ;;  %1103 = vmatmul.f32.gmra.mxu2 %v4535_v13  ;;  %1168 = vmatmul.f32.gmra.mxu3 %v4537_v36  ;;  %v4541_v0 = vsel %vm514_vm4, %v258_v12, %v579_v49  ;;  %v4543_v5 = vsel %vm515_vm5, %v323_v6, %v580_v23  ;;  %v905_v13 = vld [vmem:[#allocation6 + $0x7d0] sm:$0xff] }
 0x126   :  { %6252 = vst [vmem:[#allocation34_spill] sm:$0xff] %v4537_v36  ;;  %976 = vmatmul.f32.gmra.mxu0 %v4541_v0  ;;  %1041 = vmatmul.f32.gmra.mxu1 %v4543_v5  ;;  %v713_v36 = vld [vmem:[#allocation6 + $0x1d0] sm:$0xff] }
 0x127   :  { %6253 = vst [vmem:[#allocation35_spill] sm:$0xff] %v4541_v0  ;;  %v387_v18 = vpop.f32.mrf.mxu2  ;;  %v452_v55 = vpop.f32.mrf.mxu3  ;;  %v841_v0 = vld [vmem:[#allocation6 + $0x5d0] sm:$0xff]  ;;  %1442 = vmatpush.msrb.mxu0 %v713_v36  ;;  %1637 = vmatpush.msrb.mxu3 %v905_v13 }
 0x128   :  { %6254 = vst [vmem:[#allocation36_spill] sm:$0xff] %v4543_v5  ;;  %v388_v54 = vadd.f32 %v387_v18, %v4277_v38  ;;  %v453_v22 = vadd.f32 %v452_v55, %v4279_v39  ;;  %v260_v11 = vpop.f32.mrf.mxu0  ;;  %v325_v12 = vpop.f32.mrf.mxu1  ;;  %1572 = vmatpush.msrb.mxu2 %v841_v0  ;;  %v777_v13 = vld [vmem:[#allocation6 + $0x3d0] sm:$0xff] }
 0x129   :  { %v261_v6 = vadd.f32 %v260_v11, %v4267_v25  ;;  %v326_v49 = vadd.f32 %v325_v12, %v4269_v26  ;;  %v781_v12 = vld [vmem:[#allocation6 + $0x3f0] sm:$0xff] }
 0x12a   :  { %v581_v23 = vmul.f32 %v4271_v29, %v388_v54  ;;  %v582_v5 = vmul.f32 %v4271_v29, %v453_v22  ;;  %vm516_vm6 = vcmp.gt.f32.partialorder %v388_v54, 0.0  ;;  %vm517_vm7 = vcmp.gt.f32.partialorder %v453_v22, 0.0  ;;  %1506 = vmatpush.msrb.mxu1 %v781_v12 }
 0x12b   :  { %v583_v21 = vmul.f32 %v4271_v29, %v261_v6  ;;  %v584_v35 = vmul.f32 %v4271_v29, %v326_v49  ;;  %vm518_vm8 = vcmp.gt.f32.partialorder %v261_v6, 0.0  ;;  %vm519_vm9 = vcmp.gt.f32.partialorder %v326_v49, 0.0 }
 0x12c   :  { %v4555_v18 = vsel %vm516_vm6, %v388_v54, %v581_v23  ;;  %v4557_v55 = vsel %vm517_vm7, %v453_v22, %v582_v5  ;;  %1507 = vmatpush.msrb.mxu1 %v777_v13 }
 0x12d   :  { %6255 = vst [vmem:[#allocation37_spill] sm:$0xff] %v4557_v55  ;;  %1106 = vmatmul.f32.gmra.mxu2 %v4555_v18  ;;  %1171 = vmatmul.f32.gmra.mxu3 %v4557_v55  ;;  %v4561_v19 = vsel %vm518_vm8, %v261_v6, %v583_v21  ;;  %v4563_v11 = vsel %vm519_vm9, %v326_v49, %v584_v35 }
 0x12e   :  { %6256 = vst [vmem:[#allocation38_spill] sm:$0xff] %v4561_v19  ;;  %979 = vmatmul.f32.gmra.mxu0 %v4561_v19  ;;  %1044 = vmatmul.f32.gmra.mxu1 %v4563_v11 }
 0x12f   :  { %6257 = vst [vmem:[#allocation39_spill] sm:$0xff] %v4563_v11  ;;  %v390_v54 = vpop.f32.mrf.mxu2  ;;  %v455_v23 = vpop.f32.mrf.mxu3 }
 0x130   :  { %v391_v5 = vadd.f32 %v390_v54, %v4277_v38  ;;  %v456_v22 = vadd.f32 %v455_v23, %v4279_v39  ;;  %v263_v6 = vpop.f32.mrf.mxu0  ;;  %v328_v21 = vpop.f32.mrf.mxu1  ;;  %v837_v23 = vld [vmem:[#allocation6 + $0x5b0] sm:$0xff] }
 0x131   :  { %v264_v49 = vadd.f32 %v263_v6, %v4267_v25  ;;  %v329_v35 = vadd.f32 %v328_v21, %v4269_v26  ;;  %v709_v6 = vld [vmem:[#allocation6 + $0x1b0] sm:$0xff]  ;;  %1573 = vmatpush.msrb.mxu2 %v837_v23 }
 0x132   :  { %v585_v11 = vmul.f32 %v4271_v29, %v391_v5  ;;  %v586_v19 = vmul.f32 %v4271_v29, %v456_v22  ;;  %vm520_vm10 = vcmp.gt.f32.partialorder %v391_v5, 0.0  ;;  %vm521_vm11 = vcmp.gt.f32.partialorder %v456_v22, 0.0  ;;  %v901_v21 = vld [vmem:[#allocation6 + $0x7b0] sm:$0xff]  ;;  %1443 = vmatpush.msrb.mxu0 %v709_v6 }
 0x133   :  { %v587_v0 = vmul.f32 %v4271_v29, %v264_v49  ;;  %v588_v12 = vmul.f32 %v4271_v29, %v329_v35  ;;  %vm522_vm12 = vcmp.gt.f32.partialorder %v264_v49, 0.0  ;;  %vm523_vm13 = vcmp.gt.f32.partialorder %v329_v35, 0.0  ;;  %1638 = vmatpush.msrb.mxu3 %v901_v21  ;;  %v705_v23 = vld [vmem:[#allocation6 + $0x190] sm:$0xff] }
 0x134   :  { %v4575_v54 = vsel %vm520_vm10, %v391_v5, %v585_v11  ;;  %v4577_v36 = vsel %vm521_vm11, %v456_v22, %v586_v19  ;;  %v897_v6 = vld [vmem:[#allocation6 + $0x790] sm:$0xff]  ;;  %1444 = vmatpush.msrb.mxu0 %v705_v23 }
 0x135   :  { %6258 = vst [vmem:[#allocation40_spill] sm:$0xff] %v4575_v54  ;;  %1109 = vmatmul.f32.gmra.mxu2 %v4575_v54  ;;  %1174 = vmatmul.f32.gmra.mxu3 %v4577_v36  ;;  %v4581_v25 = vsel %vm522_vm12, %v264_v49, %v587_v0  ;;  %v4583_v26 = vsel %vm523_vm13, %v329_v35, %v588_v12 }
 0x136   :  { %6259 = vst [vmem:[#allocation41_spill] sm:$0xff] %v4577_v36  ;;  %982 = vmatmul.f32.gmra.mxu0 %v4581_v25  ;;  %1047 = vmatmul.f32.gmra.mxu1 %v4583_v26 }
 0x137   :  { %6260 = vst [vmem:[#allocation42_spill] sm:$0xff] %v4581_v25  ;;  %v393_v11 = vpop.f32.mrf.mxu2  ;;  %v458_v5 = vpop.f32.mrf.mxu3  ;;  %1639 = vmatpush.msrb.mxu3 %v897_v6 }
 0x138   :  { %6261 = vst [vmem:[#allocation43_spill] sm:$0xff] %v4583_v26  ;;  %v394_v19 = vadd.f32 %v393_v11, %v4277_v38  ;;  %v459_v22 = vadd.f32 %v458_v5, %v4279_v39  ;;  %v4594_v26 = vld [vmem:[%s6051_s5] sm:$0xf]  ;;  %v773_v39 = vld [vmem:[#allocation6 + $0x3b0] sm:$0xff] }
 0x139   :  { %6262 = vst [vmem:[#allocation44_spill] sm:$0xff] %v4594_v26  ;;  %v4605_v21 = vperm.slane %v4594_v26, 0  ;;  %1508 = vmatpush.msrb.mxu1 %v773_v39  ;;  %v893_v26 = vld [vmem:[#allocation6 + $0x770] sm:$0xff] }
 0x13a   :  { %v589_v49 = vmul.f32 %v4271_v29, %v394_v19  ;;  %v590_v35 = vmul.f32 %v4271_v29, %v459_v22  ;;  %vm524_vm14 = vcmp.gt.f32.partialorder %v394_v19, 0.0  ;;  %vm525_vm15 = vcmp.gt.f32.partialorder %v459_v22, 0.0  ;;  %v833_v29 = vld [vmem:[#allocation6 + $0x590] sm:$0xff]  ;;  %1640 = vmatpush.msrb.mxu3 %v893_v26 }
 0x13b   :  { %v938_v0 = vpop.f32.mrf.mxu0  ;;  %v1003_v12 = vpop.f32.mrf.mxu1  ;;  %1574 = vmatpush.msrb.mxu2 %v833_v29 }
 0x13c   :  { %v4596_v13 = vsel %vm524_vm14, %v394_v19, %v589_v49  ;;  %v4598_v38 = vsel %vm525_vm15, %v459_v22, %v590_v35  ;;  %v939_v11 = vadd.f32 %v938_v0, %v4605_v21  ;;  %v769_v22 = vld [vmem:[#allocation6 + $0x390] sm:$0xff] }
 0x13d   :  { %6263 = vst [vmem:[#allocation45_spill] sm:$0xff] %v4598_v38  ;;  %1112 = vmatmul.f32.gmra.mxu2 %v4596_v13  ;;  %1177 = vmatmul.f32.gmra.mxu3 %v4598_v38  ;;  %v829_v49 = vld [vmem:[#allocation6 + $0x570] sm:$0xff] }
 0x13e   :  { %1197 = vmatmul.f32.vlgmr.msra.gmra.mxu0 %v4281_v40  ;;  %1262 = vmatmul.f32.vlgmr.msra.gmra.mxu1 %v4283_v41  ;;  %v701_v35 = vld [vmem:[#allocation6 + $0x170] sm:$0xff]  ;;  %v1004_v39 = vadd.f32 %v1003_v12, %v939_v11 }
 0x13f   :  { %1509 = vmatpush.msrb.mxu1 %v769_v22  ;;  %1575 = vmatpush.msrb.mxu2 %v829_v49  ;;  %v825_v12 = vld [vmem:[#allocation6 + $0x550] sm:$0xff] }
 0x140   :  { %1445 = vmatpush.msrb.mxu0 %v701_v35  ;;  %v697_v11 = vld [vmem:[#allocation6 + $0x150] sm:$0xff] }
 0x141   :  { %v889_v22 = vld [vmem:[#allocation6 + $0x750] sm:$0xff]  ;;  %1576 = vmatpush.msrb.mxu2 %v825_v12 }
 0x142   :  { %1446 = vmatpush.msrb.mxu0 %v697_v11  ;;  %1641 = vmatpush.msrb.mxu3 %v889_v22 }
 0x143   :  { %v941_v5 = vpop.f32.mrf.mxu0  ;;  %v1006_v19 = vpop.f32.mrf.mxu1 }
 0x144   :  { %v942_v6 = vadd.f32 %v941_v5, %v4605_v21 }
 0x145   :  { %1327 = vmatmul.f32.vlgmr.msra.gmra.mxu2 %v4295_v58  ;;  %1392 = vmatmul.f32.vlgmr.msra.gmra.mxu3 %v4297_v59 }
 0x146   :  { %1200 = vmatmul.f32.gmra.mxu0 %v4301_v60  ;;  %1265 = vmatmul.f32.gmra.mxu1 %v4303_v61  ;;  %v765_v61 = vld [vmem:[#allocation6 + $0x370] sm:$0xff]  ;;  %v1007_v26 = vadd.f32 %v1006_v19, %v942_v6 }
 0x147   :  { %1510 = vmatpush.msrb.mxu1 %v765_v61  ;;  %v821_v61 = vld [vmem:[#allocation6 + $0x530] sm:$0xff] }
 0x148   :  { %v1068_v29 = vpop.f32.mrf.mxu2  ;;  %v1133_v23 = vpop.f32.mrf.mxu3  ;;  %v693_v19 = vld [vmem:[#allocation6 + $0x130] sm:$0xff]  ;;  %1577 = vmatpush.msrb.mxu2 %v821_v61 }
 0x149   :  { %v1069_v0 = vadd.f32 %v1068_v29, %v1004_v39  ;;  %v885_v6 = vld [vmem:[#allocation6 + $0x730] sm:$0xff]  ;;  %1447 = vmatpush.msrb.mxu0 %v693_v19 }
 0x14a   :  { %1642 = vmatpush.msrb.mxu3 %v885_v6 }
 0x14b   :  { %v4613_v58 = vadd.f32 %v1133_v23, %v1069_v0  ;;  %v944_v59 = vpop.f32.mrf.mxu0  ;;  %v1009_v41 = vpop.f32.mrf.mxu1 }
 0x14c   :  { %v945_v39 = vadd.f32 %v944_v59, %v4605_v21 }
 0x14d   :  { %6264 = vst [vmem:[#allocation46_spill] sm:$0xff] %v4613_v58  ;;  %1330 = vmatmul.f32.gmra.mxu2 %v4315_v14  ;;  %1395 = vmatmul.f32.gmra.mxu3 %v4317_v15  ;;  %v761_v58 = vld [vmem:[#allocation6 + $0x350] sm:$0xff] }
 0x14e   :  { %1203 = vmatmul.f32.gmra.mxu0 %v4321_v16  ;;  %1268 = vmatmul.f32.gmra.mxu1 %v4323_v17  ;;  %v1010_v12 = vadd.f32 %v1009_v41, %v945_v39  ;;  %v817_v41 = vld [vmem:[#allocation6 + $0x510] sm:$0xff] }
 0x14f   :  { %1511 = vmatpush.msrb.mxu1 %v761_v58  ;;  %v689_v58 = vld [vmem:[#allocation6 + $0x110] sm:$0xff]  ;;  %1578 = vmatpush.msrb.mxu2 %v817_v41 }
 0x150   :  { %v1071_v5 = vpop.f32.mrf.mxu2  ;;  %v1136_v49 = vpop.f32.mrf.mxu3  ;;  %v881_v39 = vld [vmem:[#allocation6 + $0x710] sm:$0xff]  ;;  %1448 = vmatpush.msrb.mxu0 %v689_v58 }
 0x151   :  { %v1072_v35 = vadd.f32 %v1071_v5, %v1007_v26  ;;  %1643 = vmatpush.msrb.mxu3 %v881_v39 }
 0x153   :  { %v4620_v29 = vadd.f32 %v1136_v49, %v1072_v35  ;;  %v947_v23 = vpop.f32.mrf.mxu0  ;;  %v1012_v0 = vpop.f32.mrf.mxu1 }
 0x154   :  { %v948_v26 = vadd.f32 %v947_v23, %v4605_v21 }
 0x155   :  { %6265 = vst [vmem:[#allocation47_spill] sm:$0xff] %v4620_v29  ;;  %1333 = vmatmul.f32.gmra.mxu2 %v4335_v37  ;;  %1398 = vmatmul.f32.gmra.mxu3 %v4337_v42  ;;  %v757_v29 = vld [vmem:[#allocation6 + $0x330] sm:$0xff] }
 0x156   :  { %1206 = vmatmul.f32.gmra.mxu0 %v4341_v43  ;;  %1271 = vmatmul.f32.gmra.mxu1 %v4343_v44  ;;  %v1013_v61 = vadd.f32 %v1012_v0, %v948_v26  ;;  %v685_v0 = vld [vmem:[#allocation6 + $0xf0] sm:$0xff] }
 0x157   :  { %1512 = vmatpush.msrb.mxu1 %v757_v29  ;;  %v813_v29 = vld [vmem:[#allocation6 + $0x4f0] sm:$0xff]  ;;  %1449 = vmatpush.msrb.mxu0 %v685_v0 }
 0x158   :  { %v1074_v59 = vpop.f32.mrf.mxu2  ;;  %v1139_v11 = vpop.f32.mrf.mxu3  ;;  %v877_v26 = vld [vmem:[#allocation6 + $0x6f0] sm:$0xff]  ;;  %1579 = vmatpush.msrb.mxu2 %v813_v29 }
 0x159   :  { %v1075_v22 = vadd.f32 %v1074_v59, %v1010_v12  ;;  %1644 = vmatpush.msrb.mxu3 %v877_v26 }
 0x15b   :  { %v4627_v5 = vadd.f32 %v1139_v11, %v1075_v22  ;;  %v950_v49 = vpop.f32.mrf.mxu0  ;;  %v1015_v35 = vpop.f32.mrf.mxu1 }
 0x15c   :  { %v951_v12 = vadd.f32 %v950_v49, %v4605_v21 }
 0x15d   :  { %6266 = vst [vmem:[#allocation48_spill] sm:$0xff] %v4627_v5  ;;  %1336 = vmatmul.f32.gmra.mxu2 %v4355_v1  ;;  %1401 = vmatmul.f32.gmra.mxu3 %v4357_v2  ;;  %v753_v5 = vld [vmem:[#allocation6 + $0x310] sm:$0xff] }
 0x15e   :  { %1209 = vmatmul.f32.gmra.mxu0 %v4361_v3  ;;  %1274 = vmatmul.f32.gmra.mxu1 %v4363_v4  ;;  %v1016_v41 = vadd.f32 %v1015_v35, %v951_v12  ;;  %v681_v35 = vld [vmem:[#allocation6 + $0xd0] sm:$0xff] }
 0x15f   :  { %1513 = vmatpush.msrb.mxu1 %v753_v5  ;;  %v809_v5 = vld [vmem:[#allocation6 + $0x4d0] sm:$0xff]  ;;  %1450 = vmatpush.msrb.mxu0 %v681_v35 }
 0x160   :  { %v1077_v23 = vpop.f32.mrf.mxu2  ;;  %v1142_v19 = vpop.f32.mrf.mxu3  ;;  %v873_v12 = vld [vmem:[#allocation6 + $0x6d0] sm:$0xff]  ;;  %1580 = vmatpush.msrb.mxu2 %v809_v5 }
 0x161   :  { %v1078_v6 = vadd.f32 %v1077_v23, %v1013_v61  ;;  %1645 = vmatpush.msrb.mxu3 %v873_v12 }
 0x163   :  { %v4634_v59 = vadd.f32 %v1142_v19, %v1078_v6  ;;  %v953_v11 = vpop.f32.mrf.mxu0  ;;  %v1018_v22 = vpop.f32.mrf.mxu1 }
 0x164   :  { %v954_v61 = vadd.f32 %v953_v11, %v4605_v21 }
 0x165   :  { %6267 = vst [vmem:[#allocation49_spill] sm:$0xff] %v4634_v59  ;;  %1339 = vmatmul.f32.gmra.mxu2 %v4375_v27  ;;  %1404 = vmatmul.f32.gmra.mxu3 %v4377_v28  ;;  %v749_v59 = vld [vmem:[#allocation6 + $0x2f0] sm:$0xff] }
 0x166   :  { %1212 = vmatmul.f32.gmra.mxu0 %v4381_v30  ;;  %1277 = vmatmul.f32.gmra.mxu1 %v4383_v31  ;;  %v1019_v29 = vadd.f32 %v1018_v22, %v954_v61  ;;  %v677_v22 = vld [vmem:[#allocation6 + $0xb0] sm:$0xff] }
 0x167   :  { %1514 = vmatpush.msrb.mxu1 %v749_v59  ;;  %v805_v59 = vld [vmem:[#allocation6 + $0x4b0] sm:$0xff]  ;;  %1451 = vmatpush.msrb.mxu0 %v677_v22 }
 0x168   :  { %v1080_v49 = vpop.f32.mrf.mxu2  ;;  %v1145_v58 = vpop.f32.mrf.mxu3  ;;  %v869_v61 = vld [vmem:[#allocation6 + $0x6b0] sm:$0xff]  ;;  %1581 = vmatpush.msrb.mxu2 %v805_v59 }
 0x169   :  { %v1081_v39 = vadd.f32 %v1080_v49, %v1016_v41  ;;  %1646 = vmatpush.msrb.mxu3 %v869_v61 }
 0x16b   :  { %v4641_v23 = vadd.f32 %v1145_v58, %v1081_v39  ;;  %v956_v19 = vpop.f32.mrf.mxu0  ;;  %v1021_v6 = vpop.f32.mrf.mxu1 }
 0x16c   :  { %v957_v41 = vadd.f32 %v956_v19, %v4605_v21 }
 0x16d   :  { %6268 = vst [vmem:[#allocation50_spill] sm:$0xff] %v4641_v23  ;;  %1342 = vmatmul.f32.gmra.mxu2 %v4395_v56  ;;  %1407 = vmatmul.f32.gmra.mxu3 %v4397_v57  ;;  %v745_v23 = vld [vmem:[#allocation6 + $0x2d0] sm:$0xff] }
 0x16e   :  { %1215 = vmatmul.f32.gmra.mxu0 %v4401_v62  ;;  %1280 = vmatmul.f32.gmra.mxu1 %v4403_v63  ;;  %v1022_v5 = vadd.f32 %v1021_v6, %v957_v41  ;;  %v673_v6 = vld [vmem:[#allocation6 + $0x90] sm:$0xff] }
 0x16f   :  { %1515 = vmatpush.msrb.mxu1 %v745_v23  ;;  %v801_v23 = vld [vmem:[#allocation6 + $0x490] sm:$0xff]  ;;  %1452 = vmatpush.msrb.mxu0 %v673_v6 }
 0x170   :  { %v1083_v11 = vpop.f32.mrf.mxu2  ;;  %v1148_v0 = vpop.f32.mrf.mxu3  ;;  %v865_v41 = vld [vmem:[#allocation6 + $0x690] sm:$0xff]  ;;  %1582 = vmatpush.msrb.mxu2 %v801_v23 }
 0x171   :  { %v1084_v26 = vadd.f32 %v1083_v11, %v1019_v29  ;;  %1647 = vmatpush.msrb.mxu3 %v865_v41 }
 0x173   :  { %v4648_v49 = vadd.f32 %v1148_v0, %v1084_v26  ;;  %v959_v58 = vpop.f32.mrf.mxu0  ;;  %v1024_v39 = vpop.f32.mrf.mxu1 }
 0x174   :  { %v960_v29 = vadd.f32 %v959_v58, %v4605_v21 }
 0x175   :  { %6269 = vst [vmem:[#allocation51_spill] sm:$0xff] %v4648_v49  ;;  %1345 = vmatmul.f32.gmra.mxu2 %v4415_v24  ;;  %1410 = vmatmul.f32.gmra.mxu3 %v4417_v32  ;;  %v741_v49 = vld [vmem:[#allocation6 + $0x2b0] sm:$0xff] }
 0x176   :  { %1218 = vmatmul.f32.gmra.mxu0 %v4421_v33  ;;  %1283 = vmatmul.f32.gmra.mxu1 %v4423_v34  ;;  %v1025_v59 = vadd.f32 %v1024_v39, %v960_v29  ;;  %v669_v39 = vld [vmem:[#allocation6 + $0x70] sm:$0xff] }
 0x177   :  { %1516 = vmatpush.msrb.mxu1 %v741_v49  ;;  %v797_v49 = vld [vmem:[#allocation6 + $0x470] sm:$0xff]  ;;  %1453 = vmatpush.msrb.mxu0 %v669_v39 }
 0x178   :  { %v1086_v19 = vpop.f32.mrf.mxu2  ;;  %v1151_v35 = vpop.f32.mrf.mxu3  ;;  %v861_v29 = vld [vmem:[#allocation6 + $0x670] sm:$0xff]  ;;  %1583 = vmatpush.msrb.mxu2 %v797_v49 }
 0x179   :  { %v1087_v12 = vadd.f32 %v1086_v19, %v1022_v5  ;;  %1648 = vmatpush.msrb.mxu3 %v861_v29 }
 0x17b   :  { %v4655_v11 = vadd.f32 %v1151_v35, %v1087_v12  ;;  %v962_v0 = vpop.f32.mrf.mxu0  ;;  %v1027_v26 = vpop.f32.mrf.mxu1 }
 0x17c   :  { %v963_v5 = vadd.f32 %v962_v0, %v4605_v21 }
 0x17d   :  { %6270 = vst [vmem:[#allocation52_spill] sm:$0xff] %v4655_v11  ;;  %1348 = vmatmul.f32.gmra.mxu2 %v4435_v7  ;;  %1413 = vmatmul.f32.gmra.mxu3 %v4437_v8  ;;  %v737_v11 = vld [vmem:[#allocation6 + $0x290] sm:$0xff] }
 0x17e   :  { %1221 = vmatmul.f32.gmra.mxu0 %v4441_v9  ;;  %1286 = vmatmul.f32.gmra.mxu1 %v4443_v10  ;;  %v1028_v23 = vadd.f32 %v1027_v26, %v963_v5  ;;  %v665_v26 = vld [vmem:[#allocation6 + $0x50] sm:$0xff] }
 0x17f   :  { %1517 = vmatpush.msrb.mxu1 %v737_v11  ;;  %v793_v11 = vld [vmem:[#allocation6 + $0x450] sm:$0xff]  ;;  %1454 = vmatpush.msrb.mxu0 %v665_v26 }
 0x180   :  { %v1089_v58 = vpop.f32.mrf.mxu2  ;;  %v1154_v22 = vpop.f32.mrf.mxu3  ;;  %v857_v5 = vld [vmem:[#allocation6 + $0x650] sm:$0xff]  ;;  %1584 = vmatpush.msrb.mxu2 %v793_v11 }
 0x181   :  { %v1090_v61 = vadd.f32 %v1089_v58, %v1025_v59  ;;  %1649 = vmatpush.msrb.mxu3 %v857_v5  ;;  %v853_v11 = vld [vmem:[#allocation6 + $0x630] sm:$0xff] }
 0x183   :  { %v4662_v19 = vadd.f32 %v1154_v22, %v1090_v61  ;;  %v965_v35 = vpop.f32.mrf.mxu0  ;;  %v1030_v12 = vpop.f32.mrf.mxu1  ;;  %1650 = vmatpush.msrb.mxu3 %v853_v11  ;;  %v849_v11 = vld [vmem:[#allocation6 + $0x610] sm:$0xff] }
 0x184   :  { %v966_v59 = vadd.f32 %v965_v35, %v4605_v21 }
 0x185   :  { %6271 = vst [vmem:[#allocation53_spill] sm:$0xff] %v4662_v19  ;;  %1351 = vmatmul.f32.gmra.mxu2 %v4455_v50  ;;  %1416 = vmatmul.f32.gmra.mxu3 %v4457_v51  ;;  %v733_v19 = vld [vmem:[#allocation6 + $0x270] sm:$0xff] }
 0x186   :  { %1224 = vmatmul.f32.gmra.mxu0 %v4461_v52  ;;  %1289 = vmatmul.f32.gmra.mxu1 %v4463_v53  ;;  %v1031_v49 = vadd.f32 %v1030_v12, %v966_v59  ;;  %v789_v12 = vld [vmem:[#allocation6 + $0x430] sm:$0xff] }
 0x187   :  { %1518 = vmatpush.msrb.mxu1 %v733_v19  ;;  %v6277_v19 = vld [vmem:[#allocation28_spill] sm:$0xff]  ;;  %v661_v59 = vld [vmem:[#allocation6 + $0x30] sm:$0xff]  ;;  %1585 = vmatpush.msrb.mxu2 %v789_v12 }
 0x188   :  { %v1092_v0 = vpop.f32.mrf.mxu2  ;;  %v1157_v6 = vpop.f32.mrf.mxu3  ;;  %1455 = vmatpush.msrb.mxu0 %v661_v59  ;;  %v6281_v12 = vld [vmem:[#allocation32_spill] sm:$0xff]  ;;  %v785_v59 = vld [vmem:[#allocation6 + $0x410] sm:$0xff]  ;;  %1651 = vmatpush.msrb.mxu3 %v849_v11 }
 0x189   :  { %v1093_v41 = vadd.f32 %v1092_v0, %v1028_v23  ;;  %1586 = vmatpush.msrb.mxu2 %v785_v59  ;;  %v910_v59 = vld [vmem:[#allocation6 + $0x7f8] sm:$0xff] }
 0x18a   :  { %1896 = vmatpush.msra.mxu3 %v910_v59 }
 0x18b   :  { %v4669_v58 = vadd.f32 %v1157_v6, %v1093_v41  ;;  %v968_v22 = vpop.f32.mrf.mxu0  ;;  %v1033_v61 = vpop.f32.mrf.mxu1 }
 0x18c   :  { %v969_v23 = vadd.f32 %v968_v22, %v4605_v21 }
 0x18d   :  { %6272 = vst [vmem:[#allocation54_spill] sm:$0xff] %v4669_v58  ;;  %1354 = vmatmul.f32.gmra.mxu2 %v4475_v45  ;;  %1419 = vmatmul.f32.gmra.mxu3 %v4477_v46  ;;  %v6274_v58 = vld [vmem:[#allocation25_spill] sm:$0xff]  ;;  %v6276_v46 = vld [vmem:[#allocation27_spill] sm:$0xff] }
 0x18e   :  { %1227 = vmatmul.f32.gmra.mxu0 %v4481_v47  ;;  %1292 = vmatmul.f32.gmra.mxu1 %v4483_v48  ;;  %v6275_v48 = vld [vmem:[#allocation26_spill] sm:$0xff]  ;;  %v729_v47 = vld [vmem:[#allocation6 + $0x250] sm:$0xff]  ;;  %v1034_v26 = vadd.f32 %v1033_v61, %v969_v23  ;;  %v6280_v23 = vld [vmem:[#allocation31_spill] sm:$0xff] }
 0x18f   :  { %1519 = vmatpush.msrb.mxu1 %v729_v47  ;;  %v657_v61 = vld [vmem:[#allocation6 + $0x10] sm:$0xff] }
 0x190   :  { %v1095_v35 = vpop.f32.mrf.mxu2  ;;  %v1160_v39 = vpop.f32.mrf.mxu3  ;;  %v721_v47 = vld [vmem:[#allocation6 + $0x210] sm:$0xff]  ;;  %1456 = vmatpush.msrb.mxu0 %v657_v61  ;;  %v718_v61 = vld [vmem:[#allocation6 + $0x1f8] sm:$0xff] }
 0x191   :  { %v1096_v29 = vadd.f32 %v1095_v35, %v1031_v49 }
 0x192   :  { %1701 = vmatpush.msra.mxu0 %v718_v61  ;;  %v906_v61 = vld [vmem:[#allocation6 + $0x7d8] sm:$0xff] }
 0x193   :  { %v4676_v0 = vadd.f32 %v1160_v39, %v1096_v29  ;;  %v971_v6 = vpop.f32.mrf.mxu0  ;;  %v1036_v41 = vpop.f32.mrf.mxu1  ;;  %1897 = vmatpush.msra.mxu3 %v906_v61 }
 0x194   :  { %v972_v35 = vadd.f32 %v971_v6, %v4605_v21 }
 0x195   :  { %6273 = vst [vmem:[#allocation55_spill] sm:$0xff] %v4676_v0  ;;  %1357 = vmatmul.f32.gmra.mxu2 %v6274_v58  ;;  %1422 = vmatmul.f32.gmra.mxu3 %v6275_v48 }
 0x196   :  { %1230 = vmatmul.f32.gmra.mxu0 %v6276_v46  ;;  %1295 = vmatmul.f32.gmra.mxu1 %v6277_v19  ;;  %v725_v46 = vld [vmem:[#allocation6 + $0x230] sm:$0xff]  ;;  %v6279_v19 = vld [vmem:[#allocation30_spill] sm:$0xff] }
 0x197   :  { %1520 = vmatpush.msrb.mxu1 %v725_v46 }
 0x198   :  { %v1098_v22 = vpop.f32.mrf.mxu2  ;;  %v1163_v5 = vpop.f32.mrf.mxu3 }
 0x199   :  { %v1099_v49 = vadd.f32 %v1098_v22, %v1034_v26  ;;  %v1037_v26 = vadd.f32 %v1036_v41, %v972_v35  ;;  %1521 = vmatpush.msrb.mxu1 %v721_v47  ;;  %v6286_v41 = vld [vmem:[#allocation36_spill] sm:$0xff]  ;;  %v846_v35 = vld [vmem:[#allocation6 + $0x5f8] sm:$0xff] }
 0x19a   :  { %1831 = vmatpush.msra.mxu2 %v846_v35  ;;  %v714_v35 = vld [vmem:[#allocation6 + $0x1d8] sm:$0xff] }
 0x19b   :  { %v4683_v39 = vadd.f32 %v1163_v5, %v1099_v49  ;;  %v974_v29 = vpop.f32.mrf.mxu0  ;;  %v1039_v0 = vpop.f32.mrf.mxu1  ;;  %1702 = vmatpush.msra.mxu0 %v714_v35 }
 0x19c   :  { %v975_v5 = vadd.f32 %v974_v29, %v4605_v21 }
 0x19d   :  { %6278 = vst [vmem:[#allocation25_spill] sm:$0xff] %v4683_v39  ;;  %1360 = vmatmul.f32.gmra.mxu2 %v4515_v20  ;;  %1425 = vmatmul.f32.gmra.mxu3 %v6279_v19  ;;  %v6283_v20 = vld [vmem:[#allocation33_spill] sm:$0xff] }
 0x19e   :  { %1233 = vmatmul.f32.gmra.mxu0 %v6280_v23  ;;  %1298 = vmatmul.f32.gmra.mxu1 %v6281_v12  ;;  %v6284_v23 = vld [vmem:[#allocation34_spill] sm:$0xff]  ;;  %v6285_v12 = vld [vmem:[#allocation35_spill] sm:$0xff]  ;;  %v1040_v47 = vadd.f32 %v1039_v0, %v975_v5 }
 0x19f   :  { %v6289_v0 = vld [vmem:[#allocation39_spill] sm:$0xff]  ;;  %v842_v5 = vld [vmem:[#allocation6 + $0x5d8] sm:$0xff] }
 0x1a0   :  { %v1101_v6 = vpop.f32.mrf.mxu2  ;;  %v1166_v22 = vpop.f32.mrf.mxu3  ;;  %1832 = vmatpush.msra.mxu2 %v842_v5  ;;  %v902_v5 = vld [vmem:[#allocation6 + $0x7b8] sm:$0xff] }
 0x1a1   :  { %v1102_v46 = vadd.f32 %v1101_v6, %v1037_v26  ;;  %1898 = vmatpush.msra.mxu3 %v902_v5  ;;  %v6294_v5 = vld [vmem:[#allocation44_spill] sm:$0xff] }
 0x1a3   :  { %v4690_v49 = vadd.f32 %v1166_v22, %v1102_v46  ;;  %v977_v39 = vpop.f32.mrf.mxu0  ;;  %v1042_v19 = vpop.f32.mrf.mxu1 }
 0x1a4   :  { %v978_v6 = vadd.f32 %v977_v39, %v4605_v21 }
 0x1a5   :  { %6282 = vst [vmem:[#allocation56_spill] sm:$0xff] %v4690_v49  ;;  %1363 = vmatmul.f32.gmra.mxu2 %v6283_v20  ;;  %1428 = vmatmul.f32.gmra.mxu3 %v6284_v23 }
 0x1a6   :  { %1236 = vmatmul.f32.gmra.mxu0 %v6285_v12  ;;  %1301 = vmatmul.f32.gmra.mxu1 %v6286_v41  ;;  %v782_v41 = vld [vmem:[#allocation6 + $0x3f8] sm:$0xff]  ;;  %v1043_v59 = vadd.f32 %v1042_v19, %v978_v6  ;;  %v6291_v19 = vld [vmem:[#allocation43_spill] sm:$0xff] }
 0x1a7   :  { %v6288_v12 = vld [vmem:[#allocation38_spill] sm:$0xff]  ;;  %1766 = vmatpush.msra.mxu1 %v782_v41 }
 0x1a8   :  { %v1104_v11 = vpop.f32.mrf.mxu2  ;;  %v1169_v29 = vpop.f32.mrf.mxu3  ;;  %v838_v41 = vld [vmem:[#allocation6 + $0x5b8] sm:$0xff] }
 0x1a9   :  { %v1105_v26 = vadd.f32 %v1104_v11, %v1040_v47  ;;  %v710_v6 = vld [vmem:[#allocation6 + $0x1b8] sm:$0xff]  ;;  %1833 = vmatpush.msra.mxu2 %v838_v41 }
 0x1aa   :  { %1703 = vmatpush.msra.mxu0 %v710_v6  ;;  %v898_v41 = vld [vmem:[#allocation6 + $0x798] sm:$0xff] }
 0x1ab   :  { %v4697_v22 = vadd.f32 %v1169_v29, %v1105_v26  ;;  %v980_v46 = vpop.f32.mrf.mxu0  ;;  %v1045_v49 = vpop.f32.mrf.mxu1  ;;  %1899 = vmatpush.msra.mxu3 %v898_v41 }
 0x1ac   :  { %v981_v29 = vadd.f32 %v980_v46, %v4605_v21 }
 0x1ad   :  { %6287 = vst [vmem:[#allocation33_spill] sm:$0xff] %v4697_v22  ;;  %1366 = vmatmul.f32.gmra.mxu2 %v4555_v18  ;;  %1431 = vmatmul.f32.gmra.mxu3 %v4557_v55 }
 0x1ae   :  { %1239 = vmatmul.f32.gmra.mxu0 %v6288_v12  ;;  %1304 = vmatmul.f32.gmra.mxu1 %v6289_v0  ;;  %v778_v0 = vld [vmem:[#allocation6 + $0x3d8] sm:$0xff]  ;;  %v1046_v35 = vadd.f32 %v1045_v49, %v981_v29  ;;  %v6293_v49 = vld [vmem:[#allocation16_spill] sm:$0xff] }
 0x1af   :  { %1767 = vmatpush.msra.mxu1 %v778_v0  ;;  %v834_v0 = vld [vmem:[#allocation6 + $0x598] sm:$0xff] }
 0x1b0   :  { %v1107_v39 = vpop.f32.mrf.mxu2  ;;  %v1172_v47 = vpop.f32.mrf.mxu3  ;;  %v706_v29 = vld [vmem:[#allocation6 + $0x198] sm:$0xff]  ;;  %1834 = vmatpush.msra.mxu2 %v834_v0 }
 0x1b1   :  { %v1108_v11 = vadd.f32 %v1107_v39, %v1043_v59  ;;  %1704 = vmatpush.msra.mxu0 %v706_v29  ;;  %v702_v0 = vld [vmem:[#allocation6 + $0x178] sm:$0xff] }
 0x1b2   :  { %v894_v29 = vld [vmem:[#allocation6 + $0x778] sm:$0xff] }
 0x1b3   :  { %v4704_v26 = vadd.f32 %v1172_v47, %v1108_v11  ;;  %v983_v22 = vpop.f32.mrf.mxu0  ;;  %v1048_v55 = vpop.f32.mrf.mxu1  ;;  %1705 = vmatpush.msra.mxu0 %v702_v0  ;;  %1900 = vmatpush.msra.mxu3 %v894_v29 }
 0x1b4   :  { %v984_v39 = vadd.f32 %v983_v22, %v4605_v21 }
 0x1b5   :  { %6290 = vst [vmem:[#allocation34_spill] sm:$0xff] %v4704_v26  ;;  %1369 = vmatmul.f32.gmra.mxu2 %v4575_v54  ;;  %1434 = vmatmul.f32.gmra.mxu3 %v4577_v36 }
 0x1b6   :  { %1242 = vmatmul.f32.gmra.mxu0 %v4581_v25  ;;  %1307 = vmatmul.f32.gmra.mxu1 %v6291_v19  ;;  %v774_v19 = vld [vmem:[#allocation6 + $0x3b8] sm:$0xff]  ;;  %v1049_v6 = vadd.f32 %v1048_v55, %v984_v39 }
 0x1b7   :  { %1768 = vmatpush.msra.mxu1 %v774_v19  ;;  %v770_v55 = vld [vmem:[#allocation6 + $0x398] sm:$0xff]  ;;  %v6298_v19 = vld [vmem:[#allocation19_spill] sm:$0xff] }
 0x1b8   :  { %v1110_v46 = vpop.f32.mrf.mxu2  ;;  %v1175_v61 = vpop.f32.mrf.mxu3  ;;  %v830_v39 = vld [vmem:[#allocation6 + $0x578] sm:$0xff] }
 0x1b9   :  { %v1111_v59 = vadd.f32 %v1110_v46, %v1046_v35  ;;  %v4718_v35 = vperm.slane %v6294_v5, 1  ;;  %1769 = vmatpush.msra.mxu1 %v770_v55  ;;  %1835 = vmatpush.msra.mxu2 %v830_v39  ;;  %v890_v55 = vld [vmem:[#allocation6 + $0x758] sm:$0xff] }
 0x1ba   :  { %1901 = vmatpush.msra.mxu3 %v890_v55 }
 0x1bb   :  { %v4711_v47 = vadd.f32 %v1175_v61, %v1111_v59  ;;  %v1198_v11 = vpop.f32.mrf.mxu0  ;;  %v1263_v26 = vpop.f32.mrf.mxu1 }
 0x1bc   :  { %v1199_v61 = vadd.f32 %v1198_v11, %v4718_v35 }
 0x1bd   :  { %6292 = vst [vmem:[#allocation57_spill] sm:$0xff] %v4711_v47  ;;  %1372 = vmatmul.f32.gmra.mxu2 %v4596_v13  ;;  %1437 = vmatmul.f32.gmra.mxu3 %v4598_v38  ;;  %v6297_v38 = vld [vmem:[#allocation18_spill] sm:$0xff] }
 0x1be   :  { %1457 = vmatmul.f32.vlgmr.msrb.gmra.mxu0 %v4281_v40  ;;  %1522 = vmatmul.f32.vlgmr.msrb.gmra.mxu1 %v6293_v49  ;;  %v6296_v40 = vld [vmem:[#allocation17_spill] sm:$0xff]  ;;  %v1264_v41 = vadd.f32 %v1263_v26, %v1199_v61  ;;  %v826_v26 = vld [vmem:[#allocation6 + $0x558] sm:$0xff] }
 0x1bf   :  { %v698_v61 = vld [vmem:[#allocation6 + $0x158] sm:$0xff]  ;;  %1836 = vmatpush.msra.mxu2 %v826_v26 }
 0x1c0   :  { %v1113_v21 = vpop.f32.mrf.mxu2  ;;  %v1178_v22 = vpop.f32.mrf.mxu3  ;;  %1706 = vmatpush.msra.mxu0 %v698_v61 }
 0x1c1   :  { %v1114_v46 = vadd.f32 %v1113_v21, %v1049_v6 }
 0x1c3   :  { %v4721_v59 = vadd.f32 %v1178_v22, %v1114_v46  ;;  %v1201_v47 = vpop.f32.mrf.mxu0  ;;  %v1266_v49 = vpop.f32.mrf.mxu1 }
 0x1c4   :  { %v1202_v21 = vadd.f32 %v1201_v47, %v4718_v35 }
 0x1c5   :  { %6295 = vst [vmem:[#allocation44_spill] sm:$0xff] %v4721_v59  ;;  %1587 = vmatmul.f32.vlgmr.msrb.gmra.mxu2 %v6296_v40  ;;  %1652 = vmatmul.f32.vlgmr.msrb.gmra.mxu3 %v6297_v38 }
 0x1c6   :  { %1460 = vmatmul.f32.gmra.mxu0 %v4301_v60  ;;  %1525 = vmatmul.f32.gmra.mxu1 %v6298_v19  ;;  %v766_v19 = vld [vmem:[#allocation6 + $0x378] sm:$0xff]  ;;  %v1267_v39 = vadd.f32 %v1266_v49, %v1202_v21 }
 0x1c7   :  { %1770 = vmatpush.msra.mxu1 %v766_v19  ;;  %v822_v49 = vld [vmem:[#allocation6 + $0x538] sm:$0xff] }
 0x1c8   :  { %v1328_v11 = vpop.f32.mrf.mxu2  ;;  %v1393_v6 = vpop.f32.mrf.mxu3  ;;  %v694_v19 = vld [vmem:[#allocation6 + $0x138] sm:$0xff]  ;;  %1837 = vmatpush.msra.mxu2 %v822_v49 }
 0x1c9   :  { %v1329_v5 = vadd.f32 %v1328_v11, %v1264_v41  ;;  %v886_v21 = vld [vmem:[#allocation6 + $0x738] sm:$0xff]  ;;  %1707 = vmatpush.msra.mxu0 %v694_v19 }
 0x1ca   :  { %1902 = vmatpush.msra.mxu3 %v886_v21 }
 0x1cb   :  { %v4728_v22 = vadd.f32 %v1393_v6, %v1329_v5  ;;  %v1204_v46 = vpop.f32.mrf.mxu0  ;;  %v1269_v59 = vpop.f32.mrf.mxu1 }
 0x1cc   :  { %v1205_v41 = vadd.f32 %v1204_v46, %v4718_v35 }
 0x1cd   :  { %6299 = vst [vmem:[#allocation17_spill] sm:$0xff] %v4728_v22  ;;  %1590 = vmatmul.f32.gmra.mxu2 %v4315_v14  ;;  %1655 = vmatmul.f32.gmra.mxu3 %v4317_v15  ;;  %v762_v22 = vld [vmem:[#allocation6 + $0x358] sm:$0xff] }
 0x1ce   :  { %1463 = vmatmul.f32.gmra.mxu0 %v4321_v16  ;;  %1528 = vmatmul.f32.gmra.mxu1 %v4323_v17  ;;  %v1270_v26 = vadd.f32 %v1269_v59, %v1205_v41  ;;  %v818_v59 = vld [vmem:[#allocation6 + $0x518] sm:$0xff] }
 0x1cf   :  { %1771 = vmatpush.msra.mxu1 %v762_v22  ;;  %v690_v22 = vld [vmem:[#allocation6 + $0x118] sm:$0xff]  ;;  %1838 = vmatpush.msra.mxu2 %v818_v59 }
 0x1d0   :  { %v1331_v47 = vpop.f32.mrf.mxu2  ;;  %v1396_v0 = vpop.f32.mrf.mxu3  ;;  %v882_v41 = vld [vmem:[#allocation6 + $0x718] sm:$0xff]  ;;  %1708 = vmatpush.msra.mxu0 %v690_v22 }
 0x1d1   :  { %v1332_v29 = vadd.f32 %v1331_v47, %v1267_v39  ;;  %1903 = vmatpush.msra.mxu3 %v882_v41 }
 0x1d3   :  { %v4735_v11 = vadd.f32 %v1396_v0, %v1332_v29  ;;  %v1207_v6 = vpop.f32.mrf.mxu0  ;;  %v1272_v5 = vpop.f32.mrf.mxu1 }
 0x1d4   :  { %v1208_v39 = vadd.f32 %v1207_v6, %v4718_v35 }
 0x1d5   :  { %6300 = vst [vmem:[#allocation18_spill] sm:$0xff] %v4735_v11  ;;  %1593 = vmatmul.f32.gmra.mxu2 %v4335_v37  ;;  %1658 = vmatmul.f32.gmra.mxu3 %v4337_v42  ;;  %v758_v11 = vld [vmem:[#allocation6 + $0x338] sm:$0xff] }
 0x1d6   :  { %1466 = vmatmul.f32.gmra.mxu0 %v4341_v43  ;;  %1531 = vmatmul.f32.gmra.mxu1 %v4343_v44  ;;  %v1273_v49 = vadd.f32 %v1272_v5, %v1208_v39  ;;  %v686_v5 = vld [vmem:[#allocation6 + $0xf8] sm:$0xff] }
 0x1d7   :  { %1772 = vmatpush.msra.mxu1 %v758_v11  ;;  %v814_v11 = vld [vmem:[#allocation6 + $0x4f8] sm:$0xff]  ;;  %1709 = vmatpush.msra.mxu0 %v686_v5 }
 0x1d8   :  { %v1334_v46 = vpop.f32.mrf.mxu2  ;;  %v1399_v61 = vpop.f32.mrf.mxu3  ;;  %v878_v39 = vld [vmem:[#allocation6 + $0x6f8] sm:$0xff]  ;;  %1839 = vmatpush.msra.mxu2 %v814_v11 }
 0x1d9   :  { %v1335_v55 = vadd.f32 %v1334_v46, %v1270_v26  ;;  %1904 = vmatpush.msra.mxu3 %v878_v39 }
 0x1db   :  { %v4742_v47 = vadd.f32 %v1399_v61, %v1335_v55  ;;  %v1210_v0 = vpop.f32.mrf.mxu0  ;;  %v1275_v29 = vpop.f32.mrf.mxu1 }
 0x1dc   :  { %v1211_v26 = vadd.f32 %v1210_v0, %v4718_v35 }
 0x1dd   :  { %6301 = vst [vmem:[#allocation58_spill] sm:$0xff] %v4742_v47  ;;  %1596 = vmatmul.f32.gmra.mxu2 %v4355_v1  ;;  %1661 = vmatmul.f32.gmra.mxu3 %v4357_v2  ;;  %v754_v47 = vld [vmem:[#allocation6 + $0x318] sm:$0xff] }
 0x1de   :  { %1469 = vmatmul.f32.gmra.mxu0 %v4361_v3  ;;  %1534 = vmatmul.f32.gmra.mxu1 %v4363_v4  ;;  %v1276_v59 = vadd.f32 %v1275_v29, %v1211_v26  ;;  %v682_v29 = vld [vmem:[#allocation6 + $0xd8] sm:$0xff] }
 0x1df   :  { %1773 = vmatpush.msra.mxu1 %v754_v47  ;;  %v810_v47 = vld [vmem:[#allocation6 + $0x4d8] sm:$0xff]  ;;  %1710 = vmatpush.msra.mxu0 %v682_v29 }
 0x1e0   :  { %v1337_v6 = vpop.f32.mrf.mxu2  ;;  %v1402_v19 = vpop.f32.mrf.mxu3  ;;  %v874_v26 = vld [vmem:[#allocation6 + $0x6d8] sm:$0xff]  ;;  %1840 = vmatpush.msra.mxu2 %v810_v47 }
 0x1e1   :  { %v1338_v21 = vadd.f32 %v1337_v6, %v1273_v49  ;;  %1905 = vmatpush.msra.mxu3 %v874_v26 }
 0x1e3   :  { %v4749_v46 = vadd.f32 %v1402_v19, %v1338_v21  ;;  %v1213_v61 = vpop.f32.mrf.mxu0  ;;  %v1278_v55 = vpop.f32.mrf.mxu1 }
 0x1e4   :  { %v1214_v49 = vadd.f32 %v1213_v61, %v4718_v35 }
 0x1e5   :  { %6302 = vst [vmem:[#allocation59_spill] sm:$0xff] %v4749_v46  ;;  %1599 = vmatmul.f32.gmra.mxu2 %v4375_v27  ;;  %1664 = vmatmul.f32.gmra.mxu3 %v4377_v28  ;;  %v750_v46 = vld [vmem:[#allocation6 + $0x2f8] sm:$0xff] }
 0x1e6   :  { %1472 = vmatmul.f32.gmra.mxu0 %v4381_v30  ;;  %1537 = vmatmul.f32.gmra.mxu1 %v4383_v31  ;;  %v1279_v11 = vadd.f32 %v1278_v55, %v1214_v49  ;;  %v678_v55 = vld [vmem:[#allocation6 + $0xb8] sm:$0xff] }
 0x1e7   :  { %1774 = vmatpush.msra.mxu1 %v750_v46  ;;  %v806_v46 = vld [vmem:[#allocation6 + $0x4b8] sm:$0xff]  ;;  %1711 = vmatpush.msra.mxu0 %v678_v55 }
 0x1e8   :  { %v1340_v0 = vpop.f32.mrf.mxu2  ;;  %v1405_v22 = vpop.f32.mrf.mxu3  ;;  %v870_v49 = vld [vmem:[#allocation6 + $0x6b8] sm:$0xff]  ;;  %1841 = vmatpush.msra.mxu2 %v806_v46 }
 0x1e9   :  { %v1341_v41 = vadd.f32 %v1340_v0, %v1276_v59  ;;  %1906 = vmatpush.msra.mxu3 %v870_v49 }
 0x1eb   :  { %v4756_v6 = vadd.f32 %v1405_v22, %v1341_v41  ;;  %v1216_v19 = vpop.f32.mrf.mxu0  ;;  %v1281_v21 = vpop.f32.mrf.mxu1 }
 0x1ec   :  { %v1217_v59 = vadd.f32 %v1216_v19, %v4718_v35 }
 0x1ed   :  { %6303 = vst [vmem:[#allocation60_spill] sm:$0xff] %v4756_v6  ;;  %1602 = vmatmul.f32.gmra.mxu2 %v4395_v56  ;;  %1667 = vmatmul.f32.gmra.mxu3 %v4397_v57  ;;  %v746_v6 = vld [vmem:[#allocation6 + $0x2d8] sm:$0xff] }
 0x1ee   :  { %1475 = vmatmul.f32.gmra.mxu0 %v4401_v62  ;;  %1540 = vmatmul.f32.gmra.mxu1 %v4403_v63  ;;  %v1282_v47 = vadd.f32 %v1281_v21, %v1217_v59  ;;  %v674_v21 = vld [vmem:[#allocation6 + $0x98] sm:$0xff] }
 0x1ef   :  { %1775 = vmatpush.msra.mxu1 %v746_v6  ;;  %v802_v6 = vld [vmem:[#allocation6 + $0x498] sm:$0xff]  ;;  %1712 = vmatpush.msra.mxu0 %v674_v21 }
 0x1f0   :  { %v1343_v61 = vpop.f32.mrf.mxu2  ;;  %v1408_v5 = vpop.f32.mrf.mxu3  ;;  %v866_v59 = vld [vmem:[#allocation6 + $0x698] sm:$0xff]  ;;  %1842 = vmatpush.msra.mxu2 %v802_v6 }
 0x1f1   :  { %v1344_v39 = vadd.f32 %v1343_v61, %v1279_v11  ;;  %1907 = vmatpush.msra.mxu3 %v866_v59 }
 0x1f3   :  { %v4763_v0 = vadd.f32 %v1408_v5, %v1344_v39  ;;  %v1219_v22 = vpop.f32.mrf.mxu0  ;;  %v1284_v41 = vpop.f32.mrf.mxu1 }
 0x1f4   :  { %v1220_v11 = vadd.f32 %v1219_v22, %v4718_v35 }
 0x1f5   :  { %6304 = vst [vmem:[#allocation61_spill] sm:$0xff] %v4763_v0  ;;  %1605 = vmatmul.f32.gmra.mxu2 %v4415_v24  ;;  %1670 = vmatmul.f32.gmra.mxu3 %v4417_v32  ;;  %v742_v0 = vld [vmem:[#allocation6 + $0x2b8] sm:$0xff] }
 0x1f6   :  { %1478 = vmatmul.f32.gmra.mxu0 %v4421_v33  ;;  %1543 = vmatmul.f32.gmra.mxu1 %v4423_v34  ;;  %v1285_v46 = vadd.f32 %v1284_v41, %v1220_v11  ;;  %v670_v41 = vld [vmem:[#allocation6 + $0x78] sm:$0xff] }
 0x1f7   :  { %1776 = vmatpush.msra.mxu1 %v742_v0  ;;  %v798_v0 = vld [vmem:[#allocation6 + $0x478] sm:$0xff]  ;;  %1713 = vmatpush.msra.mxu0 %v670_v41 }
 0x1f8   :  { %v1346_v19 = vpop.f32.mrf.mxu2  ;;  %v1411_v29 = vpop.f32.mrf.mxu3  ;;  %v862_v11 = vld [vmem:[#allocation6 + $0x678] sm:$0xff]  ;;  %1843 = vmatpush.msra.mxu2 %v798_v0 }
 0x1f9   :  { %v1347_v26 = vadd.f32 %v1346_v19, %v1282_v47  ;;  %1908 = vmatpush.msra.mxu3 %v862_v11  ;;  %v858_v0 = vld [vmem:[#allocation6 + $0x658] sm:$0xff] }
 0x1fb   :  { %v4770_v61 = vadd.f32 %v1411_v29, %v1347_v26  ;;  %v1222_v5 = vpop.f32.mrf.mxu0  ;;  %v1287_v39 = vpop.f32.mrf.mxu1  ;;  %1909 = vmatpush.msra.mxu3 %v858_v0 }
 0x1fc   :  { %v1223_v47 = vadd.f32 %v1222_v5, %v4718_v35 }
 0x1fd   :  { %6305 = vst [vmem:[#allocation62_spill] sm:$0xff] %v4770_v61  ;;  %1608 = vmatmul.f32.gmra.mxu2 %v4435_v7  ;;  %1673 = vmatmul.f32.gmra.mxu3 %v4437_v8  ;;  %v738_v61 = vld [vmem:[#allocation6 + $0x298] sm:$0xff] }
 0x1fe   :  { %1481 = vmatmul.f32.gmra.mxu0 %v4441_v9  ;;  %1546 = vmatmul.f32.gmra.mxu1 %v4443_v10  ;;  %v1288_v6 = vadd.f32 %v1287_v39, %v1223_v47  ;;  %v794_v39 = vld [vmem:[#allocation6 + $0x458] sm:$0xff] }
 0x1ff   :  { %1777 = vmatpush.msra.mxu1 %v738_v61  ;;  %v6310_v61 = vld [vmem:[#allocation24_spill] sm:$0xff]  ;;  %v666_v47 = vld [vmem:[#allocation6 + $0x58] sm:$0xff]  ;;  %1844 = vmatpush.msra.mxu2 %v794_v39 }
 0x200   :  { %v1349_v22 = vpop.f32.mrf.mxu2  ;;  %v1414_v55 = vpop.f32.mrf.mxu3  ;;  %1714 = vmatpush.msra.mxu0 %v666_v47  ;;  %v854_v39 = vld [vmem:[#allocation6 + $0x638] sm:$0xff] }
 0x201   :  { %v1350_v49 = vadd.f32 %v1349_v22, %v1285_v46  ;;  %1910 = vmatpush.msra.mxu3 %v854_v39  ;;  %v850_v39 = vld [vmem:[#allocation6 + $0x618] sm:$0xff] }
 0x203   :  { %v4777_v19 = vadd.f32 %v1414_v55, %v1350_v49  ;;  %v1225_v29 = vpop.f32.mrf.mxu0  ;;  %v1290_v26 = vpop.f32.mrf.mxu1  ;;  %1911 = vmatpush.msra.mxu3 %v850_v39 }
 0x204   :  { %v1226_v46 = vadd.f32 %v1225_v29, %v4718_v35 }
 0x205   :  { %6306 = vst [vmem:[#allocation63_spill] sm:$0xff] %v4777_v19  ;;  %1611 = vmatmul.f32.gmra.mxu2 %v4455_v50  ;;  %1676 = vmatmul.f32.gmra.mxu3 %v4457_v51  ;;  %v6308_v19 = vld [vmem:[#allocation22_spill] sm:$0xff] }
 0x206   :  { %1484 = vmatmul.f32.gmra.mxu0 %v4461_v52  ;;  %1549 = vmatmul.f32.gmra.mxu1 %v4463_v53  ;;  %v734_v53 = vld [vmem:[#allocation6 + $0x278] sm:$0xff]  ;;  %v6309_v52 = vld [vmem:[#allocation23_spill] sm:$0xff]  ;;  %v1291_v41 = vadd.f32 %v1290_v26, %v1226_v46 }
 0x207   :  { %1778 = vmatpush.msra.mxu1 %v734_v53  ;;  %v6313_v53 = vld [vmem:[#allocation28_spill] sm:$0xff]  ;;  %v790_v26 = vld [vmem:[#allocation6 + $0x438] sm:$0xff] }
 0x208   :  { %v1352_v5 = vpop.f32.mrf.mxu2  ;;  %v1417_v21 = vpop.f32.mrf.mxu3  ;;  %v662_v46 = vld [vmem:[#allocation6 + $0x38] sm:$0xff]  ;;  %1845 = vmatpush.msra.mxu2 %v790_v26  ;;  %v6318_v26 = vld [vmem:[#allocation32_spill] sm:$0xff] }
 0x209   :  { %v1353_v59 = vadd.f32 %v1352_v5, %v1288_v6  ;;  %1715 = vmatpush.msra.mxu0 %v662_v46  ;;  %v786_v46 = vld [vmem:[#allocation6 + $0x418] sm:$0xff] }
 0x20a   :  { %1846 = vmatpush.msra.mxu2 %v786_v46 }
 0x20b   :  { %v4784_v22 = vadd.f32 %v1417_v21, %v1353_v59  ;;  %v1228_v55 = vpop.f32.mrf.mxu0  ;;  %v1293_v49 = vpop.f32.mrf.mxu1 }
 0x20c   :  { %v1229_v5 = vadd.f32 %v1228_v55, %v4718_v35 }
 0x20d   :  { %6307 = vst [vmem:[#allocation64_spill] sm:$0xff] %v4784_v22  ;;  %1614 = vmatmul.f32.gmra.mxu2 %v4475_v45  ;;  %1679 = vmatmul.f32.gmra.mxu3 %v6308_v19 }
 0x20e   :  { %1487 = vmatmul.f32.gmra.mxu0 %v6309_v52  ;;  %1552 = vmatmul.f32.gmra.mxu1 %v6310_v61  ;;  %v730_v61 = vld [vmem:[#allocation6 + $0x258] sm:$0xff]  ;;  %v6312_v52 = vld [vmem:[#allocation27_spill] sm:$0xff]  ;;  %v1294_v47 = vadd.f32 %v1293_v49, %v1229_v5 }
 0x20f   :  { %1779 = vmatpush.msra.mxu1 %v730_v61  ;;  %v658_v49 = vld [vmem:[#allocation6 + $0x18] sm:$0xff]  ;;  %v6317_v5 = vld [vmem:[#allocation31_spill] sm:$0xff] }
 0x210   :  { %v1355_v29 = vpop.f32.mrf.mxu2  ;;  %v1420_v11 = vpop.f32.mrf.mxu3  ;;  %v722_v61 = vld [vmem:[#allocation6 + $0x218] sm:$0xff]  ;;  %1716 = vmatpush.msra.mxu0 %v658_v49 }
 0x211   :  { %v1356_v6 = vadd.f32 %v1355_v29, %v1291_v41 }
 0x213   :  { %v4791_v21 = vadd.f32 %v1420_v11, %v1356_v6  ;;  %v1231_v59 = vpop.f32.mrf.mxu0  ;;  %v1296_v22 = vpop.f32.mrf.mxu1 }
 0x214   :  { %v1232_v29 = vadd.f32 %v1231_v59, %v4718_v35 }
 0x215   :  { %6311 = vst [vmem:[#allocation22_spill] sm:$0xff] %v4791_v21  ;;  %1617 = vmatmul.f32.gmra.mxu2 %v6274_v58  ;;  %1682 = vmatmul.f32.gmra.mxu3 %v6275_v48  ;;  %v6316_v48 = vld [vmem:[#allocation30_spill] sm:$0xff] }
 0x216   :  { %1490 = vmatmul.f32.gmra.mxu0 %v6312_v52  ;;  %1555 = vmatmul.f32.gmra.mxu1 %v6313_v53  ;;  %v726_v52 = vld [vmem:[#allocation6 + $0x238] sm:$0xff]  ;;  %v6315_v53 = vld [vmem:[#allocation29_spill] sm:$0xff] }
 0x217   :  { %1780 = vmatpush.msra.mxu1 %v726_v52 }
 0x218   :  { %v1358_v55 = vpop.f32.mrf.mxu2  ;;  %v1423_v0 = vpop.f32.mrf.mxu3 }
 0x219   :  { %v1359_v41 = vadd.f32 %v1358_v55, %v1294_v47  ;;  %v1297_v47 = vadd.f32 %v1296_v22, %v1232_v29  ;;  %1781 = vmatpush.msra.mxu1 %v722_v61  ;;  %v6321_v22 = vld [vmem:[#allocation36_spill] sm:$0xff] }
 0x21b   :  { %v4798_v11 = vadd.f32 %v1423_v0, %v1359_v41  ;;  %v1234_v6 = vpop.f32.mrf.mxu0  ;;  %v1299_v21 = vpop.f32.mrf.mxu1 }
 0x21c   :  { %v1235_v0 = vadd.f32 %v1234_v6, %v4718_v35 }
 0x21d   :  { %6314 = vst [vmem:[#allocation65_spill] sm:$0xff] %v4798_v11  ;;  %1620 = vmatmul.f32.gmra.mxu2 %v6315_v53  ;;  %1685 = vmatmul.f32.gmra.mxu3 %v6316_v48 }
 0x21e   :  { %1493 = vmatmul.f32.gmra.mxu0 %v6317_v5  ;;  %1558 = vmatmul.f32.gmra.mxu1 %v6318_v26  ;;  %v6320_v26 = vld [vmem:[#allocation35_spill] sm:$0xff]  ;;  %v1300_v29 = vadd.f32 %v1299_v21, %v1235_v0 }
 0x220   :  { %v1361_v59 = vpop.f32.mrf.mxu2  ;;  %v1426_v55 = vpop.f32.mrf.mxu3 }
 0x221   :  { %v1362_v52 = vadd.f32 %v1361_v59, %v1297_v47 }
 0x223   :  { %v4805_v41 = vadd.f32 %v1426_v55, %v1362_v52  ;;  %v1237_v11 = vpop.f32.mrf.mxu0  ;;  %v1302_v48 = vpop.f32.mrf.mxu1  ;;  %v6323_v55 = vld [vmem:[#allocation37_spill] sm:$0xff]  ;;  %v6324_v52 = vld [vmem:[#allocation39_spill] sm:$0xff] }
 0x224   :  { %v1238_v39 = vadd.f32 %v1237_v11, %v4718_v35 }
 0x225   :  { %6319 = vst [vmem:[#allocation29_spill] sm:$0xff] %v4805_v41  ;;  %1623 = vmatmul.f32.gmra.mxu2 %v6283_v20  ;;  %1688 = vmatmul.f32.gmra.mxu3 %v6284_v23  ;;  %v2343_v41 = vld [vmem:[#allocation8 + $0x5e0] sm:$0xff] }
 0x226   :  { %1496 = vmatmul.f32.gmra.mxu0 %v6320_v26  ;;  %1561 = vmatmul.f32.gmra.mxu1 %v6321_v22  ;;  %v1303_v22 = vadd.f32 %v1302_v48, %v1238_v39  ;;  %v6326_v48 = vld [vmem:[#allocation43_spill] sm:$0xff] }
 0x227   :  { %2551 = vmatpush.msrb.mxu2 %v2343_v41  ;;  %v2339_v41 = vld [vmem:[#allocation8 + $0x5c0] sm:$0xff] }
 0x228   :  { %v1364_v49 = vpop.f32.mrf.mxu2  ;;  %v1429_v46 = vpop.f32.mrf.mxu3 }
 0x229   :  { %v1365_v61 = vadd.f32 %v1364_v49, %v1300_v29  ;;  %2552 = vmatpush.msrb.mxu2 %v2339_v41 }
 0x22b   :  { %v4812_v47 = vadd.f32 %v1429_v46, %v1365_v61  ;;  %v1240_v6 = vpop.f32.mrf.mxu0  ;;  %v1305_v59 = vpop.f32.mrf.mxu1 }
 0x22c   :  { %v1241_v11 = vadd.f32 %v1240_v6, %v4718_v35 }
 0x22d   :  { %6322 = vst [vmem:[#allocation31_spill] sm:$0xff] %v4812_v47  ;;  %1626 = vmatmul.f32.gmra.mxu2 %v4555_v18  ;;  %1691 = vmatmul.f32.gmra.mxu3 %v6323_v55  ;;  %v2215_v47 = vld [vmem:[#allocation8 + $0x1e0] sm:$0xff] }
 0x22e   :  { %1499 = vmatmul.f32.gmra.mxu0 %v6288_v12  ;;  %1564 = vmatmul.f32.gmra.mxu1 %v6324_v52  ;;  %v2407_v12 = vld [vmem:[#allocation8 + $0x7e0] sm:$0xff]  ;;  %v1306_v39 = vadd.f32 %v1305_v59, %v1241_v11 }
 0x22f   :  { %v2279_v55 = vld [vmem:[#allocation8 + $0x3e0] sm:$0xff]  ;;  %2421 = vmatpush.msrb.mxu0 %v2215_v47  ;;  %2616 = vmatpush.msrb.mxu3 %v2407_v12  ;;  %v6330_v12 = vld [vmem:[#allocation16_spill] sm:$0xff] }
 0x230   :  { %v1367_v21 = vpop.f32.mrf.mxu2  ;;  %v1432_v0 = vpop.f32.mrf.mxu3  ;;  %2486 = vmatpush.msrb.mxu1 %v2279_v55  ;;  %v2275_v59 = vld [vmem:[#allocation8 + $0x3c0] sm:$0xff] }
 0x231   :  { %v1368_v29 = vadd.f32 %v1367_v21, %v1303_v22  ;;  %v6329_v47 = vld [vmem:[#allocation15_spill] sm:$0xff] }
 0x232   :  { %v2335_v55 = vld [vmem:[#allocation8 + $0x5a0] sm:$0xff]  ;;  %2487 = vmatpush.msrb.mxu1 %v2275_v59 }
 0x233   :  { %v4819_v49 = vadd.f32 %v1432_v0, %v1368_v29  ;;  %v1243_v46 = vpop.f32.mrf.mxu0  ;;  %v1308_v61 = vpop.f32.mrf.mxu1  ;;  %2553 = vmatpush.msrb.mxu2 %v2335_v55 }
 0x234   :  { %v1244_v0 = vadd.f32 %v1243_v46, %v4718_v35  ;;  %v4835_v35 = vld [vmem:[%s6051_s5] sm:$0xf]  ;;  %s4007_s5 = sld [smem:[#allocation2 + $0x1]] }
 0x235   :  { %6325 = vst [vmem:[#allocation35_spill] sm:$0xff] %v4819_v49  ;;  %1629 = vmatmul.f32.gmra.mxu2 %v4575_v54  ;;  %1694 = vmatmul.f32.gmra.mxu3 %v4577_v36  ;;  %v2403_v54 = vld [vmem:[#allocation8 + $0x7c0] sm:$0xff]  ;;  %v4838_v46 = vperm.slane %v4835_v35, 2 }
 0x236   :  { %1502 = vmatmul.f32.gmra.mxu0 %v4581_v25  ;;  %1567 = vmatmul.f32.gmra.mxu1 %v6326_v48  ;;  %v6328_v25 = vld [vmem:[#allocation45_spill] sm:$0xff]  ;;  %v2211_v48 = vld [vmem:[#allocation8 + $0x1c0] sm:$0xff]  ;;  %v1309_v11 = vadd.f32 %v1308_v61, %v1244_v0 }
 0x237   :  { %2422 = vmatpush.msrb.mxu0 %v2211_v48  ;;  %2617 = vmatpush.msrb.mxu3 %v2403_v54  ;;  %v6331_v54 = vld [vmem:[#allocation19_spill] sm:$0xff] }
 0x238   :  { %v1370_v22 = vpop.f32.mrf.mxu2  ;;  %v1435_v6 = vpop.f32.mrf.mxu3  ;;  %v2331_v48 = vld [vmem:[#allocation8 + $0x580] sm:$0xff] }
 0x239   :  { %v1371_v21 = vadd.f32 %v1370_v22, %v1306_v39  ;;  %2554 = vmatpush.msrb.mxu2 %v2331_v48 }
 0x23b   :  { %v4826_v29 = vadd.f32 %v1435_v6, %v1371_v21  ;;  %v1458_v49 = vpop.f32.mrf.mxu0  ;;  %v1523_v36 = vpop.f32.mrf.mxu1 }
 0x23c   :  { %v1459_v6 = vadd.f32 %v1458_v49, %v4838_v46 }
 0x23d   :  { %6327 = vst [vmem:[#allocation39_spill] sm:$0xff] %v4826_v29  ;;  %1632 = vmatmul.f32.gmra.mxu2 %v4596_v13  ;;  %1697 = vmatmul.f32.gmra.mxu3 %v6328_v25  ;;  %v2271_v29 = vld [vmem:[#allocation8 + $0x3a0] sm:$0xff] }
 0x23e   :  { %1717 = vmatmul.f32.vlgmr.msra.gmra.mxu0 %v6329_v47  ;;  %1782 = vmatmul.f32.vlgmr.msra.gmra.mxu1 %v6330_v12  ;;  %v2207_v47 = vld [vmem:[#allocation8 + $0x1a0] sm:$0xff]  ;;  %v1524_v59 = vadd.f32 %v1523_v36, %v1459_v6 }
 0x23f   :  { %v2399_v12 = vld [vmem:[#allocation8 + $0x7a0] sm:$0xff]  ;;  %2423 = vmatpush.msrb.mxu0 %v2207_v47  ;;  %2488 = vmatpush.msrb.mxu1 %v2271_v29 }
 0x240   :  { %v1373_v41 = vpop.f32.mrf.mxu2  ;;  %v1438_v39 = vpop.f32.mrf.mxu3  ;;  %2618 = vmatpush.msrb.mxu3 %v2399_v12  ;;  %v2267_v36 = vld [vmem:[#allocation8 + $0x380] sm:$0xff] }
 0x241   :  { %v1374_v22 = vadd.f32 %v1373_v41, %v1309_v11  ;;  %v2327_v29 = vld [vmem:[#allocation8 + $0x560] sm:$0xff]  ;;  %2489 = vmatpush.msrb.mxu1 %v2267_v36 }
 0x242   :  { %2555 = vmatpush.msrb.mxu2 %v2327_v29 }
 0x243   :  { %v4841_v21 = vadd.f32 %v1438_v39, %v1374_v22  ;;  %v1461_v61 = vpop.f32.mrf.mxu0  ;;  %v1526_v0 = vpop.f32.mrf.mxu1  ;;  %v2395_v22 = vld [vmem:[#allocation8 + $0x780] sm:$0xff] }
 0x244   :  { %2619 = vmatpush.msrb.mxu3 %v2395_v22  ;;  %v2319_v22 = vld [vmem:[#allocation8 + $0x520] sm:$0xff] }
 0x245   :  { %1847 = vmatmul.f32.vlgmr.msra.gmra.mxu2 %v6296_v40  ;;  %1912 = vmatmul.f32.vlgmr.msra.gmra.mxu3 %v6297_v38  ;;  %v1462_v40 = vadd.f32 %v1461_v61, %v4838_v46 }
 0x246   :  { %1720 = vmatmul.f32.gmra.mxu0 %v4301_v60  ;;  %1785 = vmatmul.f32.gmra.mxu1 %v6331_v54  ;;  %v2203_v60 = vld [vmem:[#allocation8 + $0x180] sm:$0xff] }
 0x247   :  { %v1527_v6 = vadd.f32 %v1526_v0, %v1462_v40  ;;  %2424 = vmatpush.msrb.mxu0 %v2203_v60  ;;  %v2263_v0 = vld [vmem:[#allocation8 + $0x360] sm:$0xff] }
 0x248   :  { %v1588_v49 = vpop.f32.mrf.mxu2  ;;  %v1653_v55 = vpop.f32.mrf.mxu3  ;;  %2490 = vmatpush.msrb.mxu1 %v2263_v0 }
 0x249   :  { %v1589_v11 = vadd.f32 %v1588_v49, %v1524_v59  ;;  %v2323_v59 = vld [vmem:[#allocation8 + $0x540] sm:$0xff] }
 0x24a   :  { %2556 = vmatpush.msrb.mxu2 %v2323_v59 }
 0x24b   :  { %v4848_v41 = vadd.f32 %v1653_v55, %v1589_v11  ;;  %v1464_v38 = vpop.f32.mrf.mxu0  ;;  %v1529_v39 = vpop.f32.mrf.mxu1 }
 0x24c   :  { %2557 = vmatpush.msrb.mxu2 %v2319_v22  ;;  %v2307_v22 = vld [vmem:[#allocation8 + $0x4c0] sm:$0xff] }
 0x24d   :  { %1850 = vmatmul.f32.gmra.mxu2 %v4315_v14  ;;  %1915 = vmatmul.f32.gmra.mxu3 %v4317_v15  ;;  %v1465_v14 = vadd.f32 %v1464_v38, %v4838_v46  ;;  %vm1964_vm2 = vcmp.gt.f32.partialorder %v4848_v41, 0.0 }
 0x24e   :  { %1723 = vmatmul.f32.gmra.mxu0 %v4321_v16  ;;  %1788 = vmatmul.f32.gmra.mxu1 %v4323_v17  ;;  %v2199_v16 = vld [vmem:[#allocation8 + $0x160] sm:$0xff] }
 0x24f   :  { %v2391_v17 = vld [vmem:[#allocation8 + $0x760] sm:$0xff]  ;;  %v1530_v49 = vadd.f32 %v1529_v39, %v1465_v14  ;;  %2425 = vmatpush.msrb.mxu0 %v2199_v16 }
 0x250   :  { %v1591_v61 = vpop.f32.mrf.mxu2  ;;  %v1656_v47 = vpop.f32.mrf.mxu3  ;;  %2620 = vmatpush.msrb.mxu3 %v2391_v17  ;;  %v2259_v39 = vld [vmem:[#allocation8 + $0x340] sm:$0xff] }
 0x251   :  { %v1592_v12 = vadd.f32 %v1591_v61, %v1527_v6  ;;  %2491 = vmatpush.msrb.mxu1 %v2259_v39  ;;  %v2255_v14 = vld [vmem:[#allocation8 + $0x320] sm:$0xff] }
 0x252   :  { %v2247_v39 = vld [vmem:[#allocation8 + $0x2e0] sm:$0xff] }
 0x253   :  { %v4855_v54 = vadd.f32 %v1656_v47, %v1592_v12  ;;  %v1467_v15 = vpop.f32.mrf.mxu0  ;;  %v1532_v48 = vpop.f32.mrf.mxu1  ;;  %2492 = vmatpush.msrb.mxu1 %v2255_v14 }
 0x255   :  { %1853 = vmatmul.f32.gmra.mxu2 %v4335_v37  ;;  %1918 = vmatmul.f32.gmra.mxu3 %v4337_v42  ;;  %v1468_v37 = vadd.f32 %v1467_v15, %v4838_v46  ;;  %v2315_v15 = vld [vmem:[#allocation8 + $0x500] sm:$0xff]  ;;  %vm1968_vm5 = vcmp.gt.f32.partialorder %v4855_v54, 0.0 }
 0x256   :  { %1726 = vmatmul.f32.gmra.mxu0 %v4341_v43  ;;  %1791 = vmatmul.f32.gmra.mxu1 %v4343_v44  ;;  %v2195_v43 = vld [vmem:[#allocation8 + $0x140] sm:$0xff] }
 0x257   :  { %v2387_v44 = vld [vmem:[#allocation8 + $0x740] sm:$0xff]  ;;  %v1533_v36 = vadd.f32 %v1532_v48, %v1468_v37  ;;  %2426 = vmatpush.msrb.mxu0 %v2195_v43  ;;  %2558 = vmatpush.msrb.mxu2 %v2315_v15 }
 0x258   :  { %v1594_v55 = vpop.f32.mrf.mxu2  ;;  %v1659_v11 = vpop.f32.mrf.mxu3  ;;  %2621 = vmatpush.msrb.mxu3 %v2387_v44 }
 0x259   :  { %v1595_v40 = vadd.f32 %v1594_v55, %v1530_v49  ;;  %v2251_v55 = vld [vmem:[#allocation8 + $0x300] sm:$0xff] }
 0x25a   :  { %2493 = vmatpush.msrb.mxu1 %v2251_v55 }
 0x25b   :  { %v4862_v38 = vadd.f32 %v1659_v11, %v1595_v40  ;;  %v1470_v42 = vpop.f32.mrf.mxu0  ;;  %v1535_v60 = vpop.f32.mrf.mxu1  ;;  %v2311_v11 = vld [vmem:[#allocation8 + $0x4e0] sm:$0xff] }
 0x25c   :  { %2559 = vmatpush.msrb.mxu2 %v2311_v11  ;;  %2494 = vmatpush.msrb.mxu1 %v2247_v39 }
 0x25d   :  { %1856 = vmatmul.f32.gmra.mxu2 %v4355_v1  ;;  %1921 = vmatmul.f32.gmra.mxu3 %v4357_v2  ;;  %v1471_v1 = vadd.f32 %v1470_v42, %v4838_v46  ;;  %vm1972_vm9 = vcmp.gt.f32.partialorder %v4862_v38, 0.0 }
 0x25e   :  { %1729 = vmatmul.f32.gmra.mxu0 %v4361_v3  ;;  %1794 = vmatmul.f32.gmra.mxu1 %v4363_v4  ;;  %v2191_v3 = vld [vmem:[#allocation8 + $0x120] sm:$0xff] }
 0x25f   :  { %v2383_v4 = vld [vmem:[#allocation8 + $0x720] sm:$0xff]  ;;  %v1536_v48 = vadd.f32 %v1535_v60, %v1471_v1  ;;  %2427 = vmatpush.msrb.mxu0 %v2191_v3  ;;  %2560 = vmatpush.msrb.mxu2 %v2307_v22 }
 0x260   :  { %v1597_v29 = vpop.f32.mrf.mxu2  ;;  %v1662_v6 = vpop.f32.mrf.mxu3  ;;  %2622 = vmatpush.msrb.mxu3 %v2383_v4  ;;  %v2303_v3 = vld [vmem:[#allocation8 + $0x4a0] sm:$0xff] }
 0x261   :  { %v1598_v61 = vadd.f32 %v1597_v29, %v1533_v36  ;;  %2561 = vmatpush.msrb.mxu2 %v2303_v3 }
 0x263   :  { %v4869_v47 = vadd.f32 %v1662_v6, %v1598_v61  ;;  %v1473_v2 = vpop.f32.mrf.mxu0  ;;  %v1538_v12 = vpop.f32.mrf.mxu1 }
 0x265   :  { %1859 = vmatmul.f32.gmra.mxu2 %v4375_v27  ;;  %1924 = vmatmul.f32.gmra.mxu3 %v4377_v28  ;;  %v1474_v27 = vadd.f32 %v1473_v2, %v4838_v46  ;;  %vm1976_vm13 = vcmp.gt.f32.partialorder %v4869_v47, 0.0 }
 0x266   :  { %1732 = vmatmul.f32.gmra.mxu0 %v4381_v30  ;;  %1797 = vmatmul.f32.gmra.mxu1 %v4383_v31  ;;  %v2187_v30 = vld [vmem:[#allocation8 + $0x100] sm:$0xff] }
 0x267   :  { %v2379_v31 = vld [vmem:[#allocation8 + $0x700] sm:$0xff]  ;;  %v1539_v40 = vadd.f32 %v1538_v12, %v1474_v27  ;;  %2428 = vmatpush.msrb.mxu0 %v2187_v30  ;;  %v6332_v27 = vld [vmem:[#allocation20_spill] sm:$0xff] }
 0x268   :  { %v1600_v16 = vpop.f32.mrf.mxu2  ;;  %v1665_v17 = vpop.f32.mrf.mxu3  ;;  %2623 = vmatpush.msrb.mxu3 %v2379_v31  ;;  %v2243_v12 = vld [vmem:[#allocation8 + $0x2c0] sm:$0xff] }
 0x269   :  { %v1601_v0 = vadd.f32 %v1600_v16, %v1536_v48  ;;  %2495 = vmatpush.msrb.mxu1 %v2243_v12 }
 0x26b   :  { %v4876_v59 = vadd.f32 %v1665_v17, %v1601_v0  ;;  %v1476_v28 = vpop.f32.mrf.mxu0  ;;  %v1541_v49 = vpop.f32.mrf.mxu1  ;;  %v2239_v0 = vld [vmem:[#allocation8 + $0x2a0] sm:$0xff] }
 0x26c   :  { %2496 = vmatpush.msrb.mxu1 %v2239_v0  ;;  %v2155_v0 = vld [vmem:[#allocation8] sm:$0xff] }
 0x26d   :  { %1862 = vmatmul.f32.gmra.mxu2 %v4395_v56  ;;  %1927 = vmatmul.f32.gmra.mxu3 %v4397_v57  ;;  %v1477_v56 = vadd.f32 %v1476_v28, %v4838_v46  ;;  %v6333_v28 = vld [vmem:[#allocation21_spill] sm:$0xff] }
 0x26e   :  { %1735 = vmatmul.f32.gmra.mxu0 %v4401_v62  ;;  %1800 = vmatmul.f32.gmra.mxu1 %v4403_v63  ;;  %v2183_v62 = vld [vmem:[#allocation8 + $0xe0] sm:$0xff] }
 0x26f   :  { %v2375_v63 = vld [vmem:[#allocation8 + $0x6e0] sm:$0xff]  ;;  %v1542_v36 = vadd.f32 %v1541_v49, %v1477_v56  ;;  %2429 = vmatpush.msrb.mxu0 %v2183_v62 }
 0x270   :  { %v1603_v37 = vpop.f32.mrf.mxu2  ;;  %v1668_v42 = vpop.f32.mrf.mxu3  ;;  %2624 = vmatpush.msrb.mxu3 %v2375_v63  ;;  %v2299_v49 = vld [vmem:[#allocation8 + $0x480] sm:$0xff] }
 0x271   :  { %v1604_v60 = vadd.f32 %v1603_v37, %v1539_v40  ;;  %2562 = vmatpush.msrb.mxu2 %v2299_v49  ;;  %v2171_v37 = vld [vmem:[#allocation8 + $0x80] sm:$0xff] }
 0x272   :  { %v6334_v56 = vld [vmem:[#allocation23_spill] sm:$0xff] }
 0x273   :  { %v4883_v43 = vadd.f32 %v1668_v42, %v1604_v60  ;;  %v1479_v57 = vpop.f32.mrf.mxu0  ;;  %v1544_v44 = vpop.f32.mrf.mxu1  ;;  %v2363_v42 = vld [vmem:[#allocation8 + $0x680] sm:$0xff] }
 0x274   :  { %v2235_v60 = vld [vmem:[#allocation8 + $0x280] sm:$0xff] }
 0x275   :  { %1865 = vmatmul.f32.gmra.mxu2 %v4415_v24  ;;  %1930 = vmatmul.f32.gmra.mxu3 %v4417_v32  ;;  %v1480_v24 = vadd.f32 %v1479_v57, %v4838_v46  ;;  %v6335_v57 = vld [vmem:[#allocation24_spill] sm:$0xff]  ;;  %v2287_v49 = vld [vmem:[#allocation8 + $0x420] sm:$0xff] }
 0x276   :  { %1738 = vmatmul.f32.gmra.mxu0 %v4421_v33  ;;  %1803 = vmatmul.f32.gmra.mxu1 %v4423_v34  ;;  %v2179_v33 = vld [vmem:[#allocation8 + $0xc0] sm:$0xff] }
 0x277   :  { %v2371_v34 = vld [vmem:[#allocation8 + $0x6c0] sm:$0xff]  ;;  %v1545_v4 = vadd.f32 %v1544_v44, %v1480_v24  ;;  %2430 = vmatpush.msrb.mxu0 %v2179_v33  ;;  %2497 = vmatpush.msrb.mxu1 %v2235_v60  ;;  %v6341_v60 = vld [vmem:[#allocation36_spill] sm:$0xff] }
 0x278   :  { %v1606_v29 = vpop.f32.mrf.mxu2  ;;  %v1671_v6 = vpop.f32.mrf.mxu3  ;;  %2625 = vmatpush.msrb.mxu3 %v2371_v34  ;;  %v2295_v44 = vld [vmem:[#allocation8 + $0x460] sm:$0xff] }
 0x279   :  { %v1607_v61 = vadd.f32 %v1606_v29, %v1542_v36  ;;  %2563 = vmatpush.msrb.mxu2 %v2295_v44  ;;  %v6336_v29 = vld [vmem:[#allocation26_spill] sm:$0xff]  ;;  %v2231_v24 = vld [vmem:[#allocation8 + $0x260] sm:$0xff] }
 0x27a   :  { %v2291_v33 = vld [vmem:[#allocation8 + $0x440] sm:$0xff]  ;;  %2498 = vmatpush.msrb.mxu1 %v2231_v24 }
 0x27b   :  { %v4890_v1 = vadd.f32 %v1671_v6, %v1607_v61  ;;  %v1482_v32 = vpop.f32.mrf.mxu0  ;;  %v1547_v2 = vpop.f32.mrf.mxu1  ;;  %v2167_v6 = vld [vmem:[#allocation8 + $0x60] sm:$0xff]  ;;  %2564 = vmatpush.msrb.mxu2 %v2291_v33  ;;  %v6344_v33 = vld [vmem:[#allocation40_spill] sm:$0xff] }
 0x27c   :  { %v2359_v61 = vld [vmem:[#allocation8 + $0x660] sm:$0xff] }
 0x27d   :  { %1868 = vmatmul.f32.gmra.mxu2 %v4435_v7  ;;  %1933 = vmatmul.f32.gmra.mxu3 %v4437_v8  ;;  %v1483_v7 = vadd.f32 %v1482_v32, %v4838_v46  ;;  %v6337_v32 = vld [vmem:[#allocation27_spill] sm:$0xff] }
 0x27e   :  { %1741 = vmatmul.f32.gmra.mxu0 %v4441_v9  ;;  %1806 = vmatmul.f32.gmra.mxu1 %v4443_v10  ;;  %v2175_v9 = vld [vmem:[#allocation8 + $0xa0] sm:$0xff] }
 0x27f   :  { %v2367_v10 = vld [vmem:[#allocation8 + $0x6a0] sm:$0xff]  ;;  %v1548_v30 = vadd.f32 %v1547_v2, %v1483_v7  ;;  %2431 = vmatpush.msrb.mxu0 %v2175_v9  ;;  %v6338_v2 = vld [vmem:[#allocation28_spill] sm:$0xff]  ;;  %v6339_v9 = vld [vmem:[#allocation30_spill] sm:$0xff]  ;;  %2565 = vmatpush.msrb.mxu2 %v2287_v49 }
 0x280   :  { %v1609_v14 = vpop.f32.mrf.mxu2  ;;  %v1674_v15 = vpop.f32.mrf.mxu3  ;;  %2626 = vmatpush.msrb.mxu3 %v2367_v10  ;;  %v2355_v10 = vld [vmem:[#allocation8 + $0x640] sm:$0xff] }
 0x281   :  { %v1610_v48 = vadd.f32 %v1609_v14, %v1545_v4  ;;  %2432 = vmatpush.msrb.mxu0 %v2171_v37  ;;  %v2227_v14 = vld [vmem:[#allocation8 + $0x240] sm:$0xff] }
 0x282   :  { %2627 = vmatpush.msrb.mxu3 %v2363_v42  ;;  %2499 = vmatpush.msrb.mxu1 %v2227_v14  ;;  %v2283_v42 = vld [vmem:[#allocation8 + $0x400] sm:$0xff]  ;;  %v4955_v14 = vstv %s4007_s5 }
 0x283   :  { %v4897_v16 = vadd.f32 %v1674_v15, %v1610_v48  ;;  %v1485_v8 = vpop.f32.mrf.mxu0  ;;  %v1550_v17 = vpop.f32.mrf.mxu1  ;;  %2433 = vmatpush.msrb.mxu0 %v2167_v6  ;;  %2566 = vmatpush.msrb.mxu2 %v2283_v42  ;;  %v2212_v42 = vld [vmem:[#allocation8 + $0x1c8] sm:$0xff] }
 0x284   :  { %2628 = vmatpush.msrb.mxu3 %v2359_v61 }
 0x285   :  { %1871 = vmatmul.f32.gmra.mxu2 %v4455_v50  ;;  %1936 = vmatmul.f32.gmra.mxu3 %v4457_v51  ;;  %v1486_v50 = vadd.f32 %v1485_v8, %v4838_v46  ;;  %v2159_v8 = vld [vmem:[#allocation8 + $0x20] sm:$0xff] }
 0x286   :  { %1744 = vmatmul.f32.gmra.mxu0 %v6332_v27  ;;  %1809 = vmatmul.f32.gmra.mxu1 %v6333_v28  ;;  %v2219_v27 = vld [vmem:[#allocation8 + $0x200] sm:$0xff]  ;;  %v6340_v28 = vld [vmem:[#allocation32_spill] sm:$0xff] }
 0x287   :  { %v1551_v62 = vadd.f32 %v1550_v17, %v1486_v50  ;;  %v2223_v17 = vld [vmem:[#allocation8 + $0x220] sm:$0xff]  ;;  %2629 = vmatpush.msrb.mxu3 %v2355_v10  ;;  %v6348_v10 = vld [vmem:[#allocation46_spill] sm:$0xff] }
 0x288   :  { %v1612_v31 = vpop.f32.mrf.mxu2  ;;  %v4903_v55 = vpop.f32.mrf.mxu3  ;;  %2500 = vmatpush.msrb.mxu1 %v2223_v17  ;;  %vm1962_vm0 = vcmp.gt.f32.partialorder %v6348_v10, 0.0 }
 0x289   :  { %v4905_v11 = vadd.f32 %v1612_v31, %v1548_v30 }
 0x28a   :  { %2501 = vmatpush.msrb.mxu1 %v2219_v27  ;;  %v6349_v27 = vld [vmem:[#allocation17_spill] sm:$0xff] }
 0x28b   :  { %v1488_v51 = vpop.f32.mrf.mxu0  ;;  %v1553_v40 = vpop.f32.mrf.mxu1  ;;  %vm1963_vm1 = vcmp.gt.f32.partialorder %v6349_v27, 0.0 }
 0x28d   :  { %1874 = vmatmul.f32.gmra.mxu2 %v4475_v45  ;;  %1939 = vmatmul.f32.gmra.mxu3 %v6308_v19  ;;  %v1489_v45 = vadd.f32 %v1488_v51, %v4838_v46 }
 0x28e   :  { %1747 = vmatmul.f32.gmra.mxu0 %v6334_v56  ;;  %1812 = vmatmul.f32.gmra.mxu1 %v6335_v57 }
 0x28f   :  { %v1554_v34 = vadd.f32 %v1553_v40, %v1489_v45 }
 0x290   :  { %v1615_v63 = vpop.f32.mrf.mxu2  ;;  %v4912_v39 = vpop.f32.mrf.mxu3 }
 0x291   :  { %v4914_v22 = vadd.f32 %v1615_v63, %v1551_v62 }
 0x293   :  { %v1491_v19 = vpop.f32.mrf.mxu0  ;;  %v1556_v36 = vpop.f32.mrf.mxu1 }
 0x294   :  { %v1492_v15 = vadd.f32 %v1491_v19, %v4838_v46 }
 0x295   :  { %1877 = vmatmul.f32.gmra.mxu2 %v6274_v58  ;;  %1942 = vmatmul.f32.gmra.mxu3 %v6336_v29  ;;  %v2163_v58 = vld [vmem:[#allocation8 + $0x40] sm:$0xff] }
 0x296   :  { %1750 = vmatmul.f32.gmra.mxu0 %v6337_v32  ;;  %1815 = vmatmul.f32.gmra.mxu1 %v6338_v2  ;;  %v1557_v30 = vadd.f32 %v1556_v36, %v1492_v15  ;;  %v2344_v36 = vld [vmem:[#allocation8 + $0x5e8] sm:$0xff]  ;;  %v6346_v15 = vld [vmem:[#allocation42_spill] sm:$0xff] }
 0x297   :  { %2434 = vmatpush.msrb.mxu0 %v2163_v58  ;;  %2811 = vmatpush.msra.mxu2 %v2344_v36  ;;  %v2408_v58 = vld [vmem:[#allocation8 + $0x7e8] sm:$0xff] }
 0x298   :  { %v1618_v12 = vpop.f32.mrf.mxu2  ;;  %v4921_v3 = vpop.f32.mrf.mxu3 }
 0x299   :  { %v4923_v4 = vadd.f32 %v1618_v12, %v1554_v34  ;;  %2435 = vmatpush.msrb.mxu0 %v2159_v8  ;;  %v6345_v34 = vld [vmem:[#allocation41_spill] sm:$0xff]  ;;  %v2216_v12 = vld [vmem:[#allocation8 + $0x1e8] sm:$0xff] }
 0x29b   :  { %v1494_v48 = vpop.f32.mrf.mxu0  ;;  %v1559_v7 = vpop.f32.mrf.mxu1  ;;  %2436 = vmatpush.msrb.mxu0 %v2155_v0  ;;  %v2027_v0 = vmul.f32 %v4955_v14, %v6348_v10 }
 0x29d   :  { %1880 = vmatmul.f32.gmra.mxu2 %v6315_v53  ;;  %1945 = vmatmul.f32.gmra.mxu3 %v6339_v9  ;;  %v1495_v53 = vadd.f32 %v1494_v48, %v4838_v46  ;;  %v6347_v48 = vld [vmem:[#allocation43_spill] sm:$0xff] }
 0x29e   :  { %1753 = vmatmul.f32.gmra.mxu0 %v6317_v5  ;;  %1818 = vmatmul.f32.gmra.mxu1 %v6340_v28  ;;  %v2351_v5 = vld [vmem:[#allocation8 + $0x620] sm:$0xff]  ;;  %v2028_v28 = vmul.f32 %v4955_v14, %v6349_v27 }
 0x29f   :  { %v1560_v56 = vadd.f32 %v1559_v7, %v1495_v53  ;;  %2630 = vmatpush.msrb.mxu3 %v2351_v5  ;;  %v2340_v7 = vld [vmem:[#allocation8 + $0x5c8] sm:$0xff]  ;;  %2681 = vmatpush.msra.mxu0 %v2216_v12 }
 0x2a0   :  { %v1621_v31 = vpop.f32.mrf.mxu2  ;;  %v4930_v50 = vpop.f32.mrf.mxu3  ;;  %2812 = vmatpush.msra.mxu2 %v2340_v7  ;;  %v2404_v5 = vld [vmem:[#allocation8 + $0x7c8] sm:$0xff] }
 0x2a1   :  { %v4932_v51 = vadd.f32 %v1621_v31, %v1557_v30  ;;  %2682 = vmatpush.msra.mxu0 %v2212_v42  ;;  %v2332_v12 = vld [vmem:[#allocation8 + $0x588] sm:$0xff] }
 0x2a3   :  { %v1497_v40 = vpop.f32.mrf.mxu0  ;;  %v1562_v37 = vpop.f32.mrf.mxu1 }
 0x2a4   :  { %v1498_v63 = vadd.f32 %v1497_v40, %v4838_v46  ;;  %v4973_v40 = vsel %vm1962_vm0, %v6348_v10, %v2027_v0 }
 0x2a5   :  { %1883 = vmatmul.f32.gmra.mxu2 %v6283_v20  ;;  %1948 = vmatmul.f32.gmra.mxu3 %v6284_v23  ;;  %v6342_v20 = vld [vmem:[#allocation37_spill] sm:$0xff]  ;;  %v2347_v23 = vld [vmem:[#allocation8 + $0x600] sm:$0xff] }
 0x2a6   :  { %1756 = vmatmul.f32.gmra.mxu0 %v6320_v26  ;;  %1821 = vmatmul.f32.gmra.mxu1 %v6341_v60  ;;  %v6343_v26 = vld [vmem:[#allocation38_spill] sm:$0xff]  ;;  %v1563_v29 = vadd.f32 %v1562_v37, %v1498_v63  ;;  %v4976_v37 = vsel %vm1963_vm1, %v6349_v27, %v2028_v28  ;;  %v2276_v60 = vld [vmem:[#allocation8 + $0x3c8] sm:$0xff]  ;;  %vm1980_vm1 = vcmp.gt.f32.partialorder %v4876_v59, 0.0 }
 0x2a7   :  { %2631 = vmatpush.msrb.mxu3 %v2347_v23 }
 0x2a8   :  { %v1624_v57 = vpop.f32.mrf.mxu2  ;;  %v4939_v44 = vpop.f32.mrf.mxu3 }
 0x2a9   :  { %v4941_v62 = vadd.f32 %v1624_v57, %v1560_v56  ;;  %2876 = vmatpush.msra.mxu3 %v2408_v58  ;;  %v4981_v57 = vperm.slane %v4835_v35, 3 }
 0x2ab   :  { %v1500_v45 = vpop.f32.mrf.mxu0  ;;  %v1565_v19 = vpop.f32.mrf.mxu1  ;;  %2877 = vmatpush.msra.mxu3 %v2404_v5 }
 0x2ac   :  { %v1501_v32 = vadd.f32 %v1500_v45, %v4838_v46  ;;  %v6350_v45 = vld [vmem:[#allocation47_spill] sm:$0xff] }
 0x2ad   :  { %1886 = vmatmul.f32.gmra.mxu2 %v4555_v18  ;;  %1951 = vmatmul.f32.gmra.mxu3 %v6342_v20  ;;  %v6351_v20 = vld [vmem:[#allocation18_spill] sm:$0xff]  ;;  %vm1966_vm3 = vcmp.gt.f32.partialorder %v6350_v45, 0.0 }
 0x2ae   :  { %1759 = vmatmul.f32.gmra.mxu0 %v6343_v26  ;;  %1824 = vmatmul.f32.gmra.mxu1 %v6324_v52  ;;  %v2280_v52 = vld [vmem:[#allocation8 + $0x3e8] sm:$0xff]  ;;  %v1566_v8 = vadd.f32 %v1565_v19, %v1501_v32  ;;  %v2031_v19 = vmul.f32 %v4955_v14, %v6350_v45  ;;  %v2032_v23 = vmul.f32 %v4955_v14, %v6351_v20  ;;  %vm1967_vm4 = vcmp.gt.f32.partialorder %v6351_v20, 0.0 }
 0x2af   :  { %2746 = vmatpush.msra.mxu1 %v2280_v52 }
 0x2b0   :  { %v1627_v6 = vpop.f32.mrf.mxu2  ;;  %v4948_v61 = vpop.f32.mrf.mxu3  ;;  %v5002_v32 = vsel %vm1966_vm3, %v6350_v45, %v2031_v19  ;;  %v2037_v45 = vmul.f32 %v4955_v14, %v4862_v38 }
 0x2b1   :  { %v4950_v24 = vadd.f32 %v1627_v6, %v1563_v29  ;;  %2747 = vmatpush.msra.mxu1 %v2276_v60  ;;  %v2204_v60 = vld [vmem:[#allocation8 + $0x188] sm:$0xff] }
 0x2b3   :  { %v1503_v18 = vpop.f32.mrf.mxu0  ;;  %v1568_v2 = vpop.f32.mrf.mxu1 }
 0x2b4   :  { %v1504_v30 = vadd.f32 %v1503_v18, %v4838_v46  ;;  %v2336_v46 = vld [vmem:[#allocation8 + $0x5a8] sm:$0xff]  ;;  %v5005_v18 = vsel %vm1967_vm4, %v6351_v20, %v2032_v23  ;;  %v6355_v23 = vld [vmem:[#allocation49_spill] sm:$0xff] }
 0x2b5   :  { %1889 = vmatmul.f32.gmra.mxu2 %v6344_v33  ;;  %1954 = vmatmul.f32.gmra.mxu3 %v6345_v34  ;;  %v2400_v33 = vld [vmem:[#allocation8 + $0x7a8] sm:$0xff]  ;;  %vm1974_vm10 = vcmp.gt.f32.partialorder %v6355_v23, 0.0 }
 0x2b6   :  { %1762 = vmatmul.f32.gmra.mxu0 %v6346_v15  ;;  %1827 = vmatmul.f32.gmra.mxu1 %v6347_v48  ;;  %v1569_v56 = vadd.f32 %v1568_v2, %v1504_v30  ;;  %v2208_v2 = vld [vmem:[#allocation8 + $0x1a8] sm:$0xff] }
 0x2b7   :  { %2813 = vmatpush.msra.mxu2 %v2336_v46  ;;  %v2272_v34 = vld [vmem:[#allocation8 + $0x3a8] sm:$0xff]  ;;  %2683 = vmatpush.msra.mxu0 %v2208_v2 }
 0x2b8   :  { %v1630_v17 = vpop.f32.mrf.mxu2  ;;  %v4959_v9 = vpop.f32.mrf.mxu3  ;;  %2878 = vmatpush.msra.mxu3 %v2400_v33  ;;  %2748 = vmatpush.msra.mxu1 %v2272_v34  ;;  %v6352_v48 = vld [vmem:[#allocation48_spill] sm:$0xff] }
 0x2b9   :  { %v4965_v49 = vadd.f32 %v1630_v17, %v1566_v8  ;;  %2814 = vmatpush.msra.mxu2 %v2332_v12  ;;  %v2035_v7 = vmul.f32 %v4955_v14, %v6352_v48  ;;  %v6353_v8 = vld [vmem:[#allocation58_spill] sm:$0xff]  ;;  %vm1970_vm6 = vcmp.gt.f32.partialorder %v6352_v48, 0.0  ;;  %v2396_v46 = vld [vmem:[#allocation8 + $0x788] sm:$0xff]  ;;  %2684 = vmatpush.msra.mxu0 %v2204_v60 }
 0x2ba   :  { %v2036_v17 = vmul.f32 %v4955_v14, %v6353_v8  ;;  %vm1971_vm7 = vcmp.gt.f32.partialorder %v6353_v8, 0.0  ;;  %2879 = vmatpush.msra.mxu3 %v2396_v46  ;;  %v6357_v60 = vld [vmem:[#allocation50_spill] sm:$0xff] }
 0x2bb   :  { %v1718_v31 = vpop.f32.mrf.mxu0  ;;  %v1783_v53 = vpop.f32.mrf.mxu1  ;;  %v5025_v42 = vsel %vm1970_vm6, %v6352_v48, %v2035_v7  ;;  %v2200_v7 = vld [vmem:[#allocation8 + $0x168] sm:$0xff]  ;;  %v2043_v46 = vmul.f32 %v4955_v14, %v6357_v60  ;;  %vm1978_vm14 = vcmp.gt.f32.partialorder %v6357_v60, 0.0 }
 0x2bc   :  { %v1719_v26 = vadd.f32 %v1718_v31, %v4981_v57  ;;  %v5028_v5 = vsel %vm1971_vm7, %v6353_v8, %v2036_v17  ;;  %v2392_v8 = vld [vmem:[#allocation8 + $0x768] sm:$0xff]  ;;  %2685 = vmatpush.msra.mxu0 %v2200_v7  ;;  %v2045_v7 = vmul.f32 %v4955_v14, %v4876_v59 }
 0x2bd   :  { %1892 = vmatmul.f32.gmra.mxu2 %v4596_v13  ;;  %1957 = vmatmul.f32.gmra.mxu3 %v6328_v25  ;;  %v2029_v25 = vmul.f32 %v4955_v14, %v4848_v41  ;;  %6354 = vst [vmem:[#allocation45_spill] sm:$0xff] %v5028_v5  ;;  %v2264_v17 = vld [vmem:[#allocation8 + $0x368] sm:$0xff] }
 0x2be   :  { %2437 = vmatmul.f32.vlgmr.msrb.gmra.mxu0 %v4973_v40  ;;  %2502 = vmatmul.f32.vlgmr.msrb.gmra.mxu1 %v4976_v37  ;;  %v1784_v58 = vadd.f32 %v1783_v53, %v1719_v26  ;;  %v2039_v26 = vmul.f32 %v4955_v14, %v6355_v23 }
 0x2bf   :  { %v4998_v6 = vsel %vm1964_vm2, %v4848_v41, %v2029_v25  ;;  %v2033_v41 = vmul.f32 %v4955_v14, %v4855_v54  ;;  %2880 = vmatpush.msra.mxu3 %v2392_v8 }
 0x2c0   :  { %v1633_v13 = vpop.f32.mrf.mxu2  ;;  %v4985_v63 = vpop.f32.mrf.mxu3 }
 0x2c1   :  { %v4992_v35 = vadd.f32 %v1633_v13, %v1569_v56  ;;  %v5020_v31 = vsel %vm1968_vm5, %v4855_v54, %v2033_v41  ;;  %v2268_v56 = vld [vmem:[#allocation8 + $0x388] sm:$0xff]  ;;  %v5046_v41 = vsel %vm1972_vm9, %v4862_v38, %v2037_v45  ;;  %vm1984_vm5 = vcmp.gt.f32.partialorder %v4883_v43, 0.0 }
 0x2c2   :  { %v2328_v54 = vld [vmem:[#allocation8 + $0x568] sm:$0xff]  ;;  %2749 = vmatpush.msra.mxu1 %v2268_v56  ;;  %vm1988_vm9 = vcmp.gt.f32.partialorder %v4890_v1, 0.0 }
 0x2c3   :  { %v1721_v36 = vpop.f32.mrf.mxu0  ;;  %v1786_v29 = vpop.f32.mrf.mxu1  ;;  %2815 = vmatpush.msra.mxu2 %v2328_v54  ;;  %v2324_v38 = vld [vmem:[#allocation8 + $0x548] sm:$0xff] }
 0x2c4   :  { %v1722_v0 = vadd.f32 %v1721_v36, %v4981_v57  ;;  %v6356_v36 = vld [vmem:[#allocation59_spill] sm:$0xff]  ;;  %2750 = vmatpush.msra.mxu1 %v2264_v17  ;;  %v6358_v56 = vld [vmem:[#allocation60_spill] sm:$0xff] }
 0x2c5   :  { %2567 = vmatmul.f32.vlgmr.msrb.gmra.mxu2 %v4998_v6  ;;  %v2040_v2 = vmul.f32 %v4955_v14, %v6356_v36  ;;  %vm1975_vm11 = vcmp.gt.f32.partialorder %v6356_v36, 0.0  ;;  %v2044_v54 = vmul.f32 %v4955_v14, %v6358_v56  ;;  %vm1979_vm15 = vcmp.gt.f32.partialorder %v6358_v56, 0.0 }
 0x2c6   :  { %2440 = vmatmul.f32.gmra.mxu0 %v5002_v32  ;;  %2505 = vmatmul.f32.gmra.mxu1 %v5005_v18  ;;  %v1787_v25 = vadd.f32 %v1786_v29, %v1722_v0 }
 0x2c7   :  { %v5054_v48 = vsel %vm1975_vm11, %v6356_v36, %v2040_v2  ;;  %2816 = vmatpush.msra.mxu2 %v2324_v38  ;;  %v5077_v36 = vsel %vm1978_vm14, %v6357_v60, %v2043_v46  ;;  %v5080_v2 = vsel %vm1979_vm15, %v6358_v56, %v2044_v54  ;;  %v6359_v38 = vld [vmem:[#allocation51_spill] sm:$0xff]  ;;  %v5098_v54 = vsel %vm1980_vm1, %v4876_v59, %v2045_v7  ;;  %v2316_v59 = vld [vmem:[#allocation8 + $0x508] sm:$0xff] }
 0x2c8   :  { %v1848_v52 = vpop.f32.mrf.mxu2  ;;  %v1913_v15 = vpop.f32.mrf.mxu3  ;;  %vm1982_vm2 = vcmp.gt.f32.partialorder %v6359_v38, 0.0 }
 0x2c9   :  { %v1849_v10 = vadd.f32 %v1848_v52, %v1784_v58 }
 0x2cb   :  { %v1914_v27 = vadd.f32 %v1913_v15, %v1849_v10  ;;  %v1724_v28 = vpop.f32.mrf.mxu0  ;;  %v1789_v30 = vpop.f32.mrf.mxu1  ;;  %v5051_v15 = vsel %vm1974_vm10, %v6355_v23, %v2039_v26 }
 0x2cc   :  { %v1725_v29 = vadd.f32 %v1724_v28, %v4981_v57 }
 0x2cd   :  { %vm1965_vm8 = vcmp.gt.f32.partialorder %v1914_v27, 0.0  ;;  %v2030_v53 = vmul.f32 %v4955_v14, %v1914_v27  ;;  %2570 = vmatmul.f32.gmra.mxu2 %v5020_v31 }
 0x2ce   :  { %2443 = vmatmul.f32.gmra.mxu0 %v5025_v42  ;;  %2508 = vmatmul.f32.gmra.mxu1 %v5028_v5  ;;  %v1790_v10 = vadd.f32 %v1789_v30, %v1725_v29  ;;  %v2388_v29 = vld [vmem:[#allocation8 + $0x748] sm:$0xff] }
 0x2cf   :  { %v5032_v13 = vsel %vm1965_vm8, %v1914_v27, %v2030_v53  ;;  %v2041_v27 = vmul.f32 %v4955_v14, %v4869_v47  ;;  %2881 = vmatpush.msra.mxu3 %v2388_v29 }
 0x2d0   :  { %v1851_v19 = vpop.f32.mrf.mxu2  ;;  %v1916_v20 = vpop.f32.mrf.mxu3  ;;  %2632 = vmatmul.f32.vlgmr.msrb.gmra.mxu3 %v5032_v13 }
 0x2d1   :  { %v1852_v33 = vadd.f32 %v1851_v19, %v1787_v25  ;;  %v5072_v23 = vsel %vm1976_vm13, %v4869_v47, %v2041_v27  ;;  %v2320_v47 = vld [vmem:[#allocation8 + $0x528] sm:$0xff]  ;;  %v6360_v27 = vld [vmem:[#allocation61_spill] sm:$0xff]  ;;  %vm1992_vm13 = vcmp.gt.f32.partialorder %v4897_v16, 0.0 }
 0x2d2   :  { %2817 = vmatpush.msra.mxu2 %v2320_v47  ;;  %vm1983_vm3 = vcmp.gt.f32.partialorder %v6360_v27, 0.0  ;;  %v2049_v47 = vmul.f32 %v4955_v14, %v4883_v43 }
 0x2d3   :  { %v1917_v34 = vadd.f32 %v1916_v20, %v1852_v33  ;;  %v1727_v12 = vpop.f32.mrf.mxu0  ;;  %v1792_v58 = vpop.f32.mrf.mxu1  ;;  %v2196_v33 = vld [vmem:[#allocation8 + $0x148] sm:$0xff] }
 0x2d4   :  { %v1728_v30 = vadd.f32 %v1727_v12, %v4981_v57  ;;  %2686 = vmatpush.msra.mxu0 %v2196_v33  ;;  %v2384_v33 = vld [vmem:[#allocation8 + $0x728] sm:$0xff]  ;;  %2818 = vmatpush.msra.mxu2 %v2316_v59 }
 0x2d5   :  { %v2034_v52 = vmul.f32 %v4955_v14, %v1917_v34  ;;  %2573 = vmatmul.f32.gmra.mxu2 %v5046_v41  ;;  %vm1969_vm12 = vcmp.gt.f32.partialorder %v1917_v34, 0.0  ;;  %2882 = vmatpush.msra.mxu3 %v2384_v33  ;;  %v2380_v59 = vld [vmem:[#allocation8 + $0x708] sm:$0xff] }
 0x2d6   :  { %2446 = vmatmul.f32.gmra.mxu0 %v5051_v15  ;;  %2511 = vmatmul.f32.gmra.mxu1 %v5054_v48  ;;  %v1793_v12 = vadd.f32 %v1792_v58, %v1728_v30 }
 0x2d7   :  { %v5058_v0 = vsel %vm1969_vm12, %v1917_v34, %v2034_v52  ;;  %v2260_v34 = vld [vmem:[#allocation8 + $0x348] sm:$0xff]  ;;  %2883 = vmatpush.msra.mxu3 %v2380_v59 }
 0x2d8   :  { %v1854_v28 = vpop.f32.mrf.mxu2  ;;  %v1919_v53 = vpop.f32.mrf.mxu3  ;;  %2635 = vmatmul.f32.gmra.mxu3 %v5058_v0  ;;  %2751 = vmatpush.msra.mxu1 %v2260_v34 }
 0x2d9   :  { %v1855_v25 = vadd.f32 %v1854_v28, %v1790_v10  ;;  %v2047_v10 = vmul.f32 %v4955_v14, %v6359_v38  ;;  %v2048_v28 = vmul.f32 %v4955_v14, %v6360_v27 }
 0x2db   :  { %v1920_v45 = vadd.f32 %v1919_v53, %v1855_v25  ;;  %v1730_v19 = vpop.f32.mrf.mxu0  ;;  %v1795_v20 = vpop.f32.mrf.mxu1  ;;  %v5103_v30 = vsel %vm1982_vm2, %v6359_v38, %v2047_v10  ;;  %v6364_v38 = vld [vmem:[#allocation62_spill] sm:$0xff] }
 0x2dc   :  { %v1731_v58 = vadd.f32 %v1730_v19, %v4981_v57  ;;  %v2256_v19 = vld [vmem:[#allocation8 + $0x328] sm:$0xff]  ;;  %v2052_v10 = vmul.f32 %v4955_v14, %v6364_v38  ;;  %vm1987_vm7 = vcmp.gt.f32.partialorder %v6364_v38, 0.0 }
 0x2dd   :  { %v2038_v26 = vmul.f32 %v4955_v14, %v1920_v45  ;;  %2576 = vmatmul.f32.gmra.mxu2 %v5072_v23  ;;  %vm1973_vm0 = vcmp.gt.f32.partialorder %v1920_v45, 0.0  ;;  %2752 = vmatpush.msra.mxu1 %v2256_v19  ;;  %v2188_v19 = vld [vmem:[#allocation8 + $0x108] sm:$0xff] }
 0x2de   :  { %2449 = vmatmul.f32.gmra.mxu0 %v5077_v36  ;;  %2514 = vmatmul.f32.gmra.mxu1 %v5080_v2  ;;  %v1796_v29 = vadd.f32 %v1795_v20, %v1731_v58  ;;  %v5132_v33 = vsel %vm1987_vm7, %v6364_v38, %v2052_v10  ;;  %v6369_v10 = vld [vmem:[#allocation63_spill] sm:$0xff] }
 0x2df   :  { %v5084_v52 = vsel %vm1973_vm0, %v1920_v45, %v2038_v26  ;;  %v5106_v45 = vsel %vm1983_vm3, %v6360_v27, %v2048_v28  ;;  %v2192_v26 = vld [vmem:[#allocation8 + $0x128] sm:$0xff]  ;;  %6366 = vst [vmem:[#allocation20_spill] sm:$0xff] %v5132_v33  ;;  %vm1991_vm11 = vcmp.gt.f32.partialorder %v6369_v10, 0.0 }
 0x2e0   :  { %v1857_v8 = vpop.f32.mrf.mxu2  ;;  %v1922_v17 = vpop.f32.mrf.mxu3  ;;  %2638 = vmatmul.f32.gmra.mxu3 %v5084_v52  ;;  %6361 = vst [vmem:[#allocation15_spill] sm:$0xff] %v5106_v45  ;;  %2687 = vmatpush.msra.mxu0 %v2192_v26 }
 0x2e1   :  { %v1858_v53 = vadd.f32 %v1857_v8, %v1793_v12  ;;  %v6363_v8 = vld [vmem:[#allocation52_spill] sm:$0xff] }
 0x2e2   :  { %vm1986_vm6 = vcmp.gt.f32.partialorder %v6363_v8, 0.0  ;;  %2688 = vmatpush.msra.mxu0 %v2188_v19 }
 0x2e3   :  { %v1923_v60 = vadd.f32 %v1922_v17, %v1858_v53  ;;  %v1733_v46 = vpop.f32.mrf.mxu0  ;;  %v1798_v56 = vpop.f32.mrf.mxu1  ;;  %v2051_v17 = vmul.f32 %v4955_v14, %v6363_v8 }
 0x2e4   :  { %v1734_v20 = vadd.f32 %v1733_v46, %v4981_v57  ;;  %v2252_v46 = vld [vmem:[#allocation8 + $0x308] sm:$0xff] }
 0x2e5   :  { %v2042_v25 = vmul.f32 %v4955_v14, %v1923_v60  ;;  %2579 = vmatmul.f32.gmra.mxu2 %v5098_v54  ;;  %vm1977_vm4 = vcmp.gt.f32.partialorder %v1923_v60, 0.0  ;;  %v5129_v26 = vsel %vm1986_vm6, %v6363_v8, %v2051_v17  ;;  %2753 = vmatpush.msra.mxu1 %v2252_v46  ;;  %v6368_v17 = vld [vmem:[#allocation53_spill] sm:$0xff] }
 0x2e6   :  { %2452 = vmatmul.f32.gmra.mxu0 %v5103_v30  ;;  %2517 = vmatmul.f32.gmra.mxu1 %v5106_v45  ;;  %6365 = vst [vmem:[#allocation19_spill] sm:$0xff] %v5129_v26  ;;  %v2055_v38 = vmul.f32 %v4955_v14, %v6368_v17  ;;  %vm1990_vm10 = vcmp.gt.f32.partialorder %v6368_v17, 0.0 }
 0x2e7   :  { %v5110_v34 = vsel %vm1977_vm4, %v1923_v60, %v2042_v25  ;;  %v5124_v60 = vsel %vm1984_vm5, %v4883_v43, %v2049_v47  ;;  %v2312_v43 = vld [vmem:[#allocation8 + $0x4e8] sm:$0xff] }
 0x2e8   :  { %6362 = vst [vmem:[#allocation16_spill] sm:$0xff] %v5110_v34  ;;  %v1860_v12 = vpop.f32.mrf.mxu2  ;;  %v1925_v7 = vpop.f32.mrf.mxu3  ;;  %2641 = vmatmul.f32.gmra.mxu3 %v5110_v34  ;;  %2819 = vmatpush.msra.mxu2 %v2312_v43  ;;  %v5155_v46 = vsel %vm1990_vm10, %v6368_v17, %v2055_v38 }
 0x2e9   :  { %v1861_v27 = vadd.f32 %v1860_v12, %v1796_v29  ;;  %v1799_v29 = vadd.f32 %v1798_v56, %v1734_v20  ;;  %v2053_v12 = vmul.f32 %v4955_v14, %v4890_v1  ;;  %6371 = vst [vmem:[#allocation24_spill] sm:$0xff] %v5155_v46 }
 0x2eb   :  { %v1926_v28 = vadd.f32 %v1925_v7, %v1861_v27  ;;  %v1736_v53 = vpop.f32.mrf.mxu0  ;;  %v1801_v58 = vpop.f32.mrf.mxu1  ;;  %v2056_v27 = vmul.f32 %v4955_v14, %v6369_v10  ;;  %v5150_v19 = vsel %vm1988_vm9, %v4890_v1, %v2053_v12  ;;  %v2308_v1 = vld [vmem:[#allocation8 + $0x4c8] sm:$0xff] }
 0x2ec   :  { %v1737_v56 = vadd.f32 %v1736_v53, %v4981_v57  ;;  %6370 = vst [vmem:[#allocation23_spill] sm:$0xff] %v5150_v19  ;;  %v2248_v53 = vld [vmem:[#allocation8 + $0x2e8] sm:$0xff]  ;;  %2820 = vmatpush.msra.mxu2 %v2308_v1 }
 0x2ed   :  { %v2046_v25 = vmul.f32 %v4955_v14, %v1926_v28  ;;  %2582 = vmatmul.f32.gmra.mxu2 %v5124_v60  ;;  %vm1981_vm8 = vcmp.gt.f32.partialorder %v1926_v28, 0.0  ;;  %v5158_v43 = vsel %vm1991_vm11, %v6369_v10, %v2056_v27  ;;  %2754 = vmatpush.msra.mxu1 %v2248_v53  ;;  %v6374_v10 = vld [vmem:[#allocation54_spill] sm:$0xff] }
 0x2ee   :  { %2455 = vmatmul.f32.gmra.mxu0 %v5129_v26  ;;  %2520 = vmatmul.f32.gmra.mxu1 %v5132_v33  ;;  %6372 = vst [vmem:[#allocation26_spill] sm:$0xff] %v5158_v43  ;;  %v2059_v27 = vmul.f32 %v4955_v14, %v6374_v10  ;;  %vm1994_vm14 = vcmp.gt.f32.partialorder %v6374_v10, 0.0 }
 0x2ef   :  { %v5136_v47 = vsel %vm1981_vm8, %v1926_v28, %v2046_v25 }
 0x2f0   :  { %6367 = vst [vmem:[#allocation21_spill] sm:$0xff] %v5136_v47  ;;  %v1863_v7 = vpop.f32.mrf.mxu2  ;;  %v1928_v8 = vpop.f32.mrf.mxu3  ;;  %2644 = vmatmul.f32.gmra.mxu3 %v5136_v47  ;;  %v5183_v1 = vsel %vm1994_vm14, %v6374_v10, %v2059_v27  ;;  %v6380_v27 = vld [vmem:[#allocation22_spill] sm:$0xff] }
 0x2f1   :  { %v1864_v33 = vadd.f32 %v1863_v7, %v1799_v29  ;;  %v2184_v29 = vld [vmem:[#allocation8 + $0xe8] sm:$0xff]  ;;  %6376 = vst [vmem:[#allocation28_spill] sm:$0xff] %v5183_v1  ;;  %vm1999_vm3 = vcmp.gt.f32.partialorder %v6380_v27, 0.0 }
 0x2f2   :  { %v2376_v7 = vld [vmem:[#allocation8 + $0x6e8] sm:$0xff]  ;;  %2689 = vmatpush.msra.mxu0 %v2184_v29  ;;  %v1678_v29 = vadd.f32 %v4903_v55, %v4905_v11 }
 0x2f3   :  { %v1929_v20 = vadd.f32 %v1928_v8, %v1864_v33  ;;  %v1739_v28 = vpop.f32.mrf.mxu0  ;;  %v1804_v25 = vpop.f32.mrf.mxu1  ;;  %v1802_v33 = vadd.f32 %v1801_v58, %v1737_v56  ;;  %2884 = vmatpush.msra.mxu3 %v2376_v7  ;;  %v2057_v8 = vmul.f32 %v4955_v14, %v4897_v16 }
 0x2f4   :  { %v1740_v58 = vadd.f32 %v1739_v28, %v4981_v57  ;;  %v2180_v28 = vld [vmem:[#allocation8 + $0xc8] sm:$0xff]  ;;  %vm1996_vm1 = vcmp.gt.f32.partialorder %v1678_v29, 0.0 }
 0x2f5   :  { %v2050_v59 = vmul.f32 %v4955_v14, %v1929_v20  ;;  %2585 = vmatmul.f32.gmra.mxu2 %v5150_v19  ;;  %vm1985_vm12 = vcmp.gt.f32.partialorder %v1929_v20, 0.0  ;;  %v5178_v7 = vsel %vm1992_vm13, %v4897_v16, %v2057_v8  ;;  %v2304_v16 = vld [vmem:[#allocation8 + $0x4a8] sm:$0xff]  ;;  %2690 = vmatpush.msra.mxu0 %v2180_v28  ;;  %v2061_v8 = vmul.f32 %v4955_v14, %v1678_v29 }
 0x2f6   :  { %2458 = vmatmul.f32.gmra.mxu0 %v5155_v46  ;;  %2523 = vmatmul.f32.gmra.mxu1 %v5158_v43  ;;  %v6375_v46 = vld [vmem:[#allocation64_spill] sm:$0xff]  ;;  %v1805_v55 = vadd.f32 %v1804_v25, %v1740_v58  ;;  %v1681_v28 = vadd.f32 %v4912_v39, %v4914_v22 }
 0x2f7   :  { %v5162_v12 = vsel %vm1985_vm12, %v1929_v20, %v2050_v59  ;;  %v2060_v43 = vmul.f32 %v4955_v14, %v6375_v46  ;;  %vm1995_vm15 = vcmp.gt.f32.partialorder %v6375_v46, 0.0  ;;  %2821 = vmatpush.msra.mxu2 %v2304_v16  ;;  %v2300_v39 = vld [vmem:[#allocation8 + $0x488] sm:$0xff] }
 0x2f8   :  { %6373 = vst [vmem:[#allocation27_spill] sm:$0xff] %v5162_v12  ;;  %v1866_v17 = vpop.f32.mrf.mxu2  ;;  %v1931_v38 = vpop.f32.mrf.mxu3  ;;  %2647 = vmatmul.f32.gmra.mxu3 %v5162_v12  ;;  %vm2000_vm5 = vcmp.gt.f32.partialorder %v1681_v28, 0.0 }
 0x2f9   :  { %v1867_v19 = vadd.f32 %v1866_v17, %v1802_v33  ;;  %v5186_v33 = vsel %vm1995_vm15, %v6375_v46, %v2060_v43  ;;  %v2244_v17 = vld [vmem:[#allocation8 + $0x2c8] sm:$0xff]  ;;  %v6379_v46 = vld [vmem:[#allocation55_spill] sm:$0xff]  ;;  %2822 = vmatpush.msra.mxu2 %v2300_v39 }
 0x2fa   :  { %6377 = vst [vmem:[#allocation30_spill] sm:$0xff] %v5186_v33  ;;  %2755 = vmatpush.msra.mxu1 %v2244_v17  ;;  %v2063_v43 = vmul.f32 %v4955_v14, %v6379_v46  ;;  %vm1998_vm2 = vcmp.gt.f32.partialorder %v6379_v46, 0.0 }
 0x2fb   :  { %v1932_v56 = vadd.f32 %v1931_v38, %v1867_v19  ;;  %v1742_v20 = vpop.f32.mrf.mxu0  ;;  %v1807_v59 = vpop.f32.mrf.mxu1  ;;  %v2372_v19 = vld [vmem:[#allocation8 + $0x6c8] sm:$0xff] }
 0x2fc   :  { %2885 = vmatpush.msra.mxu3 %v2372_v19  ;;  %v1743_v25 = vadd.f32 %v1742_v20, %v4981_v57  ;;  %v5203_v19 = vsel %vm1996_vm1, %v1678_v29, %v2061_v8  ;;  %v5208_v16 = vsel %vm1998_vm2, %v6379_v46, %v2063_v43  ;;  %v2176_v20 = vld [vmem:[#allocation8 + $0xa8] sm:$0xff]  ;;  %v2065_v8 = vmul.f32 %v4955_v14, %v1681_v28 }
 0x2fd   :  { %v2054_v53 = vmul.f32 %v4955_v14, %v1932_v56  ;;  %2588 = vmatmul.f32.gmra.mxu2 %v5178_v7  ;;  %vm1989_vm0 = vcmp.gt.f32.partialorder %v1932_v56, 0.0  ;;  %6381 = vst [vmem:[#allocation36_spill] sm:$0xff] %v5208_v16  ;;  %2691 = vmatpush.msra.mxu0 %v2176_v20  ;;  %v1684_v20 = vadd.f32 %v4921_v3, %v4923_v4  ;;  %v2296_v3 = vld [vmem:[#allocation8 + $0x468] sm:$0xff] }
 0x2fe   :  { %2461 = vmatmul.f32.gmra.mxu0 %v5183_v1  ;;  %2526 = vmatmul.f32.gmra.mxu1 %v5186_v33  ;;  %v2064_v1 = vmul.f32 %v4955_v14, %v6380_v27  ;;  %v1808_v22 = vadd.f32 %v1807_v59, %v1743_v25 }
 0x2ff   :  { %v5190_v11 = vsel %vm1989_vm0, %v1932_v56, %v2054_v53  ;;  %vm2004_vm9 = vcmp.gt.f32.partialorder %v1684_v20, 0.0  ;;  %2823 = vmatpush.msra.mxu2 %v2296_v3 }
 0x300   :  { %6378 = vst [vmem:[#allocation32_spill] sm:$0xff] %v5190_v11  ;;  %v1869_v38 = vpop.f32.mrf.mxu2  ;;  %v1934_v10 = vpop.f32.mrf.mxu3  ;;  %2650 = vmatmul.f32.gmra.mxu3 %v5190_v11 }
 0x301   :  { %v1870_v33 = vadd.f32 %v1869_v38, %v1805_v55  ;;  %v5211_v55 = vsel %vm1999_vm3, %v6380_v27, %v2064_v1  ;;  %v2240_v38 = vld [vmem:[#allocation8 + $0x2a8] sm:$0xff]  ;;  %v6384_v1 = vld [vmem:[#allocation25_spill] sm:$0xff] }
 0x302   :  { %6382 = vst [vmem:[#allocation37_spill] sm:$0xff] %v5211_v55  ;;  %2756 = vmatpush.msra.mxu1 %v2240_v38  ;;  %v2067_v43 = vmul.f32 %v4955_v14, %v6384_v1  ;;  %v6385_v27 = vld [vmem:[#allocation65_spill] sm:$0xff]  ;;  %vm2002_vm6 = vcmp.gt.f32.partialorder %v6384_v1, 0.0 }
 0x303   :  { %v1935_v58 = vadd.f32 %v1934_v10, %v1870_v33  ;;  %v1745_v56 = vpop.f32.mrf.mxu0  ;;  %v1810_v53 = vpop.f32.mrf.mxu1  ;;  %v2368_v33 = vld [vmem:[#allocation8 + $0x6a8] sm:$0xff]  ;;  %vm2003_vm7 = vcmp.gt.f32.partialorder %v6385_v27, 0.0 }
 0x304   :  { %2886 = vmatpush.msra.mxu3 %v2368_v33  ;;  %v1746_v59 = vadd.f32 %v1745_v56, %v4981_v57  ;;  %v5228_v33 = vsel %vm2000_vm5, %v1681_v28, %v2065_v8  ;;  %v5233_v39 = vsel %vm2002_vm6, %v6384_v1, %v2067_v43  ;;  %v2172_v56 = vld [vmem:[#allocation8 + $0x88] sm:$0xff]  ;;  %v2069_v8 = vmul.f32 %v4955_v14, %v1684_v20 }
 0x305   :  { %v2058_v17 = vmul.f32 %v4955_v14, %v1935_v58  ;;  %2591 = vmatmul.f32.gmra.mxu2 %v5203_v19  ;;  %vm1993_vm4 = vcmp.gt.f32.partialorder %v1935_v58, 0.0  ;;  %6386 = vst [vmem:[#allocation40_spill] sm:$0xff] %v5233_v39  ;;  %2692 = vmatpush.msra.mxu0 %v2172_v56  ;;  %v1687_v56 = vadd.f32 %v4930_v50, %v4932_v51  ;;  %v2292_v50 = vld [vmem:[#allocation8 + $0x448] sm:$0xff] }
 0x306   :  { %2464 = vmatmul.f32.gmra.mxu0 %v5208_v16  ;;  %2529 = vmatmul.f32.gmra.mxu1 %v5211_v55  ;;  %v2068_v16 = vmul.f32 %v4955_v14, %v6385_v27  ;;  %v1811_v4 = vadd.f32 %v1810_v53, %v1746_v59 }
 0x307   :  { %v5215_v29 = vsel %vm1993_vm4, %v1935_v58, %v2058_v17  ;;  %vm2008_vm13 = vcmp.gt.f32.partialorder %v1687_v56, 0.0  ;;  %2824 = vmatpush.msra.mxu2 %v2292_v50 }
 0x308   :  { %6383 = vst [vmem:[#allocation38_spill] sm:$0xff] %v5215_v29  ;;  %v1872_v10 = vpop.f32.mrf.mxu2  ;;  %v1937_v46 = vpop.f32.mrf.mxu3  ;;  %2653 = vmatmul.f32.gmra.mxu3 %v5215_v29 }
 0x309   :  { %v1873_v55 = vadd.f32 %v1872_v10, %v1808_v22  ;;  %v5236_v22 = vsel %vm2003_vm7, %v6385_v27, %v2068_v16  ;;  %v2236_v10 = vld [vmem:[#allocation8 + $0x288] sm:$0xff]  ;;  %v6390_v27 = vld [vmem:[#allocation29_spill] sm:$0xff] }
 0x30a   :  { %6387 = vst [vmem:[#allocation41_spill] sm:$0xff] %v5236_v22  ;;  %2757 = vmatpush.msra.mxu1 %v2236_v10  ;;  %v6389_v16 = vld [vmem:[#allocation56_spill] sm:$0xff]  ;;  %vm2007_vm11 = vcmp.gt.f32.partialorder %v6390_v27, 0.0 }
 0x30b   :  { %v1938_v25 = vadd.f32 %v1937_v46, %v1873_v55  ;;  %v1748_v58 = vpop.f32.mrf.mxu0  ;;  %v1813_v17 = vpop.f32.mrf.mxu1  ;;  %v2364_v55 = vld [vmem:[#allocation8 + $0x688] sm:$0xff]  ;;  %v2071_v43 = vmul.f32 %v4955_v14, %v6389_v16  ;;  %vm2006_vm10 = vcmp.gt.f32.partialorder %v6389_v16, 0.0 }
 0x30c   :  { %2887 = vmatpush.msra.mxu3 %v2364_v55  ;;  %v1749_v53 = vadd.f32 %v1748_v58, %v4981_v57  ;;  %v5253_v55 = vsel %vm2004_vm9, %v1684_v20, %v2069_v8  ;;  %v2168_v58 = vld [vmem:[#allocation8 + $0x68] sm:$0xff]  ;;  %v2073_v8 = vmul.f32 %v4955_v14, %v1687_v56 }
 0x30d   :  { %v2062_v38 = vmul.f32 %v4955_v14, %v1938_v25  ;;  %2594 = vmatmul.f32.gmra.mxu2 %v5228_v33  ;;  %vm1997_vm8 = vcmp.gt.f32.partialorder %v1938_v25, 0.0  ;;  %v5258_v3 = vsel %vm2006_vm10, %v6389_v16, %v2071_v43  ;;  %2693 = vmatpush.msra.mxu0 %v2168_v58 }
 0x30e   :  { %2467 = vmatmul.f32.gmra.mxu0 %v5233_v39  ;;  %2532 = vmatmul.f32.gmra.mxu1 %v5236_v22  ;;  %v2072_v39 = vmul.f32 %v4955_v14, %v6390_v27  ;;  %6391 = vst [vmem:[#allocation43_spill] sm:$0xff] %v5258_v3  ;;  %v1814_v51 = vadd.f32 %v1813_v17, %v1749_v53  ;;  %v2164_v17 = vld [vmem:[#allocation8 + $0x48] sm:$0xff] }
 0x30f   :  { %v5240_v28 = vsel %vm1997_vm8, %v1938_v25, %v2062_v38  ;;  %v2228_v53 = vld [vmem:[#allocation8 + $0x248] sm:$0xff]  ;;  %2694 = vmatpush.msra.mxu0 %v2164_v17 }
 0x310   :  { %6388 = vst [vmem:[#allocation42_spill] sm:$0xff] %v5240_v28  ;;  %v1875_v46 = vpop.f32.mrf.mxu2  ;;  %v1940_v1 = vpop.f32.mrf.mxu3  ;;  %2656 = vmatmul.f32.gmra.mxu3 %v5240_v28 }
 0x311   :  { %v1876_v22 = vadd.f32 %v1875_v46, %v1811_v4  ;;  %v5261_v4 = vsel %vm2007_vm11, %v6390_v27, %v2072_v39  ;;  %v2232_v46 = vld [vmem:[#allocation8 + $0x268] sm:$0xff]  ;;  %v6394_v39 = vld [vmem:[#allocation33_spill] sm:$0xff]  ;;  %v6395_v27 = vld [vmem:[#allocation31_spill] sm:$0xff]  ;;  %vm2023_vm11 = vcmp.gt.f32.partialorder %v4841_v21, 0.0 }
 0x312   :  { %6392 = vst [vmem:[#allocation46_spill] sm:$0xff] %v5261_v4  ;;  %2758 = vmatpush.msra.mxu1 %v2232_v46  ;;  %v2075_v43 = vmul.f32 %v4955_v14, %v6394_v39  ;;  %vm2010_vm14 = vcmp.gt.f32.partialorder %v6394_v39, 0.0  ;;  %vm2011_vm15 = vcmp.gt.f32.partialorder %v6395_v27, 0.0  ;;  %v2160_v46 = vld [vmem:[#allocation8 + $0x28] sm:$0xff] }
 0x313   :  { %v1941_v59 = vadd.f32 %v1940_v1, %v1876_v22  ;;  %v1751_v25 = vpop.f32.mrf.mxu0  ;;  %v1816_v38 = vpop.f32.mrf.mxu1  ;;  %v2360_v22 = vld [vmem:[#allocation8 + $0x668] sm:$0xff]  ;;  %2695 = vmatpush.msra.mxu0 %v2160_v46 }
 0x314   :  { %2888 = vmatpush.msra.mxu3 %v2360_v22  ;;  %2759 = vmatpush.msra.mxu1 %v2228_v53  ;;  %v6399_v53 = vld [vmem:[#allocation35_spill] sm:$0xff] }
 0x315   :  { %v2066_v10 = vmul.f32 %v4955_v14, %v1941_v59  ;;  %2597 = vmatmul.f32.gmra.mxu2 %v5253_v55  ;;  %vm2001_vm12 = vcmp.gt.f32.partialorder %v1941_v59, 0.0  ;;  %v2080_v46 = vmul.f32 %v4955_v14, %v6399_v53  ;;  %vm2015_vm3 = vcmp.gt.f32.partialorder %v6399_v53, 0.0 }
 0x316   :  { %2470 = vmatmul.f32.gmra.mxu0 %v5258_v3  ;;  %2535 = vmatmul.f32.gmra.mxu1 %v5261_v4  ;;  %v2076_v3 = vmul.f32 %v4955_v14, %v6395_v27 }
 0x317   :  { %v5265_v20 = vsel %vm2001_vm12, %v1941_v59, %v2066_v10  ;;  %v1752_v59 = vadd.f32 %v1751_v25, %v4981_v57  ;;  %v5285_v25 = vsel %vm2010_vm14, %v6394_v39, %v2075_v43 }
 0x318   :  { %6393 = vst [vmem:[#allocation17_spill] sm:$0xff] %v5265_v20  ;;  %v1878_v1 = vpop.f32.mrf.mxu2  ;;  %v1943_v16 = vpop.f32.mrf.mxu3  ;;  %2659 = vmatmul.f32.gmra.mxu3 %v5265_v20  ;;  %v2224_v20 = vld [vmem:[#allocation8 + $0x228] sm:$0xff] }
 0x319   :  { %v1879_v4 = vadd.f32 %v1878_v1, %v1814_v51  ;;  %v1690_v51 = vadd.f32 %v4939_v44, %v4941_v62  ;;  %v5278_v1 = vsel %vm2008_vm13, %v1687_v56, %v2073_v8  ;;  %2760 = vmatpush.msra.mxu1 %v2224_v20  ;;  %6396 = vst [vmem:[#allocation47_spill] sm:$0xff] %v5285_v25  ;;  %v2356_v44 = vld [vmem:[#allocation8 + $0x648] sm:$0xff] }
 0x31a   :  { %v2156_v62 = vld [vmem:[#allocation8 + $0x8] sm:$0xff]  ;;  %v1817_v8 = vadd.f32 %v1816_v38, %v1752_v59  ;;  %2889 = vmatpush.msra.mxu3 %v2356_v44 }
 0x31b   :  { %v1944_v10 = vadd.f32 %v1943_v16, %v1879_v4  ;;  %v1754_v58 = vpop.f32.mrf.mxu0  ;;  %v1819_v22 = vpop.f32.mrf.mxu1  ;;  %v5290_v4 = vsel %vm2011_vm15, %v6395_v27, %v2076_v3  ;;  %v2220_v56 = vld [vmem:[#allocation8 + $0x208] sm:$0xff]  ;;  %2696 = vmatpush.msra.mxu0 %v2156_v62  ;;  %v2077_v39 = vmul.f32 %v4955_v14, %v1690_v51  ;;  %v6398_v3 = vld [vmem:[#allocation34_spill] sm:$0xff]  ;;  %vm2012_vm1 = vcmp.gt.f32.partialorder %v1690_v51, 0.0 }
 0x31c   :  { %6397 = vst [vmem:[#allocation18_spill] sm:$0xff] %v5290_v4  ;;  %v2288_v20 = vld [vmem:[#allocation8 + $0x428] sm:$0xff]  ;;  %2761 = vmatpush.msra.mxu1 %v2220_v56  ;;  %v2079_v27 = vmul.f32 %v4955_v14, %v6398_v3  ;;  %vm2014_vm2 = vcmp.gt.f32.partialorder %v6398_v3, 0.0  ;;  %v1755_v38 = vadd.f32 %v1754_v58, %v4981_v57  ;;  %v1693_v62 = vadd.f32 %v4948_v61, %v4950_v24 }
 0x31d   :  { %v2070_v50 = vmul.f32 %v4955_v14, %v1944_v10  ;;  %2600 = vmatmul.f32.gmra.mxu2 %v5278_v1  ;;  %vm2005_vm0 = vcmp.gt.f32.partialorder %v1944_v10, 0.0  ;;  %v2284_v44 = vld [vmem:[#allocation8 + $0x408] sm:$0xff]  ;;  %v5307_v56 = vsel %vm2012_vm1, %v1690_v51, %v2077_v39 }
 0x31e   :  { %2473 = vmatmul.f32.gmra.mxu0 %v5285_v25  ;;  %2538 = vmatmul.f32.gmra.mxu1 %v5290_v4  ;;  %v2352_v58 = vld [vmem:[#allocation8 + $0x628] sm:$0xff]  ;;  %v1820_v61 = vadd.f32 %v1819_v22, %v1755_v38  ;;  %v2081_v51 = vmul.f32 %v4955_v14, %v1693_v62  ;;  %vm2016_vm5 = vcmp.gt.f32.partialorder %v1693_v62, 0.0 }
 0x31f   :  { %v5294_v16 = vsel %vm2005_vm0, %v1944_v10, %v2070_v50  ;;  %2825 = vmatpush.msra.mxu2 %v2288_v20  ;;  %v5312_v20 = vsel %vm2014_vm2, %v6398_v3, %v2079_v27  ;;  %2890 = vmatpush.msra.mxu3 %v2352_v58  ;;  %v6403_v27 = vld [vmem:[#allocation39_spill] sm:$0xff]  ;;  %v1696_v58 = vadd.f32 %v4959_v9, %v4965_v49 }
 0x320   :  { %v1881_v43 = vpop.f32.mrf.mxu2  ;;  %v1946_v17 = vpop.f32.mrf.mxu3  ;;  %2662 = vmatmul.f32.gmra.mxu3 %v5294_v16  ;;  %vm2019_vm7 = vcmp.gt.f32.partialorder %v6403_v27, 0.0 }
 0x321   :  { %v1882_v4 = vadd.f32 %v1881_v43, %v1817_v8  ;;  %2826 = vmatpush.msra.mxu2 %v2284_v44  ;;  %v5315_v43 = vsel %vm2015_vm3, %v6399_v53, %v2080_v46  ;;  %v2084_v53 = vmul.f32 %v4955_v14, %v6403_v27  ;;  %v2348_v44 = vld [vmem:[#allocation8 + $0x608] sm:$0xff]  ;;  %v2085_v49 = vmul.f32 %v4955_v14, %v1696_v58 }
 0x322   :  { %6400 = vst [vmem:[#allocation48_spill] sm:$0xff] %v5315_v43  ;;  %2891 = vmatpush.msra.mxu3 %v2348_v44  ;;  %vm2020_vm9 = vcmp.gt.f32.partialorder %v1696_v58, 0.0  ;;  %v2409_v44 = vld [vmem:[#allocation8 + $0x7f0] sm:$0xff] }
 0x323   :  { %v1947_v59 = vadd.f32 %v1946_v17, %v1882_v4  ;;  %v1757_v10 = vpop.f32.mrf.mxu0  ;;  %v1822_v50 = vpop.f32.mrf.mxu1  ;;  %v6402_v17 = vld [vmem:[#allocation57_spill] sm:$0xff] }
 0x324   :  { %v2083_v3 = vmul.f32 %v4955_v14, %v6402_v17  ;;  %vm2018_vm6 = vcmp.gt.f32.partialorder %v6402_v17, 0.0  ;;  %v1758_v22 = vadd.f32 %v1757_v10, %v4981_v57  ;;  %v2345_v10 = vld [vmem:[#allocation8 + $0x5f0] sm:$0xff]  ;;  %3136 = vmatpush.msrb.mxu3 %v2409_v44 }
 0x325   :  { %v2074_v8 = vmul.f32 %v4955_v14, %v1947_v59  ;;  %2603 = vmatmul.f32.gmra.mxu2 %v5307_v56  ;;  %vm2009_vm4 = vcmp.gt.f32.partialorder %v1947_v59, 0.0 }
 0x326   :  { %2476 = vmatmul.f32.gmra.mxu0 %v5312_v20  ;;  %2541 = vmatmul.f32.gmra.mxu1 %v5315_v43 }
 0x327   :  { %v5319_v24 = vsel %vm2009_vm4, %v1947_v59, %v2074_v8  ;;  %3071 = vmatpush.msrb.mxu2 %v2345_v10 }
 0x328   :  { %6401 = vst [vmem:[#allocation58_spill] sm:$0xff] %v5319_v24  ;;  %v1884_v4 = vpop.f32.mrf.mxu2  ;;  %v1949_v39 = vpop.f32.mrf.mxu3  ;;  %2665 = vmatmul.f32.gmra.mxu3 %v5319_v24  ;;  %v5332_v24 = vsel %vm2016_vm5, %v1693_v62, %v2081_v51 }
 0x329   :  { %v1885_v46 = vadd.f32 %v1884_v4, %v1820_v61  ;;  %v5337_v61 = vsel %vm2018_vm6, %v6402_v17, %v2083_v3  ;;  %v5340_v4 = vsel %vm2019_vm7, %v6403_v27, %v2084_v53  ;;  %v6407_v17 = vld [vmem:[#allocation44_spill] sm:$0xff]  ;;  %v2088_v27 = vmul.f32 %v4955_v14, %v4841_v21 }
 0x32a   :  { %6404 = vst [vmem:[#allocation49_spill] sm:$0xff] %v5337_v61  ;;  %v2087_v3 = vmul.f32 %v4955_v14, %v6407_v17  ;;  %vm2022_vm10 = vcmp.gt.f32.partialorder %v6407_v17, 0.0 }
 0x32b   :  { %v1950_v38 = vadd.f32 %v1949_v39, %v1885_v46  ;;  %v1760_v59 = vpop.f32.mrf.mxu0  ;;  %v1825_v8 = vpop.f32.mrf.mxu1  ;;  %6405 = vst [vmem:[#allocation59_spill] sm:$0xff] %v5340_v4  ;;  %v1823_v39 = vadd.f32 %v1822_v50, %v1758_v22  ;;  %v2217_v46 = vld [vmem:[#allocation8 + $0x1f0] sm:$0xff] }
 0x32c   :  { %v2281_v50 = vld [vmem:[#allocation8 + $0x3f0] sm:$0xff]  ;;  %2941 = vmatpush.msrb.mxu0 %v2217_v46  ;;  %v5365_v46 = vsel %vm2023_vm11, %v4841_v21, %v2088_v27 }
 0x32d   :  { %v2078_v43 = vmul.f32 %v4955_v14, %v1950_v38  ;;  %2606 = vmatmul.f32.gmra.mxu2 %v5332_v24  ;;  %vm2013_vm8 = vcmp.gt.f32.partialorder %v1950_v38, 0.0  ;;  %3006 = vmatpush.msrb.mxu1 %v2281_v50  ;;  %v2213_v21 = vld [vmem:[#allocation8 + $0x1d0] sm:$0xff] }
 0x32e   :  { %2479 = vmatmul.f32.gmra.mxu0 %v5337_v61  ;;  %2544 = vmatmul.f32.gmra.mxu1 %v5340_v4  ;;  %v5362_v4 = vsel %vm2022_vm10, %v6407_v17, %v2087_v3  ;;  %v2405_v3 = vld [vmem:[#allocation8 + $0x7d0] sm:$0xff] }
 0x32f   :  { %v5344_v9 = vsel %vm2013_vm8, %v1950_v38, %v2078_v43  ;;  %v1761_v43 = vadd.f32 %v1760_v59, %v4981_v57  ;;  %6409 = vst [vmem:[#allocation51_spill] sm:$0xff] %v5362_v4  ;;  %v2341_v59 = vld [vmem:[#allocation8 + $0x5d0] sm:$0xff]  ;;  %2942 = vmatpush.msrb.mxu0 %v2213_v21  ;;  %3137 = vmatpush.msrb.mxu3 %v2405_v3 }
 0x330   :  { %6406 = vst [vmem:[#allocation50_spill] sm:$0xff] %v5344_v9  ;;  %v1887_v62 = vpop.f32.mrf.mxu2  ;;  %v1952_v51 = vpop.f32.mrf.mxu3  ;;  %2668 = vmatmul.f32.gmra.mxu3 %v5344_v9  ;;  %v1699_v9 = vadd.f32 %v4985_v63, %v4992_v35  ;;  %3072 = vmatpush.msrb.mxu2 %v2341_v59  ;;  %v2277_v27 = vld [vmem:[#allocation8 + $0x3d0] sm:$0xff] }
 0x331   :  { %v1888_v53 = vadd.f32 %v1887_v62, %v1823_v39  ;;  %v5357_v39 = vsel %vm2020_vm9, %v1696_v58, %v2085_v49  ;;  %3007 = vmatpush.msrb.mxu1 %v2277_v27 }
 0x332   :  { %6408 = vst [vmem:[#allocation60_spill] sm:$0xff] %v5357_v39  ;;  %v2089_v35 = vmul.f32 %v4955_v14, %v1699_v9  ;;  %vm2024_vm13 = vcmp.gt.f32.partialorder %v1699_v9, 0.0 }
 0x333   :  { %v1953_v22 = vadd.f32 %v1952_v51, %v1888_v53  ;;  %v1763_v38 = vpop.f32.mrf.mxu0  ;;  %v1828_v10 = vpop.f32.mrf.mxu1  ;;  %v1826_v51 = vadd.f32 %v1825_v8, %v1761_v43  ;;  %v5377_v43 = vld [vmem:[%s6053_s7] sm:$0xf] }
 0x334   :  { %v1764_v53 = vadd.f32 %v1763_v38, %v4981_v57  ;;  %v2337_v57 = vld [vmem:[#allocation8 + $0x5b0] sm:$0xff]  ;;  %v5386_v59 = vperm.slane %v5377_v43, 0 }
 0x335   :  { %v2082_v62 = vmul.f32 %v4955_v14, %v1953_v22  ;;  %2609 = vmatmul.f32.gmra.mxu2 %v5357_v39  ;;  %vm2017_vm12 = vcmp.gt.f32.partialorder %v1953_v22, 0.0 }
 0x336   :  { %2482 = vmatmul.f32.gmra.mxu0 %v5362_v4  ;;  %2547 = vmatmul.f32.gmra.mxu1 %v5365_v46  ;;  %v1829_v38 = vadd.f32 %v1828_v10, %v1764_v53 }
 0x337   :  { %v5369_v63 = vsel %vm2017_vm12, %v1953_v22, %v2082_v62  ;;  %v5379_v22 = vsel %vm2024_vm13, %v1699_v9, %v2089_v35  ;;  %3073 = vmatpush.msrb.mxu2 %v2337_v57  ;;  %v2209_v35 = vld [vmem:[#allocation8 + $0x1b0] sm:$0xff] }
 0x338   :  { %v1890_v58 = vpop.f32.mrf.mxu2  ;;  %v1955_v49 = vpop.f32.mrf.mxu3  ;;  %2671 = vmatmul.f32.gmra.mxu3 %v5369_v63  ;;  %2943 = vmatpush.msrb.mxu0 %v2209_v35  ;;  %v2397_v35 = vld [vmem:[#allocation8 + $0x790] sm:$0xff] }
 0x339   :  { %v1891_v17 = vadd.f32 %v1890_v58, %v1826_v51 }
 0x33b   :  { %v1956_v44 = vadd.f32 %v1955_v49, %v1891_v17  ;;  %v2438_v8 = vpop.f32.mrf.mxu0  ;;  %v2503_v50 = vpop.f32.mrf.mxu1  ;;  %v2401_v49 = vld [vmem:[#allocation8 + $0x7b0] sm:$0xff] }
 0x33c   :  { %v2273_v17 = vld [vmem:[#allocation8 + $0x3b0] sm:$0xff]  ;;  %3138 = vmatpush.msrb.mxu3 %v2401_v49  ;;  %v2439_v3 = vadd.f32 %v2438_v8, %v5386_v59 }
 0x33d   :  { %v2086_v62 = vmul.f32 %v4955_v14, %v1956_v44  ;;  %2612 = vmatmul.f32.gmra.mxu2 %v5379_v22  ;;  %vm2021_vm14 = vcmp.gt.f32.partialorder %v1956_v44, 0.0  ;;  %3008 = vmatpush.msrb.mxu1 %v2273_v17  ;;  %v2269_v49 = vld [vmem:[#allocation8 + $0x390] sm:$0xff] }
 0x33e   :  { %2697 = vmatmul.f32.vlgmr.msra.gmra.mxu0 %v4973_v40  ;;  %2762 = vmatmul.f32.vlgmr.msra.gmra.mxu1 %v4976_v37  ;;  %v2504_v57 = vadd.f32 %v2503_v50, %v2439_v3  ;;  %v2329_v50 = vld [vmem:[#allocation8 + $0x570] sm:$0xff] }
 0x33f   :  { %v5388_v51 = vsel %vm2021_vm14, %v1956_v44, %v2086_v62  ;;  %v2333_v62 = vld [vmem:[#allocation8 + $0x590] sm:$0xff]  ;;  %3139 = vmatpush.msrb.mxu3 %v2397_v35  ;;  %3009 = vmatpush.msrb.mxu1 %v2269_v49 }
 0x340   :  { %v1893_v58 = vpop.f32.mrf.mxu2  ;;  %2674 = vmatmul.f32.gmra.mxu3 %v5388_v51  ;;  %v1958_v21 = vpop.f32.mrf.mxu3  ;;  %3074 = vmatpush.msrb.mxu2 %v2333_v62  ;;  %v2201_v62 = vld [vmem:[#allocation8 + $0x170] sm:$0xff] }
 0x341   :  { %v1894_v9 = vadd.f32 %v1893_v58, %v1829_v38 }
 0x342   :  { %3075 = vmatpush.msrb.mxu2 %v2329_v50 }
 0x343   :  { %v1959_v27 = vadd.f32 %v1958_v21, %v1894_v9  ;;  %v2441_v10 = vpop.f32.mrf.mxu0  ;;  %v2506_v53 = vpop.f32.mrf.mxu1  ;;  %v2205_v9 = vld [vmem:[#allocation8 + $0x190] sm:$0xff] }
 0x344   :  { %2944 = vmatpush.msrb.mxu0 %v2205_v9 }
 0x345   :  { %v2090_v44 = vmul.f32 %v4955_v14, %v1959_v27  ;;  %2827 = vmatmul.f32.vlgmr.msra.gmra.mxu2 %v4998_v6  ;;  %vm2025_vm15 = vcmp.gt.f32.partialorder %v1959_v27, 0.0  ;;  %v2442_v14 = vadd.f32 %v2441_v10, %v5386_v59 }
 0x346   :  { %2700 = vmatmul.f32.gmra.mxu0 %v5002_v32  ;;  %2765 = vmatmul.f32.gmra.mxu1 %v5005_v18 }
 0x347   :  { %v5396_v38 = vsel %vm2025_vm15, %v1959_v27, %v2090_v44  ;;  %v2507_v3 = vadd.f32 %v2506_v53, %v2442_v14  ;;  %2945 = vmatpush.msrb.mxu0 %v2201_v62  ;;  %v2325_v53 = vld [vmem:[#allocation8 + $0x550] sm:$0xff] }
 0x348   :  { %v2568_v58 = vpop.f32.mrf.mxu2  ;;  %2677 = vmatmul.f32.gmra.mxu3 %v5396_v38  ;;  %3076 = vmatpush.msrb.mxu2 %v2325_v53  ;;  %v2261_v62 = vld [vmem:[#allocation8 + $0x350] sm:$0xff] }
 0x349   :  { %v2569_v8 = vadd.f32 %v2568_v58, %v2504_v57  ;;  %v2393_v57 = vld [vmem:[#allocation8 + $0x770] sm:$0xff] }
 0x34a   :  { %v2265_v58 = vld [vmem:[#allocation8 + $0x370] sm:$0xff]  ;;  %3140 = vmatpush.msrb.mxu3 %v2393_v57 }
 0x34b   :  { %v2444_v17 = vpop.f32.mrf.mxu0  ;;  %v2509_v21 = vpop.f32.mrf.mxu1  ;;  %3010 = vmatpush.msrb.mxu1 %v2265_v58 }
 0x34c   :  { %v2445_v10 = vadd.f32 %v2444_v17, %v5386_v59  ;;  %v2197_v17 = vld [vmem:[#allocation8 + $0x150] sm:$0xff] }
 0x34d   :  { %2830 = vmatmul.f32.gmra.mxu2 %v5020_v31  ;;  %2946 = vmatpush.msrb.mxu0 %v2197_v17  ;;  %v2257_v17 = vld [vmem:[#allocation8 + $0x330] sm:$0xff] }
 0x34e   :  { %2703 = vmatmul.f32.gmra.mxu0 %v5025_v42  ;;  %2768 = vmatmul.f32.gmra.mxu1 %v5028_v5  ;;  %v2510_v14 = vadd.f32 %v2509_v21, %v2445_v10  ;;  %v2321_v21 = vld [vmem:[#allocation8 + $0x530] sm:$0xff] }
 0x34f   :  { %3011 = vmatpush.msrb.mxu1 %v2261_v62  ;;  %3077 = vmatpush.msrb.mxu2 %v2321_v21 }
 0x350   :  { %v2571_v27 = vpop.f32.mrf.mxu2  ;;  %2892 = vmatmul.f32.vlgmr.msra.gmra.mxu3 %v5032_v13 }
 0x351   :  { %v2572_v44 = vadd.f32 %v2571_v27, %v2507_v3  ;;  %v2389_v27 = vld [vmem:[#allocation8 + $0x750] sm:$0xff]  ;;  %3012 = vmatpush.msrb.mxu1 %v2257_v17 }
 0x352   :  { %3141 = vmatpush.msrb.mxu3 %v2389_v27 }
 0x353   :  { %v2633_v9 = vpop.f32.mrf.mxu3  ;;  %v2447_v35 = vpop.f32.mrf.mxu0 }
 0x354   :  { %v5405_v49 = vadd.f32 %v2633_v9, %v2569_v8  ;;  %v2512_v5 = vpop.f32.mrf.mxu1  ;;  %v2448_v8 = vadd.f32 %v2447_v35, %v5386_v59  ;;  %v2193_v35 = vld [vmem:[#allocation8 + $0x130] sm:$0xff] }
 0x355   :  { %2833 = vmatmul.f32.gmra.mxu2 %v5046_v41  ;;  %2947 = vmatpush.msrb.mxu0 %v2193_v35  ;;  %v2253_v35 = vld [vmem:[#allocation8 + $0x310] sm:$0xff] }
 0x356   :  { %6410 = vst [vmem:[#allocation61_spill] sm:$0xff] %v5405_v49  ;;  %2706 = vmatmul.f32.gmra.mxu0 %v5051_v15  ;;  %2771 = vmatmul.f32.gmra.mxu1 %v5054_v48  ;;  %v2513_v10 = vadd.f32 %v2512_v5, %v2448_v8  ;;  %v2317_v5 = vld [vmem:[#allocation8 + $0x510] sm:$0xff] }
 0x357   :  { %3078 = vmatpush.msrb.mxu2 %v2317_v5  ;;  %3013 = vmatpush.msrb.mxu1 %v2253_v35 }
 0x358   :  { %v2574_v50 = vpop.f32.mrf.mxu2  ;;  %2895 = vmatmul.f32.gmra.mxu3 %v5058_v0 }
 0x359   :  { %v2575_v3 = vadd.f32 %v2574_v50, %v2510_v14  ;;  %v2385_v50 = vld [vmem:[#allocation8 + $0x730] sm:$0xff] }
 0x35a   :  { %3142 = vmatpush.msrb.mxu3 %v2385_v50 }
 0x35b   :  { %v2636_v57 = vpop.f32.mrf.mxu3  ;;  %v2450_v58 = vpop.f32.mrf.mxu0 }
 0x35c   :  { %v5412_v9 = vadd.f32 %v2636_v57, %v2572_v44  ;;  %v2515_v49 = vpop.f32.mrf.mxu1  ;;  %v2451_v44 = vadd.f32 %v2450_v58, %v5386_v59  ;;  %v2189_v58 = vld [vmem:[#allocation8 + $0x110] sm:$0xff] }
 0x35d   :  { %2836 = vmatmul.f32.gmra.mxu2 %v5072_v23  ;;  %2948 = vmatpush.msrb.mxu0 %v2189_v58  ;;  %v2377_v58 = vld [vmem:[#allocation8 + $0x6f0] sm:$0xff] }
 0x35e   :  { %6411 = vst [vmem:[#allocation52_spill] sm:$0xff] %v5412_v9  ;;  %2709 = vmatmul.f32.gmra.mxu0 %v5077_v36  ;;  %2774 = vmatmul.f32.gmra.mxu1 %v5080_v2  ;;  %v2516_v8 = vadd.f32 %v2515_v49, %v2451_v44  ;;  %v6414_v49 = vld [vmem:[#allocation20_spill] sm:$0xff]  ;;  %v2313_v44 = vld [vmem:[#allocation8 + $0x4f0] sm:$0xff] }
 0x35f   :  { %3079 = vmatpush.msrb.mxu2 %v2313_v44  ;;  %v2309_v44 = vld [vmem:[#allocation8 + $0x4d0] sm:$0xff] }
 0x360   :  { %v2577_v53 = vpop.f32.mrf.mxu2  ;;  %2898 = vmatmul.f32.gmra.mxu3 %v5084_v52 }
 0x361   :  { %v2578_v14 = vadd.f32 %v2577_v53, %v2513_v10  ;;  %v2381_v53 = vld [vmem:[#allocation8 + $0x710] sm:$0xff]  ;;  %3080 = vmatpush.msrb.mxu2 %v2309_v44 }
 0x362   :  { %3143 = vmatpush.msrb.mxu3 %v2381_v53  ;;  %v2249_v53 = vld [vmem:[#allocation8 + $0x2f0] sm:$0xff] }
 0x363   :  { %v2639_v27 = vpop.f32.mrf.mxu3  ;;  %v2453_v62 = vpop.f32.mrf.mxu0  ;;  %3014 = vmatpush.msrb.mxu1 %v2249_v53  ;;  %v2305_v44 = vld [vmem:[#allocation8 + $0x4b0] sm:$0xff] }
 0x364   :  { %v5419_v57 = vadd.f32 %v2639_v27, %v2575_v3  ;;  %v2518_v9 = vpop.f32.mrf.mxu1  ;;  %v2454_v3 = vadd.f32 %v2453_v62, %v5386_v59  ;;  %v2185_v62 = vld [vmem:[#allocation8 + $0xf0] sm:$0xff]  ;;  %3144 = vmatpush.msrb.mxu3 %v2377_v58  ;;  %3081 = vmatpush.msrb.mxu2 %v2305_v44 }
 0x365   :  { %2839 = vmatmul.f32.gmra.mxu2 %v5098_v54  ;;  %2949 = vmatpush.msrb.mxu0 %v2185_v62  ;;  %v2373_v58 = vld [vmem:[#allocation8 + $0x6d0] sm:$0xff] }
 0x366   :  { %6412 = vst [vmem:[#allocation62_spill] sm:$0xff] %v5419_v57  ;;  %2712 = vmatmul.f32.gmra.mxu0 %v5103_v30  ;;  %2777 = vmatmul.f32.gmra.mxu1 %v5106_v45  ;;  %v2519_v5 = vadd.f32 %v2518_v9, %v2454_v3  ;;  %v6417_v9 = vld [vmem:[#allocation24_spill] sm:$0xff]  ;;  %v6418_v3 = vld [vmem:[#allocation26_spill] sm:$0xff]  ;;  %v2301_v44 = vld [vmem:[#allocation8 + $0x490] sm:$0xff] }
 0x367   :  { %3145 = vmatpush.msrb.mxu3 %v2373_v58  ;;  %v2369_v58 = vld [vmem:[#allocation8 + $0x6b0] sm:$0xff]  ;;  %3082 = vmatpush.msrb.mxu2 %v2301_v44 }
 0x368   :  { %v2580_v21 = vpop.f32.mrf.mxu2  ;;  %2901 = vmatmul.f32.gmra.mxu3 %v5110_v34  ;;  %v2297_v44 = vld [vmem:[#allocation8 + $0x470] sm:$0xff] }
 0x369   :  { %v2581_v10 = vadd.f32 %v2580_v21, %v2516_v8  ;;  %3146 = vmatpush.msrb.mxu3 %v2369_v58  ;;  %v2365_v58 = vld [vmem:[#allocation8 + $0x690] sm:$0xff]  ;;  %3083 = vmatpush.msrb.mxu2 %v2297_v44 }
 0x36a   :  { %v2293_v44 = vld [vmem:[#allocation8 + $0x450] sm:$0xff] }
 0x36b   :  { %v2642_v50 = vpop.f32.mrf.mxu3  ;;  %v2456_v17 = vpop.f32.mrf.mxu0  ;;  %3147 = vmatpush.msrb.mxu3 %v2365_v58  ;;  %v2361_v58 = vld [vmem:[#allocation8 + $0x670] sm:$0xff]  ;;  %3084 = vmatpush.msrb.mxu2 %v2293_v44 }
 0x36c   :  { %v5426_v27 = vadd.f32 %v2642_v50, %v2578_v14  ;;  %v2521_v57 = vpop.f32.mrf.mxu1  ;;  %v2457_v14 = vadd.f32 %v2456_v17, %v5386_v59  ;;  %v2181_v17 = vld [vmem:[#allocation8 + $0xd0] sm:$0xff] }
 0x36d   :  { %2842 = vmatmul.f32.gmra.mxu2 %v5124_v60  ;;  %2950 = vmatpush.msrb.mxu0 %v2181_v17  ;;  %v2221_v44 = vld [vmem:[#allocation8 + $0x210] sm:$0xff] }
 0x36e   :  { %6413 = vst [vmem:[#allocation53_spill] sm:$0xff] %v5426_v27  ;;  %2715 = vmatmul.f32.gmra.mxu0 %v5129_v26  ;;  %2780 = vmatmul.f32.gmra.mxu1 %v6414_v49  ;;  %v6416_v26 = vld [vmem:[#allocation23_spill] sm:$0xff] }
 0x36f   :  { %3148 = vmatpush.msrb.mxu3 %v2361_v58 }
 0x370   :  { %v2583_v8 = vpop.f32.mrf.mxu2  ;;  %2904 = vmatmul.f32.gmra.mxu3 %v5136_v47  ;;  %v2245_v47 = vld [vmem:[#allocation8 + $0x2d0] sm:$0xff] }
 0x371   :  { %v2584_v21 = vadd.f32 %v2583_v8, %v2519_v5  ;;  %v2522_v5 = vadd.f32 %v2521_v57, %v2457_v14  ;;  %3015 = vmatpush.msrb.mxu1 %v2245_v47  ;;  %v6420_v57 = vld [vmem:[#allocation28_spill] sm:$0xff]  ;;  %v6421_v14 = vld [vmem:[#allocation30_spill] sm:$0xff] }
 0x373   :  { %v2645_v35 = vpop.f32.mrf.mxu3  ;;  %v2459_v50 = vpop.f32.mrf.mxu0 }
 0x374   :  { %v5433_v27 = vadd.f32 %v2645_v35, %v2581_v10  ;;  %v2524_v49 = vpop.f32.mrf.mxu1  ;;  %v2460_v10 = vadd.f32 %v2459_v50, %v5386_v59  ;;  %v2177_v50 = vld [vmem:[#allocation8 + $0xb0] sm:$0xff] }
 0x375   :  { %2845 = vmatmul.f32.gmra.mxu2 %v6416_v26  ;;  %2951 = vmatpush.msrb.mxu0 %v2177_v50 }
 0x376   :  { %6415 = vst [vmem:[#allocation63_spill] sm:$0xff] %v5433_v27  ;;  %2718 = vmatmul.f32.gmra.mxu0 %v6417_v9  ;;  %2783 = vmatmul.f32.gmra.mxu1 %v6418_v3 }
 0x378   :  { %v2586_v8 = vpop.f32.mrf.mxu2  ;;  %2907 = vmatmul.f32.gmra.mxu3 %v5162_v12  ;;  %v2241_v12 = vld [vmem:[#allocation8 + $0x2b0] sm:$0xff] }
 0x379   :  { %v2587_v62 = vadd.f32 %v2586_v8, %v2522_v5  ;;  %v2525_v5 = vadd.f32 %v2524_v49, %v2460_v10  ;;  %3016 = vmatpush.msrb.mxu1 %v2241_v12  ;;  %v6423_v49 = vld [vmem:[#allocation36_spill] sm:$0xff]  ;;  %v6424_v10 = vld [vmem:[#allocation37_spill] sm:$0xff] }
 0x37b   :  { %v2648_v53 = vpop.f32.mrf.mxu3  ;;  %v2462_v35 = vpop.f32.mrf.mxu0 }
 0x37c   :  { %v5440_v27 = vadd.f32 %v2648_v53, %v2584_v21  ;;  %v2527_v3 = vpop.f32.mrf.mxu1  ;;  %v2463_v47 = vadd.f32 %v2462_v35, %v5386_v59  ;;  %v2173_v35 = vld [vmem:[#allocation8 + $0x90] sm:$0xff] }
 0x37d   :  { %2848 = vmatmul.f32.gmra.mxu2 %v5178_v7  ;;  %2952 = vmatpush.msrb.mxu0 %v2173_v35 }
 0x37e   :  { %6419 = vst [vmem:[#allocation54_spill] sm:$0xff] %v5440_v27  ;;  %2721 = vmatmul.f32.gmra.mxu0 %v6420_v57  ;;  %2786 = vmatmul.f32.gmra.mxu1 %v6421_v14 }
 0x380   :  { %v2589_v8 = vpop.f32.mrf.mxu2  ;;  %2910 = vmatmul.f32.gmra.mxu3 %v5190_v11  ;;  %v2237_v11 = vld [vmem:[#allocation8 + $0x290] sm:$0xff] }
 0x381   :  { %v2590_v17 = vadd.f32 %v2589_v8, %v2525_v5  ;;  %v2528_v5 = vadd.f32 %v2527_v3, %v2463_v47  ;;  %3017 = vmatpush.msrb.mxu1 %v2237_v11  ;;  %v6426_v3 = vld [vmem:[#allocation40_spill] sm:$0xff]  ;;  %v6427_v47 = vld [vmem:[#allocation41_spill] sm:$0xff] }
 0x383   :  { %v2651_v21 = vpop.f32.mrf.mxu3  ;;  %v2465_v53 = vpop.f32.mrf.mxu0 }
 0x384   :  { %v5447_v27 = vadd.f32 %v2651_v21, %v2587_v62  ;;  %v2530_v14 = vpop.f32.mrf.mxu1  ;;  %v2466_v12 = vadd.f32 %v2465_v53, %v5386_v59  ;;  %v2169_v53 = vld [vmem:[#allocation8 + $0x70] sm:$0xff] }
 0x385   :  { %2851 = vmatmul.f32.gmra.mxu2 %v5203_v19  ;;  %2953 = vmatpush.msrb.mxu0 %v2169_v53  ;;  %v6431_v53 = vld [vmem:[#allocation17_spill] sm:$0xff] }
 0x386   :  { %6422 = vst [vmem:[#allocation64_spill] sm:$0xff] %v5447_v27  ;;  %2724 = vmatmul.f32.gmra.mxu0 %v6423_v49  ;;  %2789 = vmatmul.f32.gmra.mxu1 %v6424_v10 }
 0x388   :  { %v2592_v8 = vpop.f32.mrf.mxu2  ;;  %2913 = vmatmul.f32.gmra.mxu3 %v5215_v29  ;;  %v2233_v29 = vld [vmem:[#allocation8 + $0x270] sm:$0xff] }
 0x389   :  { %v2593_v50 = vadd.f32 %v2592_v8, %v2528_v5  ;;  %v2531_v5 = vadd.f32 %v2530_v14, %v2466_v12  ;;  %3018 = vmatpush.msrb.mxu1 %v2233_v29  ;;  %v6429_v14 = vld [vmem:[#allocation43_spill] sm:$0xff]  ;;  %v6430_v12 = vld [vmem:[#allocation46_spill] sm:$0xff] }
 0x38b   :  { %v2654_v62 = vpop.f32.mrf.mxu3  ;;  %v2468_v21 = vpop.f32.mrf.mxu0 }
 0x38c   :  { %v5454_v27 = vadd.f32 %v2654_v62, %v2590_v17  ;;  %v2533_v10 = vpop.f32.mrf.mxu1  ;;  %v2469_v11 = vadd.f32 %v2468_v21, %v5386_v59  ;;  %v2165_v21 = vld [vmem:[#allocation8 + $0x50] sm:$0xff] }
 0x38d   :  { %2854 = vmatmul.f32.gmra.mxu2 %v5228_v33  ;;  %2954 = vmatpush.msrb.mxu0 %v2165_v21 }
 0x38e   :  { %6425 = vst [vmem:[#allocation55_spill] sm:$0xff] %v5454_v27  ;;  %2727 = vmatmul.f32.gmra.mxu0 %v6426_v3  ;;  %2792 = vmatmul.f32.gmra.mxu1 %v6427_v47  ;;  %v2229_v3 = vld [vmem:[#allocation8 + $0x250] sm:$0xff] }
 0x38f   :  { %3019 = vmatpush.msrb.mxu1 %v2229_v3 }
 0x390   :  { %v2595_v8 = vpop.f32.mrf.mxu2  ;;  %2916 = vmatmul.f32.gmra.mxu3 %v5240_v28  ;;  %v2357_v28 = vld [vmem:[#allocation8 + $0x650] sm:$0xff] }
 0x391   :  { %v2596_v35 = vadd.f32 %v2595_v8, %v2531_v5  ;;  %v2534_v5 = vadd.f32 %v2533_v10, %v2469_v11  ;;  %3149 = vmatpush.msrb.mxu3 %v2357_v28  ;;  %v2157_v11 = vld [vmem:[#allocation8 + $0x10] sm:$0xff] }
 0x392   :  { %v2289_v28 = vld [vmem:[#allocation8 + $0x430] sm:$0xff] }
 0x393   :  { %v2657_v17 = vpop.f32.mrf.mxu3  ;;  %v2471_v62 = vpop.f32.mrf.mxu0  ;;  %3085 = vmatpush.msrb.mxu2 %v2289_v28 }
 0x394   :  { %v5461_v27 = vadd.f32 %v2657_v17, %v2593_v50  ;;  %v2536_v47 = vpop.f32.mrf.mxu1  ;;  %v2472_v29 = vadd.f32 %v2471_v62, %v5386_v59 }
 0x395   :  { %2857 = vmatmul.f32.gmra.mxu2 %v5253_v55 }
 0x396   :  { %6428 = vst [vmem:[#allocation22_spill] sm:$0xff] %v5461_v27  ;;  %2730 = vmatmul.f32.gmra.mxu0 %v6429_v14  ;;  %2795 = vmatmul.f32.gmra.mxu1 %v6430_v12  ;;  %v2161_v27 = vld [vmem:[#allocation8 + $0x30] sm:$0xff]  ;;  %v2537_v62 = vadd.f32 %v2536_v47, %v2472_v29  ;;  %v6435_v47 = vld [vmem:[#allocation48_spill] sm:$0xff] }
 0x397   :  { %v2225_v14 = vld [vmem:[#allocation8 + $0x230] sm:$0xff]  ;;  %2955 = vmatpush.msrb.mxu0 %v2161_v27 }
 0x398   :  { %v2598_v8 = vpop.f32.mrf.mxu2  ;;  %2919 = vmatmul.f32.gmra.mxu3 %v6431_v53  ;;  %3020 = vmatpush.msrb.mxu1 %v2225_v14 }
 0x399   :  { %v2599_v58 = vadd.f32 %v2598_v8, %v2534_v5  ;;  %v6433_v5 = vld [vmem:[#allocation18_spill] sm:$0xff]  ;;  %2956 = vmatpush.msrb.mxu0 %v2157_v11  ;;  %v2353_v8 = vld [vmem:[#allocation8 + $0x630] sm:$0xff] }
 0x39a   :  { %3021 = vmatpush.msrb.mxu1 %v2221_v44  ;;  %3150 = vmatpush.msrb.mxu3 %v2353_v8  ;;  %v6436_v44 = vld [vmem:[#allocation58_spill] sm:$0xff] }
 0x39b   :  { %v2660_v50 = vpop.f32.mrf.mxu3  ;;  %v2474_v17 = vpop.f32.mrf.mxu0 }
 0x39c   :  { %v5468_v12 = vadd.f32 %v2660_v50, %v2596_v35  ;;  %v2539_v10 = vpop.f32.mrf.mxu1  ;;  %v2475_v27 = vadd.f32 %v2474_v17, %v5386_v59  ;;  %v2285_v50 = vld [vmem:[#allocation8 + $0x410] sm:$0xff] }
 0x39d   :  { %2860 = vmatmul.f32.gmra.mxu2 %v5278_v1 }
 0x39e   :  { %6432 = vst [vmem:[#allocation25_spill] sm:$0xff] %v5468_v12  ;;  %2733 = vmatmul.f32.gmra.mxu0 %v5285_v25  ;;  %2798 = vmatmul.f32.gmra.mxu1 %v6433_v5  ;;  %v2540_v29 = vadd.f32 %v2539_v10, %v2475_v27  ;;  %v2346_v10 = vld [vmem:[#allocation8 + $0x5f8] sm:$0xff] }
 0x39f   :  { %3086 = vmatpush.msrb.mxu2 %v2285_v50  ;;  %v6438_v50 = vld [vmem:[#allocation59_spill] sm:$0xff] }
 0x3a0   :  { %v2601_v3 = vpop.f32.mrf.mxu2  ;;  %2922 = vmatmul.f32.gmra.mxu3 %v5294_v16 }
 0x3a1   :  { %v2602_v35 = vadd.f32 %v2601_v3, %v2537_v62  ;;  %v2349_v62 = vld [vmem:[#allocation8 + $0x610] sm:$0xff]  ;;  %3331 = vmatpush.msra.mxu2 %v2346_v10 }
 0x3a2   :  { %3151 = vmatpush.msrb.mxu3 %v2349_v62  ;;  %v2218_v62 = vld [vmem:[#allocation8 + $0x1f8] sm:$0xff] }
 0x3a3   :  { %v2663_v14 = vpop.f32.mrf.mxu3  ;;  %v2477_v21 = vpop.f32.mrf.mxu0  ;;  %3201 = vmatpush.msra.mxu0 %v2218_v62  ;;  %v2278_v62 = vld [vmem:[#allocation8 + $0x3d8] sm:$0xff] }
 0x3a4   :  { %v5475_v12 = vadd.f32 %v2663_v14, %v2599_v58  ;;  %v2542_v25 = vpop.f32.mrf.mxu1  ;;  %v2478_v17 = vadd.f32 %v2477_v21, %v5386_v59  ;;  %v2410_v21 = vld [vmem:[#allocation8 + $0x7f8] sm:$0xff] }
 0x3a5   :  { %2863 = vmatmul.f32.gmra.mxu2 %v5307_v56  ;;  %3396 = vmatpush.msra.mxu3 %v2410_v21 }
 0x3a6   :  { %6434 = vst [vmem:[#allocation65_spill] sm:$0xff] %v5475_v12  ;;  %2736 = vmatmul.f32.gmra.mxu0 %v5312_v20  ;;  %2801 = vmatmul.f32.gmra.mxu1 %v6435_v47  ;;  %v2543_v27 = vadd.f32 %v2542_v25, %v2478_v17  ;;  %v2342_v25 = vld [vmem:[#allocation8 + $0x5d8] sm:$0xff] }
 0x3a7   :  { %3332 = vmatpush.msra.mxu2 %v2342_v25  ;;  %v5502_v25 = vperm.slane %v5377_v43, 1  ;;  %v2334_v43 = vld [vmem:[#allocation8 + $0x598] sm:$0xff] }
 0x3a8   :  { %v2604_v11 = vpop.f32.mrf.mxu2  ;;  %2925 = vmatmul.f32.gmra.mxu3 %v6436_v44  ;;  %v2282_v44 = vld [vmem:[#allocation8 + $0x3f8] sm:$0xff] }
 0x3a9   :  { %v2605_v28 = vadd.f32 %v2604_v11, %v2540_v29  ;;  %v6439_v29 = vld [vmem:[#allocation50_spill] sm:$0xff]  ;;  %3266 = vmatpush.msra.mxu1 %v2282_v44 }
 0x3ab   :  { %v2666_v3 = vpop.f32.mrf.mxu3  ;;  %v2480_v58 = vpop.f32.mrf.mxu0  ;;  %3267 = vmatpush.msra.mxu1 %v2278_v62 }
 0x3ac   :  { %v5482_v8 = vadd.f32 %v2666_v3, %v2602_v35  ;;  %v2545_v14 = vpop.f32.mrf.mxu1  ;;  %v2481_v35 = vadd.f32 %v2480_v58, %v5386_v59  ;;  %v2214_v58 = vld [vmem:[#allocation8 + $0x1d8] sm:$0xff] }
 0x3ad   :  { %2866 = vmatmul.f32.gmra.mxu2 %v5332_v24  ;;  %3202 = vmatpush.msra.mxu0 %v2214_v58 }
 0x3ae   :  { %6437 = vst [vmem:[#allocation56_spill] sm:$0xff] %v5482_v8  ;;  %2739 = vmatmul.f32.gmra.mxu0 %v5337_v61  ;;  %2804 = vmatmul.f32.gmra.mxu1 %v6438_v50 }
 0x3b0   :  { %v2607_v12 = vpop.f32.mrf.mxu2  ;;  %2928 = vmatmul.f32.gmra.mxu3 %v6439_v29 }
 0x3b1   :  { %v2608_v11 = vadd.f32 %v2607_v12, %v2543_v27  ;;  %v2546_v12 = vadd.f32 %v2545_v14, %v2481_v35  ;;  %v2406_v27 = vld [vmem:[#allocation8 + $0x7d8] sm:$0xff] }
 0x3b2   :  { %3397 = vmatpush.msra.mxu3 %v2406_v27  ;;  %v2338_v14 = vld [vmem:[#allocation8 + $0x5b8] sm:$0xff] }
 0x3b3   :  { %v2669_v3 = vpop.f32.mrf.mxu3  ;;  %v2483_v8 = vpop.f32.mrf.mxu0  ;;  %3333 = vmatpush.msra.mxu2 %v2338_v14 }
 0x3b4   :  { %v5489_v61 = vadd.f32 %v2669_v3, %v2605_v28  ;;  %v2548_v50 = vpop.f32.mrf.mxu1  ;;  %v2484_v44 = vadd.f32 %v2483_v8, %v5386_v59  ;;  %v2210_v8 = vld [vmem:[#allocation8 + $0x1b8] sm:$0xff] }
 0x3b5   :  { %2869 = vmatmul.f32.gmra.mxu2 %v5357_v39  ;;  %3203 = vmatpush.msra.mxu0 %v2210_v8  ;;  %v2270_v8 = vld [vmem:[#allocation8 + $0x398] sm:$0xff] }
 0x3b6   :  { %6440 = vst [vmem:[#allocation29_spill] sm:$0xff] %v5489_v61  ;;  %2742 = vmatmul.f32.gmra.mxu0 %v5362_v4  ;;  %2807 = vmatmul.f32.gmra.mxu1 %v5365_v46  ;;  %v2549_v35 = vadd.f32 %v2548_v50, %v2484_v44 }
 0x3b7   :  { %3334 = vmatpush.msra.mxu2 %v2334_v43 }
 0x3b8   :  { %v2610_v17 = vpop.f32.mrf.mxu2  ;;  %2931 = vmatmul.f32.gmra.mxu3 %v5369_v63 }
 0x3b9   :  { %v2611_v10 = vadd.f32 %v2610_v17, %v2546_v12  ;;  %v2274_v17 = vld [vmem:[#allocation8 + $0x3b8] sm:$0xff] }
 0x3ba   :  { %3268 = vmatpush.msra.mxu1 %v2274_v17 }
 0x3bb   :  { %v2672_v28 = vpop.f32.mrf.mxu3  ;;  %v2698_v21 = vpop.f32.mrf.mxu0 }
 0x3bc   :  { %v5496_v3 = vadd.f32 %v2672_v28, %v2608_v11  ;;  %v2763_v61 = vpop.f32.mrf.mxu1  ;;  %v2402_v11 = vld [vmem:[#allocation8 + $0x7b8] sm:$0xff]  ;;  %v2699_v58 = vadd.f32 %v2698_v21, %v5502_v25  ;;  %3269 = vmatpush.msra.mxu1 %v2270_v8 }
 0x3bd   :  { %2872 = vmatmul.f32.gmra.mxu2 %v5379_v22  ;;  %3398 = vmatpush.msra.mxu3 %v2402_v11  ;;  %v2206_v21 = vld [vmem:[#allocation8 + $0x198] sm:$0xff] }
 0x3be   :  { %6441 = vst [vmem:[#allocation33_spill] sm:$0xff] %v5496_v3  ;;  %2957 = vmatmul.f32.vlgmr.msrb.gmra.mxu0 %v4973_v40  ;;  %3022 = vmatmul.f32.vlgmr.msrb.gmra.mxu1 %v4976_v37  ;;  %v2764_v44 = vadd.f32 %v2763_v61, %v2699_v58  ;;  %v6444_v61 = vld [vmem:[#allocation45_spill] sm:$0xff]  ;;  %v2330_v58 = vld [vmem:[#allocation8 + $0x578] sm:$0xff] }
 0x3bf   :  { %3204 = vmatpush.msra.mxu0 %v2206_v21  ;;  %3335 = vmatpush.msra.mxu2 %v2330_v58  ;;  %v2394_v21 = vld [vmem:[#allocation8 + $0x778] sm:$0xff] }
 0x3c0   :  { %v2613_v12 = vpop.f32.mrf.mxu2  ;;  %2934 = vmatmul.f32.gmra.mxu3 %v5388_v51 }
 0x3c1   :  { %v2614_v59 = vadd.f32 %v2613_v12, %v2549_v35  ;;  %v2398_v12 = vld [vmem:[#allocation8 + $0x798] sm:$0xff] }
 0x3c2   :  { %3399 = vmatpush.msra.mxu3 %v2398_v12  ;;  %v2266_v12 = vld [vmem:[#allocation8 + $0x378] sm:$0xff] }
 0x3c3   :  { %v2675_v27 = vpop.f32.mrf.mxu3  ;;  %v2701_v62 = vpop.f32.mrf.mxu0  ;;  %3270 = vmatpush.msra.mxu1 %v2266_v12 }
 0x3c4   :  { %v5506_v28 = vadd.f32 %v2675_v27, %v2611_v10  ;;  %v2766_v50 = vpop.f32.mrf.mxu1  ;;  %v2702_v10 = vadd.f32 %v2701_v62, %v5502_v25  ;;  %v2202_v62 = vld [vmem:[#allocation8 + $0x178] sm:$0xff]  ;;  %3400 = vmatpush.msra.mxu3 %v2394_v21 }
 0x3c5   :  { %3087 = vmatmul.f32.vlgmr.msrb.gmra.mxu2 %v4998_v6  ;;  %3205 = vmatpush.msra.mxu0 %v2202_v62  ;;  %v2262_v62 = vld [vmem:[#allocation8 + $0x358] sm:$0xff] }
 0x3c6   :  { %6442 = vst [vmem:[#allocation31_spill] sm:$0xff] %v5506_v28  ;;  %2960 = vmatmul.f32.gmra.mxu0 %v5002_v32  ;;  %3025 = vmatmul.f32.gmra.mxu1 %v5005_v18  ;;  %v2767_v43 = vadd.f32 %v2766_v50, %v2702_v10  ;;  %v2326_v50 = vld [vmem:[#allocation8 + $0x558] sm:$0xff] }
 0x3c7   :  { %3336 = vmatpush.msra.mxu2 %v2326_v50  ;;  %3271 = vmatpush.msra.mxu1 %v2262_v62 }
 0x3c8   :  { %v2828_v14 = vpop.f32.mrf.mxu2  ;;  %2937 = vmatmul.f32.gmra.mxu3 %v5396_v38 }
 0x3c9   :  { %v2829_v35 = vadd.f32 %v2828_v14, %v2764_v44 }
 0x3cb   :  { %v2678_v11 = vpop.f32.mrf.mxu3  ;;  %v2704_v17 = vpop.f32.mrf.mxu0 }
 0x3cc   :  { %v5513_v27 = vadd.f32 %v2678_v11, %v2614_v59  ;;  %v2769_v28 = vpop.f32.mrf.mxu1  ;;  %v2705_v59 = vadd.f32 %v2704_v17, %v5502_v25  ;;  %v2198_v17 = vld [vmem:[#allocation8 + $0x158] sm:$0xff] }
 0x3cd   :  { %3090 = vmatmul.f32.gmra.mxu2 %v5020_v31  ;;  %3206 = vmatpush.msra.mxu0 %v2198_v17  ;;  %v2258_v17 = vld [vmem:[#allocation8 + $0x338] sm:$0xff] }
 0x3ce   :  { %6443 = vst [vmem:[#allocation34_spill] sm:$0xff] %v5513_v27  ;;  %2963 = vmatmul.f32.gmra.mxu0 %v5025_v42  ;;  %3028 = vmatmul.f32.gmra.mxu1 %v6444_v61  ;;  %v2770_v10 = vadd.f32 %v2769_v28, %v2705_v59  ;;  %v2322_v28 = vld [vmem:[#allocation8 + $0x538] sm:$0xff] }
 0x3cf   :  { %3337 = vmatpush.msra.mxu2 %v2322_v28  ;;  %3272 = vmatpush.msra.mxu1 %v2258_v17 }
 0x3d0   :  { %v2831_v44 = vpop.f32.mrf.mxu2  ;;  %3152 = vmatmul.f32.vlgmr.msrb.gmra.mxu3 %v5032_v13 }
 0x3d1   :  { %v2832_v14 = vadd.f32 %v2831_v44, %v2767_v43  ;;  %v2390_v44 = vld [vmem:[#allocation8 + $0x758] sm:$0xff] }
 0x3d2   :  { %3401 = vmatpush.msra.mxu3 %v2390_v44 }
 0x3d3   :  { %v2893_v8 = vpop.f32.mrf.mxu3  ;;  %v2707_v11 = vpop.f32.mrf.mxu0 }
 0x3d4   :  { %v5520_v27 = vadd.f32 %v2893_v8, %v2829_v35  ;;  %v2772_v3 = vpop.f32.mrf.mxu1  ;;  %v2708_v35 = vadd.f32 %v2707_v11, %v5502_v25  ;;  %v2194_v11 = vld [vmem:[#allocation8 + $0x138] sm:$0xff] }
 0x3d5   :  { %3093 = vmatmul.f32.gmra.mxu2 %v5046_v41  ;;  %3207 = vmatpush.msra.mxu0 %v2194_v11  ;;  %v2254_v11 = vld [vmem:[#allocation8 + $0x318] sm:$0xff] }
 0x3d6   :  { %6445 = vst [vmem:[#allocation35_spill] sm:$0xff] %v5520_v27  ;;  %2966 = vmatmul.f32.gmra.mxu0 %v5051_v15  ;;  %3031 = vmatmul.f32.gmra.mxu1 %v5054_v48  ;;  %v2773_v59 = vadd.f32 %v2772_v3, %v2708_v35  ;;  %v2318_v3 = vld [vmem:[#allocation8 + $0x518] sm:$0xff] }
 0x3d7   :  { %3338 = vmatpush.msra.mxu2 %v2318_v3  ;;  %3273 = vmatpush.msra.mxu1 %v2254_v11  ;;  %v2314_v3 = vld [vmem:[#allocation8 + $0x4f8] sm:$0xff] }
 0x3d8   :  { %v2834_v58 = vpop.f32.mrf.mxu2  ;;  %3155 = vmatmul.f32.gmra.mxu3 %v5058_v0 }
 0x3d9   :  { %v2835_v43 = vadd.f32 %v2834_v58, %v2770_v10  ;;  %v2386_v58 = vld [vmem:[#allocation8 + $0x738] sm:$0xff]  ;;  %3339 = vmatpush.msra.mxu2 %v2314_v3 }
 0x3da   :  { %3402 = vmatpush.msra.mxu3 %v2386_v58 }
 0x3db   :  { %v2896_v21 = vpop.f32.mrf.mxu3  ;;  %v2710_v12 = vpop.f32.mrf.mxu0 }
 0x3dc   :  { %v5527_v8 = vadd.f32 %v2896_v21, %v2832_v14  ;;  %v2775_v27 = vpop.f32.mrf.mxu1  ;;  %v2711_v14 = vadd.f32 %v2710_v12, %v5502_v25  ;;  %v2190_v12 = vld [vmem:[#allocation8 + $0x118] sm:$0xff] }
 0x3dd   :  { %3096 = vmatmul.f32.gmra.mxu2 %v5072_v23  ;;  %3208 = vmatpush.msra.mxu0 %v2190_v12  ;;  %v6451_v12 = vld [vmem:[#allocation21_spill] sm:$0xff] }
 0x3de   :  { %6446 = vst [vmem:[#allocation57_spill] sm:$0xff] %v5527_v8  ;;  %2969 = vmatmul.f32.gmra.mxu0 %v5077_v36  ;;  %3034 = vmatmul.f32.gmra.mxu1 %v5080_v2  ;;  %v2776_v35 = vadd.f32 %v2775_v27, %v2711_v14  ;;  %v6449_v27 = vld [vmem:[#allocation19_spill] sm:$0xff]  ;;  %v6450_v14 = vld [vmem:[#allocation20_spill] sm:$0xff] }
 0x3e0   :  { %v2837_v50 = vpop.f32.mrf.mxu2  ;;  %3158 = vmatmul.f32.gmra.mxu3 %v5084_v52 }
 0x3e1   :  { %v2838_v10 = vadd.f32 %v2837_v50, %v2773_v59  ;;  %v2382_v50 = vld [vmem:[#allocation8 + $0x718] sm:$0xff] }
 0x3e2   :  { %3403 = vmatpush.msra.mxu3 %v2382_v50 }
 0x3e3   :  { %v2899_v44 = vpop.f32.mrf.mxu3  ;;  %v2713_v62 = vpop.f32.mrf.mxu0 }
 0x3e4   :  { %v5534_v21 = vadd.f32 %v2899_v44, %v2835_v43  ;;  %v2778_v8 = vpop.f32.mrf.mxu1  ;;  %v2714_v43 = vadd.f32 %v2713_v62, %v5502_v25  ;;  %v2186_v62 = vld [vmem:[#allocation8 + $0xf8] sm:$0xff] }
 0x3e5   :  { %3099 = vmatmul.f32.gmra.mxu2 %v5098_v54  ;;  %3209 = vmatpush.msra.mxu0 %v2186_v62  ;;  %v2374_v62 = vld [vmem:[#allocation8 + $0x6d8] sm:$0xff] }
 0x3e6   :  { %6447 = vst [vmem:[#allocation39_spill] sm:$0xff] %v5534_v21  ;;  %2972 = vmatmul.f32.gmra.mxu0 %v5103_v30  ;;  %3037 = vmatmul.f32.gmra.mxu1 %v5106_v45  ;;  %v2250_v45 = vld [vmem:[#allocation8 + $0x2f8] sm:$0xff] }
 0x3e7   :  { %3274 = vmatpush.msra.mxu1 %v2250_v45 }
 0x3e8   :  { %v2840_v28 = vpop.f32.mrf.mxu2  ;;  %3161 = vmatmul.f32.gmra.mxu3 %v5110_v34  ;;  %v2378_v34 = vld [vmem:[#allocation8 + $0x6f8] sm:$0xff] }
 0x3e9   :  { %v2841_v59 = vadd.f32 %v2840_v28, %v2776_v35  ;;  %v2779_v35 = vadd.f32 %v2778_v8, %v2714_v43  ;;  %3404 = vmatpush.msra.mxu3 %v2378_v34  ;;  %v6453_v8 = vld [vmem:[#allocation26_spill] sm:$0xff] }
 0x3ea   :  { %v2310_v43 = vld [vmem:[#allocation8 + $0x4d8] sm:$0xff] }
 0x3eb   :  { %v2902_v58 = vpop.f32.mrf.mxu3  ;;  %v2716_v17 = vpop.f32.mrf.mxu0  ;;  %3340 = vmatpush.msra.mxu2 %v2310_v43  ;;  %3405 = vmatpush.msra.mxu3 %v2374_v62  ;;  %v2370_v62 = vld [vmem:[#allocation8 + $0x6b8] sm:$0xff] }
 0x3ec   :  { %v5541_v44 = vadd.f32 %v2902_v58, %v2838_v10  ;;  %v2781_v21 = vpop.f32.mrf.mxu1  ;;  %v2717_v10 = vadd.f32 %v2716_v17, %v5502_v25  ;;  %v2182_v17 = vld [vmem:[#allocation8 + $0xd8] sm:$0xff] }
 0x3ed   :  { %3102 = vmatmul.f32.gmra.mxu2 %v5124_v60  ;;  %3210 = vmatpush.msra.mxu0 %v2182_v17 }
 0x3ee   :  { %6448 = vst [vmem:[#allocation44_spill] sm:$0xff] %v5541_v44  ;;  %2975 = vmatmul.f32.gmra.mxu0 %v6449_v27  ;;  %3040 = vmatmul.f32.gmra.mxu1 %v6450_v14  ;;  %v2782_v3 = vadd.f32 %v2781_v21, %v2717_v10  ;;  %v6456_v21 = vld [vmem:[#allocation30_spill] sm:$0xff] }
 0x3ef   :  { %v2306_v10 = vld [vmem:[#allocation8 + $0x4b8] sm:$0xff]  ;;  %3406 = vmatpush.msra.mxu3 %v2370_v62 }
 0x3f0   :  { %v2843_v28 = vpop.f32.mrf.mxu2  ;;  %3164 = vmatmul.f32.gmra.mxu3 %v6451_v12  ;;  %v2246_v12 = vld [vmem:[#allocation8 + $0x2d8] sm:$0xff]  ;;  %3341 = vmatpush.msra.mxu2 %v2306_v10 }
 0x3f1   :  { %v2844_v50 = vadd.f32 %v2843_v28, %v2779_v35  ;;  %v6454_v28 = vld [vmem:[#allocation27_spill] sm:$0xff]  ;;  %3275 = vmatpush.msra.mxu1 %v2246_v12  ;;  %v2366_v62 = vld [vmem:[#allocation8 + $0x698] sm:$0xff] }
 0x3f2   :  { %3407 = vmatpush.msra.mxu3 %v2366_v62 }
 0x3f3   :  { %v2905_v11 = vpop.f32.mrf.mxu3  ;;  %v2719_v58 = vpop.f32.mrf.mxu0 }
 0x3f4   :  { %v5548_v44 = vadd.f32 %v2905_v11, %v2841_v59  ;;  %v2784_v14 = vpop.f32.mrf.mxu1  ;;  %v2720_v45 = vadd.f32 %v2719_v58, %v5502_v25  ;;  %v2178_v58 = vld [vmem:[#allocation8 + $0xb8] sm:$0xff] }
 0x3f5   :  { %3105 = vmatmul.f32.gmra.mxu2 %v6416_v26  ;;  %3211 = vmatpush.msra.mxu0 %v2178_v58 }
 0x3f6   :  { %6452 = vst [vmem:[#allocation23_spill] sm:$0xff] %v5548_v44  ;;  %2978 = vmatmul.f32.gmra.mxu0 %v6417_v9  ;;  %3043 = vmatmul.f32.gmra.mxu1 %v6453_v8  ;;  %v2785_v43 = vadd.f32 %v2784_v14, %v2720_v45  ;;  %v6459_v14 = vld [vmem:[#allocation37_spill] sm:$0xff]  ;;  %v2302_v45 = vld [vmem:[#allocation8 + $0x498] sm:$0xff] }
 0x3f7   :  { %3342 = vmatpush.msra.mxu2 %v2302_v45  ;;  %v2298_v45 = vld [vmem:[#allocation8 + $0x478] sm:$0xff] }
 0x3f8   :  { %v2846_v35 = vpop.f32.mrf.mxu2  ;;  %3167 = vmatmul.f32.gmra.mxu3 %v6454_v28  ;;  %v2242_v28 = vld [vmem:[#allocation8 + $0x2b8] sm:$0xff] }
 0x3f9   :  { %v2847_v34 = vadd.f32 %v2846_v35, %v2782_v3  ;;  %v6457_v35 = vld [vmem:[#allocation32_spill] sm:$0xff]  ;;  %3276 = vmatpush.msra.mxu1 %v2242_v28  ;;  %3343 = vmatpush.msra.mxu2 %v2298_v45  ;;  %v2294_v45 = vld [vmem:[#allocation8 + $0x458] sm:$0xff] }
 0x3fb   :  { %v2908_v59 = vpop.f32.mrf.mxu3  ;;  %v2722_v11 = vpop.f32.mrf.mxu0  ;;  %3344 = vmatpush.msra.mxu2 %v2294_v45  ;;  %v2222_v45 = vld [vmem:[#allocation8 + $0x218] sm:$0xff] }
 0x3fc   :  { %v5555_v44 = vadd.f32 %v2908_v59, %v2844_v50  ;;  %v2787_v8 = vpop.f32.mrf.mxu1  ;;  %v2723_v12 = vadd.f32 %v2722_v11, %v5502_v25  ;;  %v2174_v11 = vld [vmem:[#allocation8 + $0x98] sm:$0xff] }
 0x3fd   :  { %3108 = vmatmul.f32.gmra.mxu2 %v5178_v7  ;;  %3212 = vmatpush.msra.mxu0 %v2174_v11  ;;  %v6464_v11 = vld [vmem:[#allocation42_spill] sm:$0xff] }
 0x3fe   :  { %6455 = vst [vmem:[#allocation24_spill] sm:$0xff] %v5555_v44  ;;  %2981 = vmatmul.f32.gmra.mxu0 %v6420_v57  ;;  %3046 = vmatmul.f32.gmra.mxu1 %v6456_v21  ;;  %v2788_v10 = vadd.f32 %v2787_v8, %v2723_v12  ;;  %v6462_v8 = vld [vmem:[#allocation40_spill] sm:$0xff]  ;;  %v6463_v12 = vld [vmem:[#allocation41_spill] sm:$0xff] }
 0x400   :  { %v2849_v3 = vpop.f32.mrf.mxu2  ;;  %3170 = vmatmul.f32.gmra.mxu3 %v6457_v35  ;;  %v2238_v35 = vld [vmem:[#allocation8 + $0x298] sm:$0xff] }
 0x401   :  { %v2850_v17 = vadd.f32 %v2849_v3, %v2785_v43  ;;  %v6460_v3 = vld [vmem:[#allocation38_spill] sm:$0xff]  ;;  %3277 = vmatpush.msra.mxu1 %v2238_v35 }
 0x403   :  { %v2911_v50 = vpop.f32.mrf.mxu3  ;;  %v2725_v59 = vpop.f32.mrf.mxu0 }
 0x404   :  { %v5562_v44 = vadd.f32 %v2911_v50, %v2847_v34  ;;  %v2790_v21 = vpop.f32.mrf.mxu1  ;;  %v2726_v28 = vadd.f32 %v2725_v59, %v5502_v25  ;;  %v2170_v59 = vld [vmem:[#allocation8 + $0x78] sm:$0xff] }
 0x405   :  { %3111 = vmatmul.f32.gmra.mxu2 %v5203_v19  ;;  %3213 = vmatpush.msra.mxu0 %v2170_v59  ;;  %v2358_v59 = vld [vmem:[#allocation8 + $0x658] sm:$0xff] }
 0x406   :  { %6458 = vst [vmem:[#allocation28_spill] sm:$0xff] %v5562_v44  ;;  %2984 = vmatmul.f32.gmra.mxu0 %v6423_v49  ;;  %3049 = vmatmul.f32.gmra.mxu1 %v6459_v14  ;;  %v2234_v49 = vld [vmem:[#allocation8 + $0x278] sm:$0xff] }
 0x407   :  { %3278 = vmatpush.msra.mxu1 %v2234_v49 }
 0x408   :  { %v2852_v43 = vpop.f32.mrf.mxu2  ;;  %3173 = vmatmul.f32.gmra.mxu3 %v6460_v3  ;;  %v2362_v3 = vld [vmem:[#allocation8 + $0x678] sm:$0xff] }
 0x409   :  { %v2853_v58 = vadd.f32 %v2852_v43, %v2788_v10  ;;  %v2791_v10 = vadd.f32 %v2790_v21, %v2726_v28  ;;  %3408 = vmatpush.msra.mxu3 %v2362_v3  ;;  %v6466_v21 = vld [vmem:[#allocation43_spill] sm:$0xff]  ;;  %v6467_v28 = vld [vmem:[#allocation46_spill] sm:$0xff] }
 0x40b   :  { %v2914_v34 = vpop.f32.mrf.mxu3  ;;  %v2728_v50 = vpop.f32.mrf.mxu0  ;;  %3409 = vmatpush.msra.mxu3 %v2358_v59 }
 0x40c   :  { %v5569_v44 = vadd.f32 %v2914_v34, %v2850_v17  ;;  %v2793_v14 = vpop.f32.mrf.mxu1  ;;  %v2729_v35 = vadd.f32 %v2728_v50, %v5502_v25  ;;  %v2166_v50 = vld [vmem:[#allocation8 + $0x58] sm:$0xff] }
 0x40d   :  { %3114 = vmatmul.f32.gmra.mxu2 %v5228_v33  ;;  %3214 = vmatpush.msra.mxu0 %v2166_v50  ;;  %v2354_v50 = vld [vmem:[#allocation8 + $0x638] sm:$0xff] }
 0x40e   :  { %6461 = vst [vmem:[#allocation17_spill] sm:$0xff] %v5569_v44  ;;  %2987 = vmatmul.f32.gmra.mxu0 %v6462_v8  ;;  %3052 = vmatmul.f32.gmra.mxu1 %v6463_v12 }
 0x40f   :  { %3410 = vmatpush.msra.mxu3 %v2354_v50 }
 0x410   :  { %v2855_v43 = vpop.f32.mrf.mxu2  ;;  %3176 = vmatmul.f32.gmra.mxu3 %v6464_v11  ;;  %v2230_v11 = vld [vmem:[#allocation8 + $0x258] sm:$0xff] }
 0x411   :  { %v2856_v62 = vadd.f32 %v2855_v43, %v2791_v10  ;;  %v2794_v10 = vadd.f32 %v2793_v14, %v2729_v35  ;;  %3279 = vmatpush.msra.mxu1 %v2230_v11  ;;  %v2158_v35 = vld [vmem:[#allocation8 + $0x18] sm:$0xff] }
 0x413   :  { %v2917_v17 = vpop.f32.mrf.mxu3  ;;  %v2731_v34 = vpop.f32.mrf.mxu0 }
 0x414   :  { %v5576_v44 = vadd.f32 %v2917_v17, %v2853_v58  ;;  %v2796_v12 = vpop.f32.mrf.mxu1  ;;  %v2732_v49 = vadd.f32 %v2731_v34, %v5502_v25 }
 0x415   :  { %3117 = vmatmul.f32.gmra.mxu2 %v5253_v55 }
 0x416   :  { %6465 = vst [vmem:[#allocation18_spill] sm:$0xff] %v5576_v44  ;;  %2990 = vmatmul.f32.gmra.mxu0 %v6466_v21  ;;  %3055 = vmatmul.f32.gmra.mxu1 %v6467_v28  ;;  %v2162_v44 = vld [vmem:[#allocation8 + $0x38] sm:$0xff]  ;;  %v2797_v34 = vadd.f32 %v2796_v12, %v2732_v49 }
 0x417   :  { %v2226_v21 = vld [vmem:[#allocation8 + $0x238] sm:$0xff]  ;;  %3215 = vmatpush.msra.mxu0 %v2162_v44 }
 0x418   :  { %v2858_v43 = vpop.f32.mrf.mxu2  ;;  %3179 = vmatmul.f32.gmra.mxu3 %v6431_v53  ;;  %3280 = vmatpush.msra.mxu1 %v2226_v21 }
 0x419   :  { %v2859_v3 = vadd.f32 %v2858_v43, %v2794_v10  ;;  %v6469_v10 = vld [vmem:[#allocation47_spill] sm:$0xff]  ;;  %v2290_v43 = vld [vmem:[#allocation8 + $0x438] sm:$0xff]  ;;  %3216 = vmatpush.msra.mxu0 %v2158_v35 }
 0x41a   :  { %3281 = vmatpush.msra.mxu1 %v2222_v45  ;;  %3345 = vmatpush.msra.mxu2 %v2290_v43  ;;  %v6471_v35 = vld [vmem:[#allocation58_spill] sm:$0xff] }
 0x41b   :  { %v2920_v58 = vpop.f32.mrf.mxu3  ;;  %v2734_v17 = vpop.f32.mrf.mxu0  ;;  %v2350_v43 = vld [vmem:[#allocation8 + $0x618] sm:$0xff] }
 0x41c   :  { %v5583_v28 = vadd.f32 %v2920_v58, %v2856_v62  ;;  %v2799_v14 = vpop.f32.mrf.mxu1  ;;  %v2735_v44 = vadd.f32 %v2734_v17, %v5502_v25  ;;  %v2286_v58 = vld [vmem:[#allocation8 + $0x418] sm:$0xff]  ;;  %3411 = vmatpush.msra.mxu3 %v2350_v43 }
 0x41d   :  { %3120 = vmatmul.f32.gmra.mxu2 %v5278_v1 }
 0x41e   :  { %6468 = vst [vmem:[#allocation48_spill] sm:$0xff] %v5583_v28  ;;  %2993 = vmatmul.f32.gmra.mxu0 %v6469_v10  ;;  %3058 = vmatmul.f32.gmra.mxu1 %v6433_v5  ;;  %v2800_v12 = vadd.f32 %v2799_v14, %v2735_v44 }
 0x41f   :  { %3346 = vmatpush.msra.mxu2 %v2286_v58  ;;  %v6474_v58 = vld [vmem:[#allocation59_spill] sm:$0xff] }
 0x420   :  { %v2861_v11 = vpop.f32.mrf.mxu2  ;;  %3182 = vmatmul.f32.gmra.mxu3 %v5294_v16 }
 0x421   :  { %v2862_v62 = vadd.f32 %v2861_v11, %v2797_v34 }
 0x423   :  { %v2923_v21 = vpop.f32.mrf.mxu3  ;;  %v2737_v59 = vpop.f32.mrf.mxu0 }
 0x424   :  { %v5590_v28 = vadd.f32 %v2923_v21, %v2859_v3  ;;  %v2802_v10 = vpop.f32.mrf.mxu1  ;;  %v2738_v17 = vadd.f32 %v2737_v59, %v5502_v25  ;;  %v6473_v21 = vld [vmem:[#allocation49_spill] sm:$0xff] }
 0x425   :  { %3123 = vmatmul.f32.gmra.mxu2 %v5307_v56 }
 0x426   :  { %6470 = vst [vmem:[#allocation50_spill] sm:$0xff] %v5590_v28  ;;  %2996 = vmatmul.f32.gmra.mxu0 %v5312_v20  ;;  %3061 = vmatmul.f32.gmra.mxu1 %v6435_v47  ;;  %v2803_v14 = vadd.f32 %v2802_v10, %v2738_v17 }
 0x428   :  { %v2864_v49 = vpop.f32.mrf.mxu2  ;;  %3185 = vmatmul.f32.gmra.mxu3 %v6471_v35 }
 0x429   :  { %v2865_v45 = vadd.f32 %v2864_v49, %v2800_v12 }
 0x42b   :  { %v2926_v34 = vpop.f32.mrf.mxu3  ;;  %v2740_v3 = vpop.f32.mrf.mxu0 }
 0x42c   :  { %v5597_v11 = vadd.f32 %v2926_v34, %v2862_v62  ;;  %v2805_v50 = vpop.f32.mrf.mxu1  ;;  %v2741_v49 = vadd.f32 %v2740_v3, %v5502_v25  ;;  %v3702_v34 = vld [vmem:[#allocation9 + $0x178] sm:$0xff] }
 0x42d   :  { %3126 = vmatmul.f32.gmra.mxu2 %v5332_v24  ;;  %v3718_v3 = vld [vmem:[#allocation9 + $0x1f8] sm:$0xff] }
 0x42e   :  { %6472 = vst [vmem:[#allocation45_spill] sm:$0xff] %v5597_v11  ;;  %2999 = vmatmul.f32.gmra.mxu0 %v6473_v21  ;;  %3064 = vmatmul.f32.gmra.mxu1 %v6474_v58  ;;  %v2806_v11 = vadd.f32 %v2805_v50, %v2741_v49  ;;  %v5619_v49 = vld [vmem:[%s6053_s7] sm:$0xf]  ;;  %s4008_s7 = sld [smem:[#allocation2 + $0x2]] }
 0x42f   :  { %3853 = vmatpush.msrb.mxu2 %v3702_v34  ;;  %3918 = vmatpush.msrb.mxu3 %v3718_v3  ;;  %v3717_v34 = vld [vmem:[#allocation9 + $0x1f0] sm:$0xff] }
 0x430   :  { %v2867_v44 = vpop.f32.mrf.mxu2  ;;  %3188 = vmatmul.f32.gmra.mxu3 %v6439_v29  ;;  %v3685_v3 = vld [vmem:[#allocation9 + $0xf0] sm:$0xff] }
 0x431   :  { %v2868_v12 = vadd.f32 %v2867_v44, %v2803_v14  ;;  %v3670_v14 = vld [vmem:[#allocation9 + $0x78] sm:$0xff]  ;;  %3919 = vmatpush.msrb.mxu3 %v3717_v34 }
 0x432   :  { %3723 = vmatpush.msrb.mxu0 %v3670_v14 }
 0x433   :  { %v2929_v43 = vpop.f32.mrf.mxu3  ;;  %v2743_v59 = vpop.f32.mrf.mxu0 }
 0x434   :  { %v5604_v28 = vadd.f32 %v2929_v43, %v2865_v45  ;;  %v2808_v62 = vpop.f32.mrf.mxu1  ;;  %v2744_v45 = vadd.f32 %v2743_v59, %v5502_v25  ;;  %v5622_v25 = vperm.slane %v5619_v49, 2 }
 0x435   :  { %3129 = vmatmul.f32.gmra.mxu2 %v5357_v39  ;;  %v3686_v39 = vld [vmem:[#allocation9 + $0xf8] sm:$0xff] }
 0x436   :  { %6475 = vst [vmem:[#allocation19_spill] sm:$0xff] %v5604_v28  ;;  %3002 = vmatmul.f32.gmra.mxu0 %v5362_v4  ;;  %3067 = vmatmul.f32.gmra.mxu1 %v5365_v46  ;;  %v2809_v50 = vadd.f32 %v2808_v62, %v2744_v45  ;;  %v3700_v45 = vld [vmem:[#allocation9 + $0x168] sm:$0xff] }
 0x437   :  { %3788 = vmatpush.msrb.mxu1 %v3686_v39  ;;  %v3669_v39 = vld [vmem:[#allocation9 + $0x70] sm:$0xff] }
 0x438   :  { %v2870_v10 = vpop.f32.mrf.mxu2  ;;  %3191 = vmatmul.f32.gmra.mxu3 %v5369_v63  ;;  %3724 = vmatpush.msrb.mxu0 %v3669_v39 }
 0x439   :  { %v2871_v17 = vadd.f32 %v2870_v10, %v2806_v11  ;;  %v3701_v11 = vld [vmem:[#allocation9 + $0x170] sm:$0xff]  ;;  %3789 = vmatpush.msrb.mxu1 %v3685_v3  ;;  %v3667_v3 = vld [vmem:[#allocation9 + $0x60] sm:$0xff] }
 0x43a   :  { %3854 = vmatpush.msrb.mxu2 %v3701_v11 }
 0x43b   :  { %v2932_v44 = vpop.f32.mrf.mxu3  ;;  %v2958_v43 = vpop.f32.mrf.mxu0 }
 0x43c   :  { %v5611_v28 = vadd.f32 %v2932_v44, %v2868_v12  ;;  %v3023_v4 = vpop.f32.mrf.mxu1  ;;  %3855 = vmatpush.msrb.mxu2 %v3700_v45  ;;  %v3715_v45 = vld [vmem:[#allocation9 + $0x1e0] sm:$0xff] }
 0x43d   :  { %3132 = vmatmul.f32.gmra.mxu2 %v5379_v22 }
 0x43e   :  { %3217 = vmatmul.f32.vlgmr.msra.gmra.mxu0 %v4973_v40  ;;  %3282 = vmatmul.f32.vlgmr.msra.gmra.mxu1 %v4976_v37  ;;  %v2959_v40 = vadd.f32 %v2958_v43, %v5622_v25 }
 0x440   :  { %v2873_v12 = vpop.f32.mrf.mxu2  ;;  %3194 = vmatmul.f32.gmra.mxu3 %v5388_v51  ;;  %v3024_v44 = vadd.f32 %v3023_v4, %v2959_v40 }
 0x441   :  { %v2874_v59 = vadd.f32 %v2873_v12, %v2809_v50  ;;  %v3668_v50 = vld [vmem:[#allocation9 + $0x68] sm:$0xff] }
 0x442   :  { %v3716_v12 = vld [vmem:[#allocation9 + $0x1e8] sm:$0xff]  ;;  %3725 = vmatpush.msrb.mxu0 %v3668_v50  ;;  %v3683_v50 = vld [vmem:[#allocation9 + $0xe0] sm:$0xff] }
 0x443   :  { %v2935_v37 = vpop.f32.mrf.mxu3  ;;  %v2961_v62 = vpop.f32.mrf.mxu0  ;;  %3920 = vmatpush.msrb.mxu3 %v3716_v12 }
 0x444   :  { %v5626_v10 = vadd.f32 %v2935_v37, %v2871_v17  ;;  %v3026_v14 = vpop.f32.mrf.mxu1  ;;  %v2962_v17 = vadd.f32 %v2961_v62, %v5622_v25  ;;  %v3684_v37 = vld [vmem:[#allocation9 + $0xe8] sm:$0xff]  ;;  %3726 = vmatpush.msrb.mxu0 %v3667_v3  ;;  %v3713_v3 = vld [vmem:[#allocation9 + $0x1d0] sm:$0xff] }
 0x445   :  { %3347 = vmatmul.f32.vlgmr.msra.gmra.mxu2 %v4998_v6  ;;  %3790 = vmatpush.msrb.mxu1 %v3684_v37 }
 0x446   :  { %3220 = vmatmul.f32.gmra.mxu0 %v5002_v32  ;;  %3285 = vmatmul.f32.gmra.mxu1 %v5005_v18  ;;  %v3699_v18 = vld [vmem:[#allocation9 + $0x160] sm:$0xff]  ;;  %v3027_v4 = vadd.f32 %v3026_v14, %v2962_v17  ;;  %v3666_v17 = vld [vmem:[#allocation9 + $0x58] sm:$0xff] }
 0x447   :  { %3856 = vmatpush.msrb.mxu2 %v3699_v18  ;;  %3921 = vmatpush.msrb.mxu3 %v3715_v45  ;;  %v3682_v18 = vld [vmem:[#allocation9 + $0xd8] sm:$0xff] }
 0x448   :  { %v3088_v11 = vpop.f32.mrf.mxu2  ;;  %3197 = vmatmul.f32.gmra.mxu3 %v5396_v38  ;;  %3791 = vmatpush.msrb.mxu1 %v3683_v50  ;;  %v6477_v50 = vld [vmem:[#allocation16_spill] sm:$0xff] }
 0x449   :  { %v3089_v43 = vadd.f32 %v3088_v11, %v3024_v44  ;;  %3727 = vmatpush.msrb.mxu0 %v3666_v17 }
 0x44a   :  { %3792 = vmatpush.msrb.mxu1 %v3682_v18 }
 0x44b   :  { %v2938_v39 = vpop.f32.mrf.mxu3  ;;  %v2964_v6 = vpop.f32.mrf.mxu0 }
 0x44c   :  { %v5633_v34 = vadd.f32 %v2938_v39, %v2874_v59  ;;  %v3029_v32 = vpop.f32.mrf.mxu1  ;;  %v2965_v59 = vadd.f32 %v2964_v6, %v5622_v25  ;;  %v3714_v39 = vld [vmem:[#allocation9 + $0x1d8] sm:$0xff] }
 0x44d   :  { %3350 = vmatmul.f32.gmra.mxu2 %v5020_v31  ;;  %3922 = vmatpush.msrb.mxu3 %v3714_v39 }
 0x44e   :  { %3223 = vmatmul.f32.gmra.mxu0 %v5025_v42  ;;  %3288 = vmatmul.f32.gmra.mxu1 %v6444_v61  ;;  %v3030_v61 = vadd.f32 %v3029_v32, %v2965_v59 }
 0x44f   :  { %3923 = vmatpush.msrb.mxu3 %v3713_v3 }
 0x450   :  { %v3091_v40 = vpop.f32.mrf.mxu2  ;;  %3412 = vmatmul.f32.vlgmr.msra.gmra.mxu3 %v5032_v13  ;;  %v3698_v13 = vld [vmem:[#allocation9 + $0x158] sm:$0xff] }
 0x451   :  { %v3092_v62 = vadd.f32 %v3091_v40, %v3027_v4  ;;  %3857 = vmatpush.msrb.mxu2 %v3698_v13  ;;  %v3665_v40 = vld [vmem:[#allocation9 + $0x50] sm:$0xff] }
 0x452   :  { %3728 = vmatpush.msrb.mxu0 %v3665_v40  ;;  %v3711_v40 = vld [vmem:[#allocation9 + $0x1c0] sm:$0xff] }
 0x453   :  { %v3153_v44 = vpop.f32.mrf.mxu3  ;;  %v2967_v31 = vpop.f32.mrf.mxu0 }
 0x454   :  { %v5640_v11 = vadd.f32 %v3153_v44, %v3089_v43  ;;  %v3032_v42 = vpop.f32.mrf.mxu1  ;;  %v2968_v43 = vadd.f32 %v2967_v31, %v5622_v25  ;;  %v3681_v44 = vld [vmem:[#allocation9 + $0xd0] sm:$0xff] }
 0x455   :  { %3353 = vmatmul.f32.gmra.mxu2 %v5046_v41  ;;  %3793 = vmatpush.msrb.mxu1 %v3681_v44 }
 0x456   :  { %3226 = vmatmul.f32.gmra.mxu0 %v5051_v15  ;;  %3291 = vmatmul.f32.gmra.mxu1 %v5054_v48  ;;  %v3697_v48 = vld [vmem:[#allocation9 + $0x150] sm:$0xff]  ;;  %vm3464_vm2 = vcmp.gt.f32.partialorder %v5640_v11, 0.0 }
 0x457   :  { %3858 = vmatpush.msrb.mxu2 %v3697_v48  ;;  %v6479_v48 = vld [vmem:[#allocation21_spill] sm:$0xff] }
 0x458   :  { %v3094_v14 = vpop.f32.mrf.mxu2  ;;  %3415 = vmatmul.f32.gmra.mxu3 %v5058_v0  ;;  %v3033_v0 = vadd.f32 %v3032_v42, %v2968_v43  ;;  %v3680_v43 = vld [vmem:[#allocation9 + $0xc8] sm:$0xff] }
 0x459   :  { %v3095_v12 = vadd.f32 %v3094_v14, %v3030_v61  ;;  %v3664_v61 = vld [vmem:[#allocation9 + $0x48] sm:$0xff]  ;;  %3794 = vmatpush.msrb.mxu1 %v3680_v43 }
 0x45a   :  { %v3712_v14 = vld [vmem:[#allocation9 + $0x1c8] sm:$0xff]  ;;  %3729 = vmatpush.msrb.mxu0 %v3664_v61 }
 0x45b   :  { %v3156_v6 = vpop.f32.mrf.mxu3  ;;  %v2970_v41 = vpop.f32.mrf.mxu0  ;;  %3924 = vmatpush.msrb.mxu3 %v3712_v14 }
 0x45c   :  { %v5647_v37 = vadd.f32 %v3156_v6, %v3092_v62  ;;  %v3035_v15 = vpop.f32.mrf.mxu1  ;;  %v2971_v62 = vadd.f32 %v2970_v41, %v5622_v25  ;;  %v6478_v6 = vld [vmem:[#allocation20_spill] sm:$0xff]  ;;  %v3695_v41 = vld [vmem:[#allocation9 + $0x140] sm:$0xff] }
 0x45d   :  { %3356 = vmatmul.f32.gmra.mxu2 %v5072_v23  ;;  %3925 = vmatpush.msrb.mxu3 %v3711_v40  ;;  %v3677_v40 = vld [vmem:[#allocation9 + $0xb0] sm:$0xff] }
 0x45e   :  { %3229 = vmatmul.f32.gmra.mxu0 %v5077_v36  ;;  %3294 = vmatmul.f32.gmra.mxu1 %v5080_v2  ;;  %v6476_v2 = vld [vmem:[#allocation15_spill] sm:$0xff]  ;;  %v3036_v31 = vadd.f32 %v3035_v15, %v2971_v62  ;;  %vm3468_vm5 = vcmp.gt.f32.partialorder %v5647_v37, 0.0 }
 0x460   :  { %v3097_v32 = vpop.f32.mrf.mxu2  ;;  %3418 = vmatmul.f32.gmra.mxu3 %v5084_v52  ;;  %v3696_v52 = vld [vmem:[#allocation9 + $0x148] sm:$0xff] }
 0x461   :  { %v3098_v4 = vadd.f32 %v3097_v32, %v3033_v0  ;;  %3859 = vmatpush.msrb.mxu2 %v3696_v52  ;;  %v3663_v32 = vld [vmem:[#allocation9 + $0x40] sm:$0xff] }
 0x462   :  { %3730 = vmatpush.msrb.mxu0 %v3663_v32  ;;  %v6481_v52 = vld [vmem:[#allocation27_spill] sm:$0xff] }
 0x463   :  { %v3159_v45 = vpop.f32.mrf.mxu3  ;;  %v2973_v23 = vpop.f32.mrf.mxu0  ;;  %3860 = vmatpush.msrb.mxu2 %v3695_v41 }
 0x464   :  { %v5654_v59 = vadd.f32 %v3159_v45, %v3095_v12  ;;  %v3038_v36 = vpop.f32.mrf.mxu1  ;;  %v2974_v12 = vadd.f32 %v2973_v23, %v5622_v25  ;;  %v3679_v45 = vld [vmem:[#allocation9 + $0xc0] sm:$0xff]  ;;  %v6480_v23 = vld [vmem:[#allocation26_spill] sm:$0xff] }
 0x465   :  { %3359 = vmatmul.f32.gmra.mxu2 %v5098_v54  ;;  %3795 = vmatpush.msrb.mxu1 %v3679_v45 }
 0x466   :  { %3232 = vmatmul.f32.gmra.mxu0 %v5103_v30  ;;  %3297 = vmatmul.f32.gmra.mxu1 %v6476_v2  ;;  %v3039_v15 = vadd.f32 %v3038_v36, %v2974_v12  ;;  %v3694_v36 = vld [vmem:[#allocation9 + $0x138] sm:$0xff]  ;;  %vm3472_vm8 = vcmp.gt.f32.partialorder %v5654_v59, 0.0 }
 0x467   :  { %3861 = vmatpush.msrb.mxu2 %v3694_v36  ;;  %v3678_v12 = vld [vmem:[#allocation9 + $0xb8] sm:$0xff] }
 0x468   :  { %v3100_v42 = vpop.f32.mrf.mxu2  ;;  %3421 = vmatmul.f32.gmra.mxu3 %v6477_v50  ;;  %v3710_v50 = vld [vmem:[#allocation9 + $0x1b8] sm:$0xff]  ;;  %3796 = vmatpush.msrb.mxu1 %v3678_v12 }
 0x469   :  { %v3101_v13 = vadd.f32 %v3100_v42, %v3036_v31  ;;  %v3662_v42 = vld [vmem:[#allocation9 + $0x38] sm:$0xff]  ;;  %3926 = vmatpush.msrb.mxu3 %v3710_v50 }
 0x46a   :  { %3731 = vmatpush.msrb.mxu0 %v3662_v42  ;;  %3797 = vmatpush.msrb.mxu1 %v3677_v40  ;;  %v3674_v40 = vld [vmem:[#allocation9 + $0x98] sm:$0xff] }
 0x46b   :  { %v3162_v17 = vpop.f32.mrf.mxu3  ;;  %v2976_v54 = vpop.f32.mrf.mxu0 }
 0x46c   :  { %v5661_v39 = vadd.f32 %v3162_v17, %v3098_v4  ;;  %v3041_v30 = vpop.f32.mrf.mxu1  ;;  %v2977_v4 = vadd.f32 %v2976_v54, %v5622_v25  ;;  %v6482_v17 = vld [vmem:[#allocation30_spill] sm:$0xff]  ;;  %v3693_v54 = vld [vmem:[#allocation9 + $0x130] sm:$0xff] }
 0x46d   :  { %3362 = vmatmul.f32.gmra.mxu2 %v5124_v60 }
 0x46e   :  { %3235 = vmatmul.f32.gmra.mxu0 %v6449_v27  ;;  %3300 = vmatmul.f32.gmra.mxu1 %v6478_v6  ;;  %v3042_v44 = vadd.f32 %v3041_v30, %v2977_v4  ;;  %v6483_v6 = vld [vmem:[#allocation32_spill] sm:$0xff]  ;;  %vm3476_vm12 = vcmp.gt.f32.partialorder %v5661_v39, 0.0 }
 0x46f   :  { %3862 = vmatpush.msrb.mxu2 %v3693_v54  ;;  %v6484_v4 = vld [vmem:[#allocation36_spill] sm:$0xff] }
 0x470   :  { %v3103_v18 = vpop.f32.mrf.mxu2  ;;  %3424 = vmatmul.f32.gmra.mxu3 %v6479_v48 }
 0x471   :  { %v3104_v0 = vadd.f32 %v3103_v18, %v3039_v15  ;;  %v3661_v15 = vld [vmem:[#allocation9 + $0x30] sm:$0xff] }
 0x472   :  { %v3709_v18 = vld [vmem:[#allocation9 + $0x1b0] sm:$0xff]  ;;  %3732 = vmatpush.msrb.mxu0 %v3661_v15  ;;  %v3675_v15 = vld [vmem:[#allocation9 + $0xa0] sm:$0xff] }
 0x473   :  { %v3165_v3 = vpop.f32.mrf.mxu3  ;;  %v2979_v60 = vpop.f32.mrf.mxu0  ;;  %3927 = vmatpush.msrb.mxu3 %v3709_v18  ;;  %v6489_v18 = vld [vmem:[#allocation43_spill] sm:$0xff] }
 0x474   :  { %v5668_v62 = vadd.f32 %v3165_v3, %v3101_v13  ;;  %v3044_v27 = vpop.f32.mrf.mxu1  ;;  %v2980_v13 = vadd.f32 %v2979_v60, %v5622_v25  ;;  %v6485_v3 = vld [vmem:[#allocation37_spill] sm:$0xff]  ;;  %v3692_v60 = vld [vmem:[#allocation9 + $0x128] sm:$0xff] }
 0x475   :  { %3365 = vmatmul.f32.gmra.mxu2 %v6416_v26 }
 0x476   :  { %3238 = vmatmul.f32.gmra.mxu0 %v6417_v9  ;;  %3303 = vmatmul.f32.gmra.mxu1 %v6480_v23  ;;  %v3045_v30 = vadd.f32 %v3044_v27, %v2980_v13  ;;  %v6486_v23 = vld [vmem:[#allocation38_spill] sm:$0xff]  ;;  %v3676_v13 = vld [vmem:[#allocation9 + $0xa8] sm:$0xff] }
 0x477   :  { %3863 = vmatpush.msrb.mxu2 %v3692_v60  ;;  %3798 = vmatpush.msrb.mxu1 %v3676_v13  ;;  %v3706_v60 = vld [vmem:[#allocation9 + $0x198] sm:$0xff]  ;;  %v3689_v13 = vld [vmem:[#allocation9 + $0x110] sm:$0xff] }
 0x478   :  { %v3106_v2 = vpop.f32.mrf.mxu2  ;;  %3427 = vmatmul.f32.gmra.mxu3 %v6481_v52 }
 0x479   :  { %v3107_v31 = vadd.f32 %v3106_v2, %v3042_v44  ;;  %v3660_v44 = vld [vmem:[#allocation9 + $0x28] sm:$0xff]  ;;  %3799 = vmatpush.msrb.mxu1 %v3675_v15 }
 0x47a   :  { %v3708_v2 = vld [vmem:[#allocation9 + $0x1a8] sm:$0xff]  ;;  %3733 = vmatpush.msrb.mxu0 %v3660_v44 }
 0x47b   :  { %v3168_v61 = vpop.f32.mrf.mxu3  ;;  %v2982_v26 = vpop.f32.mrf.mxu0  ;;  %3928 = vmatpush.msrb.mxu3 %v3708_v2  ;;  %3800 = vmatpush.msrb.mxu1 %v3674_v40  ;;  %v3656_v2 = vld [vmem:[#allocation9 + $0x8] sm:$0xff] }
 0x47c   :  { %v5675_v14 = vadd.f32 %v3168_v61, %v3104_v0  ;;  %v3047_v9 = vpop.f32.mrf.mxu1  ;;  %v2983_v48 = vadd.f32 %v2982_v26, %v5622_v25  ;;  %v6487_v61 = vld [vmem:[#allocation41_spill] sm:$0xff]  ;;  %v3691_v26 = vld [vmem:[#allocation9 + $0x120] sm:$0xff]  ;;  %v3704_v15 = vld [vmem:[#allocation9 + $0x188] sm:$0xff] }
 0x47d   :  { %3368 = vmatmul.f32.gmra.mxu2 %v5178_v7 }
 0x47e   :  { %3241 = vmatmul.f32.gmra.mxu0 %v6420_v57  ;;  %3306 = vmatmul.f32.gmra.mxu1 %v6482_v17  ;;  %v3048_v27 = vadd.f32 %v3047_v9, %v2983_v48  ;;  %v6488_v17 = vld [vmem:[#allocation42_spill] sm:$0xff] }
 0x47f   :  { %3864 = vmatpush.msrb.mxu2 %v3691_v26  ;;  %v6490_v48 = vld [vmem:[#allocation46_spill] sm:$0xff] }
 0x480   :  { %v3109_v43 = vpop.f32.mrf.mxu2  ;;  %3430 = vmatmul.f32.gmra.mxu3 %v6483_v6 }
 0x481   :  { %v3110_v41 = vadd.f32 %v3109_v43, %v3045_v30  ;;  %v3659_v30 = vld [vmem:[#allocation9 + $0x20] sm:$0xff] }
 0x482   :  { %v3707_v43 = vld [vmem:[#allocation9 + $0x1a0] sm:$0xff]  ;;  %3734 = vmatpush.msrb.mxu0 %v3659_v30 }
 0x483   :  { %v3171_v0 = vpop.f32.mrf.mxu3  ;;  %v2985_v7 = vpop.f32.mrf.mxu0  ;;  %3929 = vmatpush.msrb.mxu3 %v3707_v43 }
 0x484   :  { %v5682_v32 = vadd.f32 %v3171_v0, %v3107_v31  ;;  %v3050_v57 = vpop.f32.mrf.mxu1  ;;  %v2986_v52 = vadd.f32 %v2985_v7, %v5622_v25  ;;  %v3690_v0 = vld [vmem:[#allocation9 + $0x118] sm:$0xff] }
 0x485   :  { %3371 = vmatmul.f32.gmra.mxu2 %v5203_v19  ;;  %3930 = vmatpush.msrb.mxu3 %v3706_v60 }
 0x486   :  { %3244 = vmatmul.f32.gmra.mxu0 %v6484_v4  ;;  %3309 = vmatmul.f32.gmra.mxu1 %v6485_v3  ;;  %v3051_v9 = vadd.f32 %v3050_v57, %v2986_v52  ;;  %v3658_v57 = vld [vmem:[#allocation9 + $0x18] sm:$0xff]  ;;  %v3672_v52 = vld [vmem:[#allocation9 + $0x88] sm:$0xff] }
 0x487   :  { %3865 = vmatpush.msrb.mxu2 %v3690_v0  ;;  %3735 = vmatpush.msrb.mxu0 %v3658_v57 }
 0x488   :  { %v3112_v45 = vpop.f32.mrf.mxu2  ;;  %3433 = vmatmul.f32.gmra.mxu3 %v6486_v23 }
 0x489   :  { %v5688_v36 = vadd.f32 %v3112_v45, %v3048_v27  ;;  %v3657_v27 = vld [vmem:[#allocation9 + $0x10] sm:$0xff]  ;;  %3866 = vmatpush.msrb.mxu2 %v3689_v13 }
 0x48a   :  { %3736 = vmatpush.msrb.mxu0 %v3657_v27  ;;  %v5739_v27 = vstv %s4008_s7 }
 0x48b   :  { %v3174_v19 = vpop.f32.mrf.mxu3  ;;  %v2988_v31 = vpop.f32.mrf.mxu0 }
 0x48c   :  { %v5691_v42 = vadd.f32 %v3174_v19, %v3110_v41  ;;  %v3053_v50 = vpop.f32.mrf.mxu1  ;;  %v2989_v6 = vadd.f32 %v2988_v31, %v5622_v25  ;;  %3737 = vmatpush.msrb.mxu0 %v3656_v2  ;;  %v3671_v31 = vld [vmem:[#allocation9 + $0x80] sm:$0xff] }
 0x48d   :  { %3374 = vmatmul.f32.gmra.mxu2 %v5228_v33 }
 0x48e   :  { %3247 = vmatmul.f32.gmra.mxu0 %v6462_v8  ;;  %3312 = vmatmul.f32.gmra.mxu1 %v6487_v61  ;;  %v3054_v7 = vadd.f32 %v3053_v50, %v2989_v6  ;;  %v6491_v50 = vld [vmem:[#allocation47_spill] sm:$0xff] }
 0x490   :  { %v3115_v12 = vpop.f32.mrf.mxu2  ;;  %3436 = vmatmul.f32.gmra.mxu3 %v6488_v17  ;;  %v3688_v17 = vld [vmem:[#allocation9 + $0x108] sm:$0xff] }
 0x491   :  { %v5697_v54 = vadd.f32 %v3115_v12, %v3051_v9  ;;  %v3705_v12 = vld [vmem:[#allocation9 + $0x190] sm:$0xff]  ;;  %3867 = vmatpush.msrb.mxu2 %v3688_v17 }
 0x492   :  { %3931 = vmatpush.msrb.mxu3 %v3705_v12  ;;  %v6496_v12 = vld [vmem:[#allocation52_spill] sm:$0xff]  ;;  %v6497_v17 = vld [vmem:[#allocation57_spill] sm:$0xff] }
 0x493   :  { %v5700_v33 = vpop.f32.mrf.mxu3  ;;  %v2991_v41 = vpop.f32.mrf.mxu0  ;;  %vm3466_vm3 = vcmp.gt.f32.partialorder %v6496_v12, 0.0  ;;  %vm3467_vm4 = vcmp.gt.f32.partialorder %v6497_v17, 0.0 }
 0x494   :  { %v3056_v8 = vpop.f32.mrf.mxu1  ;;  %v2992_v45 = vadd.f32 %v2991_v41, %v5622_v25  ;;  %3932 = vmatpush.msrb.mxu3 %v3704_v15  ;;  %v5776_v15 = vperm.slane %v5619_v49, 3 }
 0x495   :  { %3377 = vmatmul.f32.gmra.mxu2 %v5253_v55  ;;  %v3673_v55 = vld [vmem:[#allocation9 + $0x90] sm:$0xff] }
 0x496   :  { %3250 = vmatmul.f32.gmra.mxu0 %v6489_v18  ;;  %3315 = vmatmul.f32.gmra.mxu1 %v6490_v48  ;;  %v3057_v61 = vadd.f32 %v3056_v8, %v2992_v45 }
 0x497   :  { %3801 = vmatpush.msrb.mxu1 %v3673_v55  ;;  %v6494_v55 = vld [vmem:[#allocation61_spill] sm:$0xff] }
 0x498   :  { %v3118_v4 = vpop.f32.mrf.mxu2  ;;  %3439 = vmatmul.f32.gmra.mxu3 %v6431_v53  ;;  %v3655_v53 = vld [vmem:[#allocation9] sm:$0xff]  ;;  %v3527_v45 = vmul.f32 %v5739_v27, %v6494_v55  ;;  %vm3462_vm0 = vcmp.gt.f32.partialorder %v6494_v55, 0.0 }
 0x499   :  { %v5706_v3 = vadd.f32 %v3118_v4, %v3054_v7  ;;  %3802 = vmatpush.msrb.mxu1 %v3672_v52  ;;  %3738 = vmatpush.msrb.mxu0 %v3655_v53 }
 0x49b   :  { %v5709_v23 = vpop.f32.mrf.mxu3  ;;  %v2994_v44 = vpop.f32.mrf.mxu0  ;;  %3803 = vmatpush.msrb.mxu1 %v3671_v31 }
 0x49c   :  { %v3059_v19 = vpop.f32.mrf.mxu1 }
 0x49d   :  { %3380 = vmatmul.f32.gmra.mxu2 %v5278_v1  ;;  %v2995_v1 = vadd.f32 %v2994_v44, %v5622_v25  ;;  %v6495_v44 = vld [vmem:[#allocation35_spill] sm:$0xff] }
 0x49e   :  { %3253 = vmatmul.f32.gmra.mxu0 %v6491_v50  ;;  %3318 = vmatmul.f32.gmra.mxu1 %v6433_v5  ;;  %v3687_v5 = vld [vmem:[#allocation9 + $0x100] sm:$0xff]  ;;  %v3528_v2 = vmul.f32 %v5739_v27, %v6495_v44  ;;  %vm3463_vm1 = vcmp.gt.f32.partialorder %v6495_v44, 0.0 }
 0x49f   :  { %3868 = vmatpush.msrb.mxu2 %v3687_v5 }
 0x4a0   :  { %v3121_v26 = vpop.f32.mrf.mxu2  ;;  %3442 = vmatmul.f32.gmra.mxu3 %v5294_v16  ;;  %v3060_v16 = vadd.f32 %v3059_v19, %v2995_v1  ;;  %v3592_v50 = vsel %vm3463_vm1, %v6495_v44, %v3528_v2  ;;  %v3532_v1 = vmul.f32 %v5739_v27, %v6497_v17  ;;  %v6501_v44 = vld [vmem:[#allocation44_spill] sm:$0xff] }
 0x4a1   :  { %v5715_v9 = vadd.f32 %v3121_v26, %v3057_v61  ;;  %v3529_v61 = vmul.f32 %v5739_v27, %v5640_v11  ;;  %vm3475_vm10 = vcmp.gt.f32.partialorder %v6501_v44, 0.0 }
 0x4a3   :  { %v5718_v30 = vpop.f32.mrf.mxu3  ;;  %v2997_v43 = vpop.f32.mrf.mxu0 }
 0x4a4   :  { %v3062_v6 = vpop.f32.mrf.mxu1  ;;  %v2998_v18 = vadd.f32 %v2997_v43, %v5622_v25 }
 0x4a5   :  { %3383 = vmatmul.f32.gmra.mxu2 %v5307_v56 }
 0x4a6   :  { %3256 = vmatmul.f32.gmra.mxu0 %v5312_v20  ;;  %3321 = vmatmul.f32.gmra.mxu1 %v6435_v47  ;;  %v3063_v56 = vadd.f32 %v3062_v6, %v2998_v18 }
 0x4a8   :  { %v3124_v41 = vpop.f32.mrf.mxu2  ;;  %3445 = vmatmul.f32.gmra.mxu3 %v6471_v35  ;;  %v3703_v35 = vld [vmem:[#allocation9 + $0x180] sm:$0xff] }
 0x4a9   :  { %v5724_v8 = vadd.f32 %v3124_v41, %v3060_v16  ;;  %3933 = vmatpush.msrb.mxu3 %v3703_v35  ;;  %v3596_v41 = vsel %vm3467_vm4, %v6497_v17, %v3532_v1  ;;  %vm3484_vm4 = vcmp.gt.f32.partialorder %v5675_v14, 0.0 }
 0x4ab   :  { %v5727_v48 = vpop.f32.mrf.mxu3  ;;  %v3000_v0 = vpop.f32.mrf.mxu0 }
 0x4ac   :  { %v3065_v7 = vpop.f32.mrf.mxu1  ;;  %v3001_v57 = vadd.f32 %v3000_v0, %v5622_v25  ;;  %v3533_v0 = vmul.f32 %v5739_v27, %v5647_v37 }
 0x4ad   :  { %3386 = vmatmul.f32.gmra.mxu2 %v5332_v24  ;;  %v6492_v24 = vld [vmem:[#allocation60_spill] sm:$0xff] }
 0x4ae   :  { %3259 = vmatmul.f32.gmra.mxu0 %v6473_v21  ;;  %3324 = vmatmul.f32.gmra.mxu1 %v6474_v58  ;;  %v6493_v21 = vld [vmem:[#allocation51_spill] sm:$0xff]  ;;  %v3066_v58 = vadd.f32 %v3065_v7, %v3001_v57  ;;  %v6498_v7 = vld [vmem:[#allocation62_spill] sm:$0xff] }
 0x4af   :  { %vm3470_vm6 = vcmp.gt.f32.partialorder %v6498_v7, 0.0 }
 0x4b0   :  { %v3127_v20 = vpop.f32.mrf.mxu2  ;;  %3448 = vmatmul.f32.gmra.mxu3 %v6439_v29 }
 0x4b1   :  { %v5733_v47 = vadd.f32 %v3127_v20, %v3063_v56  ;;  %v6499_v56 = vld [vmem:[#allocation39_spill] sm:$0xff] }
 0x4b2   :  { %v3536_v20 = vmul.f32 %v5739_v27, %v6499_v56  ;;  %vm3471_vm7 = vcmp.gt.f32.partialorder %v6499_v56, 0.0 }
 0x4b3   :  { %v5736_v40 = vpop.f32.mrf.mxu3  ;;  %v3003_v4 = vpop.f32.mrf.mxu0 }
 0x4b4   :  { %v3068_v60 = vpop.f32.mrf.mxu1  ;;  %v3004_v19 = vadd.f32 %v3003_v4, %v5622_v25  ;;  %v3597_v4 = vsel %vm3468_vm5, %v5647_v37, %v3533_v0  ;;  %v3540_v37 = vmul.f32 %v5739_v27, %v6501_v44 }
 0x4b5   :  { %3389 = vmatmul.f32.gmra.mxu2 %v6492_v24  ;;  %v3600_v24 = vsel %vm3471_vm7, %v6499_v56, %v3536_v20 }
 0x4b6   :  { %3262 = vmatmul.f32.gmra.mxu0 %v6493_v21  ;;  %3327 = vmatmul.f32.gmra.mxu1 %v5365_v46  ;;  %v3069_v13 = vadd.f32 %v3068_v60, %v3004_v19 }
 0x4b8   :  { %v3130_v29 = vpop.f32.mrf.mxu2  ;;  %3451 = vmatmul.f32.gmra.mxu3 %v5369_v63  ;;  %v3591_v63 = vsel %vm3462_vm0, %v6494_v55, %v3527_v45  ;;  %v6500_v55 = vld [vmem:[#allocation53_spill] sm:$0xff]  ;;  %vm3480_vm0 = vcmp.gt.f32.partialorder %v5668_v62, 0.0 }
 0x4b9   :  { %v5748_v52 = vadd.f32 %v3130_v29, %v3066_v58  ;;  %v3537_v29 = vmul.f32 %v5739_v27, %v5654_v59  ;;  %v3539_v45 = vmul.f32 %v5739_v27, %v6500_v55  ;;  %vm3474_vm9 = vcmp.gt.f32.partialorder %v6500_v55, 0.0 }
 0x4bb   :  { %v5753_v53 = vpop.f32.mrf.mxu3  ;;  %v3218_v46 = vpop.f32.mrf.mxu0 }
 0x4bc   :  { %v3283_v31 = vpop.f32.mrf.mxu1 }
 0x4bd   :  { %3392 = vmatmul.f32.gmra.mxu2 %v5379_v22  ;;  %v3531_v22 = vmul.f32 %v5739_v27, %v6496_v12 }
 0x4be   :  { %3739 = vmatmul.f32.vlgmr.msrb.gmra.mxu0 %v3591_v63  ;;  %3804 = vmatmul.f32.vlgmr.msrb.gmra.mxu1 %v3592_v50 }
 0x4bf   :  { %v3595_v16 = vsel %vm3466_vm3, %v6496_v12, %v3531_v22 }
 0x4c0   :  { %v3133_v26 = vpop.f32.mrf.mxu2  ;;  %3454 = vmatmul.f32.gmra.mxu3 %v5388_v51  ;;  %v3593_v51 = vsel %vm3464_vm2, %v5640_v11, %v3529_v61  ;;  %v3535_v11 = vmul.f32 %v5739_v27, %v6498_v7  ;;  %v3603_v61 = vsel %vm3474_vm9, %v6500_v55, %v3539_v45  ;;  %v6505_v55 = vld [vmem:[#allocation24_spill] sm:$0xff] }
 0x4c1   :  { %v5762_v25 = vadd.f32 %v3133_v26, %v3069_v13  ;;  %v3601_v13 = vsel %vm3472_vm8, %v5654_v59, %v3537_v29  ;;  %v3604_v26 = vsel %vm3475_vm10, %v6501_v44, %v3540_v37  ;;  %v6502_v59 = vld [vmem:[#allocation63_spill] sm:$0xff]  ;;  %v3548_v45 = vmul.f32 %v5739_v27, %v6505_v55 }
 0x4c2   :  { %v3599_v60 = vsel %vm3470_vm6, %v6498_v7, %v3535_v11  ;;  %vm3478_vm13 = vcmp.gt.f32.partialorder %v6502_v59, 0.0  ;;  %vm3483_vm2 = vcmp.gt.f32.partialorder %v6505_v55, 0.0  ;;  %vm3488_vm8 = vcmp.gt.f32.partialorder %v5682_v32, 0.0 }
 0x4c3   :  { %v5770_v43 = vpop.f32.mrf.mxu3  ;;  %v3221_v5 = vpop.f32.mrf.mxu0 }
 0x4c4   :  { %v3286_v6 = vpop.f32.mrf.mxu1 }
 0x4c5   :  { %3869 = vmatmul.f32.vlgmr.msrb.gmra.mxu2 %v3593_v51  ;;  %v3543_v51 = vmul.f32 %v5739_v27, %v6502_v59 }
 0x4c6   :  { %3742 = vmatmul.f32.gmra.mxu0 %v3595_v16  ;;  %3807 = vmatmul.f32.gmra.mxu1 %v3596_v41  ;;  %v6503_v16 = vld [vmem:[#allocation23_spill] sm:$0xff] }
 0x4c7   :  { %v3544_v41 = vmul.f32 %v5739_v27, %v6503_v16  ;;  %vm3479_vm14 = vcmp.gt.f32.partialorder %v6503_v16, 0.0 }
 0x4c8   :  { %v3348_v18 = vpop.f32.mrf.mxu2  ;;  %3457 = vmatmul.f32.gmra.mxu3 %v5396_v38  ;;  %v3219_v38 = vadd.f32 %v3218_v46, %v5776_v15 }
 0x4ca   :  { %v3284_v21 = vadd.f32 %v3283_v31, %v3219_v38  ;;  %v3222_v31 = vadd.f32 %v3221_v5, %v5776_v15  ;;  %v3541_v5 = vmul.f32 %v5739_v27, %v5661_v39  ;;  %v3607_v38 = vsel %vm3478_vm13, %v6502_v59, %v3543_v51 }
 0x4cb   :  { %v5788_v49 = vpop.f32.mrf.mxu3  ;;  %v3224_v35 = vpop.f32.mrf.mxu0 }
 0x4cc   :  { %v3289_v57 = vpop.f32.mrf.mxu1  ;;  %v3349_v2 = vadd.f32 %v3348_v18, %v3284_v21  ;;  %v3287_v22 = vadd.f32 %v3286_v6, %v3222_v31  ;;  %v3225_v7 = vadd.f32 %v3224_v35, %v5776_v15  ;;  %v3605_v20 = vsel %vm3476_vm12, %v5661_v39, %v3541_v5  ;;  %v6504_v39 = vld [vmem:[#allocation54_spill] sm:$0xff]  ;;  %v6507_v5 = vld [vmem:[#allocation28_spill] sm:$0xff] }
 0x4cd   :  { %3872 = vmatmul.f32.gmra.mxu2 %v3597_v4  ;;  %v3608_v4 = vsel %vm3479_vm14, %v6503_v16, %v3544_v41  ;;  %v3545_v35 = vmul.f32 %v5739_v27, %v5668_v62  ;;  %v3547_v29 = vmul.f32 %v5739_v27, %v6504_v39  ;;  %vm3482_vm1 = vcmp.gt.f32.partialorder %v6504_v39, 0.0 }
 0x4ce   :  { %3745 = vmatmul.f32.gmra.mxu0 %v3599_v60  ;;  %3810 = vmatmul.f32.gmra.mxu1 %v3600_v24  ;;  %v3290_v24 = vadd.f32 %v3289_v57, %v3225_v7  ;;  %v3552_v59 = vmul.f32 %v5739_v27, %v6507_v5  ;;  %vm3487_vm6 = vcmp.gt.f32.partialorder %v6507_v5, 0.0  ;;  %vm3492_vm12 = vcmp.gt.f32.partialorder %v5691_v42, 0.0 }
 0x4d0   :  { %v3351_v58 = vpop.f32.mrf.mxu2 }
 0x4d1   :  { %v3352_v18 = vadd.f32 %v3351_v58, %v3287_v22 }
 0x4d3   :  { %v3413_v19 = vpop.f32.mrf.mxu3  ;;  %v3227_v46 = vpop.f32.mrf.mxu0 }
 0x4d4   :  { %v3414_v63 = vadd.f32 %v3413_v19, %v3349_v2  ;;  %v3292_v50 = vpop.f32.mrf.mxu1  ;;  %v3228_v2 = vadd.f32 %v3227_v46, %v5776_v15  ;;  %v3549_v46 = vmul.f32 %v5739_v27, %v5675_v14 }
 0x4d5   :  { %3875 = vmatmul.f32.gmra.mxu2 %v3601_v13  ;;  %v3611_v13 = vsel %vm3482_vm1, %v6504_v39, %v3547_v29 }
 0x4d6   :  { %vm3465_vm11 = vcmp.gt.f32.partialorder %v3414_v63, 0.0  ;;  %v3530_v12 = vmul.f32 %v5739_v27, %v3414_v63  ;;  %3748 = vmatmul.f32.gmra.mxu0 %v3603_v61  ;;  %3813 = vmatmul.f32.gmra.mxu1 %v3604_v26  ;;  %v3612_v61 = vsel %vm3483_vm2, %v6505_v55, %v3548_v45  ;;  %v3613_v7 = vsel %vm3484_vm4, %v5675_v14, %v3549_v46  ;;  %v6508_v14 = vld [vmem:[#allocation55_spill] sm:$0xff] }
 0x4d7   :  { %vm3490_vm9 = vcmp.gt.f32.partialorder %v6508_v14, 0.0 }
 0x4d8   :  { %v3354_v17 = vpop.f32.mrf.mxu2  ;;  %v3594_v1 = vsel %vm3465_vm11, %v3414_v63, %v3530_v12  ;;  %v3609_v63 = vsel %vm3480_vm0, %v5668_v62, %v3545_v35  ;;  %v3293_v12 = vadd.f32 %v3292_v50, %v3228_v2  ;;  %v6506_v62 = vld [vmem:[#allocation64_spill] sm:$0xff] }
 0x4d9   :  { %3934 = vmatmul.f32.vlgmr.msrb.gmra.mxu3 %v3594_v1  ;;  %v3355_v44 = vadd.f32 %v3354_v17, %v3290_v24  ;;  %v3551_v1 = vmul.f32 %v5739_v27, %v6506_v62  ;;  %vm3486_vm5 = vcmp.gt.f32.partialorder %v6506_v62, 0.0 }
 0x4db   :  { %v3416_v6 = vpop.f32.mrf.mxu3  ;;  %v3230_v0 = vpop.f32.mrf.mxu0 }
 0x4dc   :  { %v3417_v11 = vadd.f32 %v3416_v6, %v3352_v18  ;;  %v3295_v56 = vpop.f32.mrf.mxu1  ;;  %v3231_v41 = vadd.f32 %v3230_v0, %v5776_v15  ;;  %v3553_v0 = vmul.f32 %v5739_v27, %v5682_v32 }
 0x4dd   :  { %3878 = vmatmul.f32.gmra.mxu2 %v3605_v20  ;;  %v3616_v20 = vsel %vm3487_vm6, %v6507_v5, %v3552_v59 }
 0x4de   :  { %3751 = vmatmul.f32.gmra.mxu0 %v3607_v38  ;;  %3816 = vmatmul.f32.gmra.mxu1 %v3608_v4  ;;  %vm3469_vm15 = vcmp.gt.f32.partialorder %v3417_v11, 0.0  ;;  %v3534_v60 = vmul.f32 %v5739_v27, %v3417_v11  ;;  %v3296_v4 = vadd.f32 %v3295_v56, %v3231_v41 }
 0x4e0   :  { %v3357_v21 = vpop.f32.mrf.mxu2  ;;  %v3598_v58 = vsel %vm3469_vm15, %v3417_v11, %v3534_v60  ;;  %v3615_v11 = vsel %vm3486_vm5, %v6506_v62, %v3551_v1  ;;  %v3178_v1 = vadd.f32 %v5700_v33, %v5688_v36  ;;  %v6512_v33 = vld [vmem:[#allocation25_spill] sm:$0xff] }
 0x4e1   :  { %3937 = vmatmul.f32.gmra.mxu3 %v3598_v58  ;;  %v3358_v51 = vadd.f32 %v3357_v21, %v3293_v12  ;;  %v3555_v21 = vmul.f32 %v5739_v27, %v6508_v14  ;;  %v6509_v58 = vld [vmem:[#allocation17_spill] sm:$0xff]  ;;  %vm3498_vm1 = vcmp.gt.f32.partialorder %v6512_v33, 0.0 }
 0x4e2   :  { %v3556_v35 = vmul.f32 %v5739_v27, %v6509_v58  ;;  %vm3491_vm10 = vcmp.gt.f32.partialorder %v6509_v58, 0.0  ;;  %v3561_v36 = vmul.f32 %v5739_v27, %v3178_v1  ;;  %vm3496_vm0 = vcmp.gt.f32.partialorder %v3178_v1, 0.0 }
 0x4e3   :  { %v3419_v57 = vpop.f32.mrf.mxu3  ;;  %v3233_v37 = vpop.f32.mrf.mxu0  ;;  %v3619_v2 = vsel %vm3490_vm9, %v6508_v14, %v3555_v21 }
 0x4e4   :  { %v3420_v19 = vadd.f32 %v3419_v57, %v3355_v44  ;;  %v3298_v31 = vpop.f32.mrf.mxu1  ;;  %v3234_v55 = vadd.f32 %v3233_v37, %v5776_v15  ;;  %v3617_v57 = vsel %vm3488_vm8, %v5682_v32, %v3553_v0  ;;  %v3557_v37 = vmul.f32 %v5739_v27, %v5691_v42  ;;  %v6510_v32 = vld [vmem:[#allocation22_spill] sm:$0xff] }
 0x4e5   :  { %3881 = vmatmul.f32.gmra.mxu2 %v3609_v63  ;;  %v3559_v12 = vmul.f32 %v5739_v27, %v6510_v32  ;;  %vm3494_vm13 = vcmp.gt.f32.partialorder %v6510_v32, 0.0 }
 0x4e6   :  { %3754 = vmatmul.f32.gmra.mxu0 %v3611_v13  ;;  %3819 = vmatmul.f32.gmra.mxu1 %v3612_v61  ;;  %vm3473_vm3 = vcmp.gt.f32.partialorder %v3420_v19, 0.0  ;;  %v3538_v26 = vmul.f32 %v5739_v27, %v3420_v19  ;;  %v3299_v13 = vadd.f32 %v3298_v31, %v3234_v55 }
 0x4e7   :  { %v3623_v41 = vsel %vm3494_vm13, %v6510_v32, %v3559_v12 }
 0x4e8   :  { %v3360_v22 = vpop.f32.mrf.mxu2  ;;  %v3602_v17 = vsel %vm3473_vm3, %v3420_v19, %v3538_v26  ;;  %v3620_v19 = vsel %vm3491_vm10, %v6509_v58, %v3556_v35  ;;  %v3625_v35 = vsel %vm3496_vm0, %v3178_v1, %v3561_v36 }
 0x4e9   :  { %3940 = vmatmul.f32.gmra.mxu3 %v3602_v17  ;;  %v3361_v39 = vadd.f32 %v3360_v22, %v3296_v4  ;;  %v6511_v22 = vld [vmem:[#allocation18_spill] sm:$0xff] }
 0x4ea   :  { %v3560_v17 = vmul.f32 %v5739_v27, %v6511_v22  ;;  %vm3495_vm14 = vcmp.gt.f32.partialorder %v6511_v22, 0.0 }
 0x4eb   :  { %v3422_v50 = vpop.f32.mrf.mxu3  ;;  %v3236_v16 = vpop.f32.mrf.mxu0 }
 0x4ec   :  { %v3423_v18 = vadd.f32 %v3422_v50, %v3358_v51  ;;  %v3301_v6 = vpop.f32.mrf.mxu1  ;;  %v3237_v5 = vadd.f32 %v3236_v16, %v5776_v15  ;;  %v3621_v50 = vsel %vm3492_vm12, %v5691_v42, %v3557_v37  ;;  %v3563_v42 = vmul.f32 %v5739_v27, %v6512_v33  ;;  %v6513_v16 = vld [vmem:[#allocation48_spill] sm:$0xff] }
 0x4ed   :  { %3884 = vmatmul.f32.gmra.mxu2 %v3613_v7  ;;  %v3564_v4 = vmul.f32 %v5739_v27, %v6513_v16  ;;  %vm3499_vm2 = vcmp.gt.f32.partialorder %v6513_v16, 0.0 }
 0x4ee   :  { %3757 = vmatmul.f32.gmra.mxu0 %v3615_v11  ;;  %3822 = vmatmul.f32.gmra.mxu1 %v3616_v20  ;;  %vm3477_vm7 = vcmp.gt.f32.partialorder %v3423_v18, 0.0  ;;  %v3542_v38 = vmul.f32 %v5739_v27, %v3423_v18  ;;  %v3302_v11 = vadd.f32 %v3301_v6, %v3237_v5  ;;  %v3181_v6 = vadd.f32 %v5709_v23, %v5697_v54  ;;  %v6514_v23 = vld [vmem:[#allocation65_spill] sm:$0xff] }
 0x4ef   :  { %vm3502_vm5 = vcmp.gt.f32.partialorder %v6514_v23, 0.0 }
 0x4f0   :  { %v3363_v60 = vpop.f32.mrf.mxu2  ;;  %v3606_v24 = vsel %vm3477_vm7, %v3423_v18, %v3542_v38  ;;  %v3624_v18 = vsel %vm3495_vm14, %v6511_v22, %v3560_v17  ;;  %v3565_v54 = vmul.f32 %v5739_v27, %v3181_v6  ;;  %vm3500_vm4 = vcmp.gt.f32.partialorder %v3181_v6, 0.0 }
 0x4f1   :  { %3943 = vmatmul.f32.gmra.mxu3 %v3606_v24  ;;  %v3364_v46 = vadd.f32 %v3363_v60, %v3299_v13 }
 0x4f2   :  { %v3629_v22 = vsel %vm3500_vm4, %v3181_v6, %v3565_v54 }
 0x4f3   :  { %v3425_v56 = vpop.f32.mrf.mxu3  ;;  %v3239_v29 = vpop.f32.mrf.mxu0 }
 0x4f4   :  { %v3426_v45 = vadd.f32 %v3425_v56, %v3361_v39  ;;  %v3304_v44 = vpop.f32.mrf.mxu1  ;;  %v3240_v14 = vadd.f32 %v3239_v29, %v5776_v15  ;;  %v3627_v39 = vsel %vm3498_vm1, %v6512_v33, %v3563_v42  ;;  %v3628_v56 = vsel %vm3499_vm2, %v6513_v16, %v3564_v4 }
 0x4f5   :  { %3887 = vmatmul.f32.gmra.mxu2 %v3617_v57  ;;  %v3567_v29 = vmul.f32 %v5739_v27, %v6514_v23  ;;  %vm3515_vm2 = vcmp.gt.f32.partialorder %v5611_v28, 0.0 }
 0x4f6   :  { %3760 = vmatmul.f32.gmra.mxu0 %v3619_v2  ;;  %3825 = vmatmul.f32.gmra.mxu1 %v3620_v19  ;;  %vm3481_vm11 = vcmp.gt.f32.partialorder %v3426_v45, 0.0  ;;  %v3546_v63 = vmul.f32 %v5739_v27, %v3426_v45  ;;  %v6515_v19 = vld [vmem:[#allocation50_spill] sm:$0xff] }
 0x4f7   :  { %vm3503_vm6 = vcmp.gt.f32.partialorder %v6515_v19, 0.0  ;;  %v3631_v17 = vsel %vm3502_vm5, %v6514_v23, %v3567_v29 }
 0x4f8   :  { %v3366_v61 = vpop.f32.mrf.mxu2  ;;  %v3610_v26 = vsel %vm3481_vm11, %v3426_v45, %v3546_v63  ;;  %v3305_v45 = vadd.f32 %v3304_v44, %v3240_v14  ;;  %v3568_v63 = vmul.f32 %v5739_v27, %v6515_v19  ;;  %v3184_v44 = vadd.f32 %v5718_v30, %v5706_v3  ;;  %v6516_v30 = vld [vmem:[#allocation56_spill] sm:$0xff]  ;;  %v6519_v14 = vld [vmem:[#allocation19_spill] sm:$0xff] }
 0x4f9   :  { %3946 = vmatmul.f32.gmra.mxu3 %v3610_v26  ;;  %v3367_v60 = vadd.f32 %v3366_v61, %v3302_v11  ;;  %vm3506_vm9 = vcmp.gt.f32.partialorder %v6516_v30, 0.0  ;;  %vm3511_vm14 = vcmp.gt.f32.partialorder %v6519_v14, 0.0 }
 0x4fa   :  { %v3569_v3 = vmul.f32 %v5739_v27, %v3184_v44  ;;  %vm3504_vm8 = vcmp.gt.f32.partialorder %v3184_v44, 0.0 }
 0x4fb   :  { %v3428_v31 = vpop.f32.mrf.mxu3  ;;  %v3242_v62 = vpop.f32.mrf.mxu0 }
 0x4fc   :  { %v3429_v59 = vadd.f32 %v3428_v31, %v3364_v46  ;;  %v3307_v51 = vpop.f32.mrf.mxu1  ;;  %v3243_v37 = vadd.f32 %v3242_v62, %v5776_v15  ;;  %v3632_v46 = vsel %vm3503_vm6, %v6515_v19, %v3568_v63  ;;  %v3571_v62 = vmul.f32 %v5739_v27, %v6516_v30 }
 0x4fd   :  { %3890 = vmatmul.f32.gmra.mxu2 %v3621_v50  ;;  %v6517_v50 = vld [vmem:[#allocation45_spill] sm:$0xff]  ;;  %v3633_v33 = vsel %vm3504_vm8, %v3184_v44, %v3569_v3  ;;  %vm3519_vm6 = vcmp.gt.f32.partialorder %v5626_v10, 0.0 }
 0x4fe   :  { %3763 = vmatmul.f32.gmra.mxu0 %v3623_v41  ;;  %3828 = vmatmul.f32.gmra.mxu1 %v3624_v18  ;;  %vm3485_vm15 = vcmp.gt.f32.partialorder %v3429_v59, 0.0  ;;  %v3550_v7 = vmul.f32 %v5739_v27, %v3429_v59  ;;  %v3308_v1 = vadd.f32 %v3307_v51, %v3243_v37  ;;  %v3572_v41 = vmul.f32 %v5739_v27, %v6517_v50 }
 0x4ff   :  { %vm3507_vm10 = vcmp.gt.f32.partialorder %v6517_v50, 0.0  ;;  %v3187_v51 = vadd.f32 %v5727_v48, %v5715_v9  ;;  %v3635_v42 = vsel %vm3506_vm9, %v6516_v30, %v3571_v62  ;;  %v6518_v48 = vld [vmem:[#allocation29_spill] sm:$0xff] }
 0x500   :  { %v3369_v20 = vpop.f32.mrf.mxu2  ;;  %v3614_v38 = vsel %vm3485_vm15, %v3429_v59, %v3550_v7  ;;  %v3636_v16 = vsel %vm3507_vm10, %v6517_v50, %v3572_v41  ;;  %vm3510_vm13 = vcmp.gt.f32.partialorder %v6518_v48, 0.0  ;;  %v3584_v41 = vmul.f32 %v5739_v27, %v5626_v10 }
 0x501   :  { %3949 = vmatmul.f32.gmra.mxu3 %v3614_v38  ;;  %v3370_v13 = vadd.f32 %v3369_v20, %v3305_v45  ;;  %v3573_v9 = vmul.f32 %v5739_v27, %v3187_v51  ;;  %vm3508_vm12 = vcmp.gt.f32.partialorder %v3187_v51, 0.0  ;;  %vm3523_vm10 = vcmp.gt.f32.partialorder %v5633_v34, 0.0 }
 0x503   :  { %v3431_v24 = vpop.f32.mrf.mxu3  ;;  %v3245_v0 = vpop.f32.mrf.mxu0 }
 0x504   :  { %v3432_v21 = vadd.f32 %v3431_v24, %v3367_v60  ;;  %v3310_v58 = vpop.f32.mrf.mxu1  ;;  %v3246_v20 = vadd.f32 %v3245_v0, %v5776_v15  ;;  %v3575_v0 = vmul.f32 %v5739_v27, %v6518_v48 }
 0x505   :  { %3893 = vmatmul.f32.gmra.mxu2 %v3625_v35 }
 0x506   :  { %3766 = vmatmul.f32.gmra.mxu0 %v3627_v39  ;;  %3831 = vmatmul.f32.gmra.mxu1 %v3628_v56  ;;  %vm3489_vm3 = vcmp.gt.f32.partialorder %v3432_v21, 0.0  ;;  %v3554_v55 = vmul.f32 %v5739_v27, %v3432_v21  ;;  %v3311_v60 = vadd.f32 %v3310_v58, %v3246_v20  ;;  %v3190_v58 = vadd.f32 %v5736_v40, %v5724_v8  ;;  %v6520_v40 = vld [vmem:[#allocation33_spill] sm:$0xff] }
 0x507   :  { %v3639_v54 = vsel %vm3510_vm13, %v6518_v48, %v3575_v0  ;;  %vm3514_vm1 = vcmp.gt.f32.partialorder %v6520_v40, 0.0 }
 0x508   :  { %v3372_v57 = vpop.f32.mrf.mxu2  ;;  %v3618_v2 = vsel %vm3489_vm3, %v3432_v21, %v3554_v55  ;;  %v3576_v21 = vmul.f32 %v5739_v27, %v6519_v14  ;;  %v3577_v8 = vmul.f32 %v5739_v27, %v3190_v58  ;;  %vm3512_vm0 = vcmp.gt.f32.partialorder %v3190_v58, 0.0 }
 0x509   :  { %3952 = vmatmul.f32.gmra.mxu3 %v3618_v2  ;;  %v3373_v18 = vadd.f32 %v3372_v57, %v3308_v1  ;;  %v3637_v2 = vsel %vm3508_vm12, %v3187_v51, %v3573_v9  ;;  %v3588_v9 = vmul.f32 %v5739_v27, %v5633_v34 }
 0x50a   :  { %v3640_v23 = vsel %vm3511_vm14, %v6519_v14, %v3576_v21  ;;  %v3199_v14 = vadd.f32 %v5788_v49, %v5762_v25 }
 0x50b   :  { %v3434_v61 = vpop.f32.mrf.mxu3  ;;  %v3248_v26 = vpop.f32.mrf.mxu0 }
 0x50c   :  { %v3435_v32 = vadd.f32 %v3434_v61, %v3370_v13  ;;  %v3313_v12 = vpop.f32.mrf.mxu1  ;;  %v3249_v55 = vadd.f32 %v3248_v26, %v5776_v15  ;;  %v3579_v61 = vmul.f32 %v5739_v27, %v6520_v40  ;;  %v3580_v26 = vmul.f32 %v5739_v27, %v5611_v28 }
 0x50d   :  { %3896 = vmatmul.f32.gmra.mxu2 %v3629_v22  ;;  %v3589_v25 = vmul.f32 %v5739_v27, %v3199_v14  ;;  %vm3524_vm12 = vcmp.gt.f32.partialorder %v3199_v14, 0.0 }
 0x50e   :  { %3769 = vmatmul.f32.gmra.mxu0 %v3631_v17  ;;  %3834 = vmatmul.f32.gmra.mxu1 %v3632_v46  ;;  %vm3493_vm7 = vcmp.gt.f32.partialorder %v3435_v32, 0.0  ;;  %v3558_v31 = vmul.f32 %v5739_v27, %v3435_v32  ;;  %v3314_v19 = vadd.f32 %v3313_v12, %v3249_v55  ;;  %v3193_v12 = vadd.f32 %v5753_v53, %v5733_v47  ;;  %v6521_v53 = vld [vmem:[#allocation31_spill] sm:$0xff] }
 0x50f   :  { %v3643_v1 = vsel %vm3514_vm1, %v6520_v40, %v3579_v61  ;;  %v3583_v50 = vmul.f32 %v5739_v27, %v6521_v53  ;;  %vm3518_vm5 = vcmp.gt.f32.partialorder %v6521_v53, 0.0  ;;  %v3652_v55 = vsel %vm3523_vm10, %v5633_v34, %v3588_v9 }
 0x510   :  { %v3375_v5 = vpop.f32.mrf.mxu2  ;;  %v3622_v59 = vsel %vm3493_vm7, %v3435_v32, %v3558_v31  ;;  %v3641_v31 = vsel %vm3512_vm0, %v3190_v58, %v3577_v8  ;;  %v3581_v47 = vmul.f32 %v5739_v27, %v3193_v12  ;;  %vm3516_vm4 = vcmp.gt.f32.partialorder %v3193_v12, 0.0 }
 0x511   :  { %3955 = vmatmul.f32.gmra.mxu3 %v3622_v59  ;;  %v3376_v35 = vadd.f32 %v3375_v5, %v3311_v60  ;;  %v3644_v5 = vsel %vm3515_vm2, %v5611_v28, %v3580_v26  ;;  %v3653_v34 = vsel %vm3524_vm12, %v3199_v14, %v3589_v25 }
 0x513   :  { %v3437_v7 = vpop.f32.mrf.mxu3  ;;  %v3251_v11 = vpop.f32.mrf.mxu0 }
 0x514   :  { %v3438_v38 = vadd.f32 %v3437_v7, %v3373_v18  ;;  %v3316_v36 = vpop.f32.mrf.mxu1  ;;  %v3252_v22 = vadd.f32 %v3251_v11, %v5776_v15  ;;  %v3196_v11 = vadd.f32 %v5770_v43, %v5748_v52  ;;  %v6522_v43 = vld [vmem:[#allocation34_spill] sm:$0xff] }
 0x515   :  { %3899 = vmatmul.f32.gmra.mxu2 %v3633_v33  ;;  %v3647_v33 = vsel %vm3518_vm5, %v6521_v53, %v3583_v50  ;;  %vm3522_vm9 = vcmp.gt.f32.partialorder %v6522_v43, 0.0 }
 0x516   :  { %v3562_v4 = vmul.f32 %v5739_v27, %v3438_v38  ;;  %3772 = vmatmul.f32.gmra.mxu0 %v3635_v42  ;;  %3837 = vmatmul.f32.gmra.mxu1 %v3636_v16  ;;  %vm3497_vm11 = vcmp.gt.f32.partialorder %v3438_v38, 0.0  ;;  %v3317_v3 = vadd.f32 %v3316_v36, %v3252_v22  ;;  %v3645_v36 = vsel %vm3516_vm4, %v3193_v12, %v3581_v47 }
 0x517   :  { %v3648_v42 = vsel %vm3519_vm6, %v5626_v10, %v3584_v41  ;;  %v3585_v52 = vmul.f32 %v5739_v27, %v3196_v11  ;;  %vm3520_vm8 = vcmp.gt.f32.partialorder %v3196_v11, 0.0 }
 0x518   :  { %v3378_v24 = vpop.f32.mrf.mxu2  ;;  %v3626_v6 = vsel %vm3497_vm11, %v3438_v38, %v3562_v4 }
 0x519   :  { %3958 = vmatmul.f32.gmra.mxu3 %v3626_v6  ;;  %v3379_v44 = vadd.f32 %v3378_v24, %v3314_v19  ;;  %v3587_v6 = vmul.f32 %v5739_v27, %v6522_v43 }
 0x51b   :  { %v3440_v39 = vpop.f32.mrf.mxu3  ;;  %v3254_v56 = vpop.f32.mrf.mxu0  ;;  %v3651_v58 = vsel %vm3522_vm9, %v6522_v43, %v3587_v6 }
 0x51c   :  { %v3441_v45 = vadd.f32 %v3440_v39, %v3376_v35  ;;  %v3319_v57 = vpop.f32.mrf.mxu1  ;;  %v3255_v51 = vadd.f32 %v3254_v56, %v5776_v15  ;;  %v3649_v56 = vsel %vm3520_vm8, %v3196_v11, %v3585_v52 }
 0x51d   :  { %3902 = vmatmul.f32.gmra.mxu2 %v3637_v2 }
 0x51e   :  { %v3566_v29 = vmul.f32 %v5739_v27, %v3441_v45  ;;  %3775 = vmatmul.f32.gmra.mxu0 %v3639_v54  ;;  %3840 = vmatmul.f32.gmra.mxu1 %v3640_v23  ;;  %vm3501_vm15 = vcmp.gt.f32.partialorder %v3441_v45, 0.0  ;;  %v3320_v4 = vadd.f32 %v3319_v57, %v3255_v51 }
 0x520   :  { %v3381_v63 = vpop.f32.mrf.mxu2  ;;  %v3630_v13 = vsel %vm3501_vm15, %v3441_v45, %v3566_v29 }
 0x521   :  { %3961 = vmatmul.f32.gmra.mxu3 %v3630_v13  ;;  %v3382_v18 = vadd.f32 %v3381_v63, %v3317_v3 }
 0x523   :  { %v3443_v37 = vpop.f32.mrf.mxu3  ;;  %v3257_v32 = vpop.f32.mrf.mxu0 }
 0x524   :  { %v3444_v17 = vadd.f32 %v3443_v37, %v3379_v44  ;;  %v3322_v46 = vpop.f32.mrf.mxu1  ;;  %v3258_v21 = vadd.f32 %v3257_v32, %v5776_v15 }
 0x525   :  { %3905 = vmatmul.f32.gmra.mxu2 %v3641_v31 }
 0x526   :  { %v3570_v59 = vmul.f32 %v5739_v27, %v3444_v17  ;;  %3778 = vmatmul.f32.gmra.mxu0 %v3643_v1  ;;  %3843 = vmatmul.f32.gmra.mxu1 %v3644_v5  ;;  %vm3505_vm3 = vcmp.gt.f32.partialorder %v3444_v17, 0.0  ;;  %v3323_v57 = vadd.f32 %v3322_v46, %v3258_v21 }
 0x528   :  { %v3384_v30 = vpop.f32.mrf.mxu2  ;;  %v3634_v62 = vsel %vm3505_vm3, %v3444_v17, %v3570_v59 }
 0x529   :  { %3964 = vmatmul.f32.gmra.mxu3 %v3634_v62  ;;  %v3385_v48 = vadd.f32 %v3384_v30, %v3320_v4 }
 0x52b   :  { %v3446_v28 = vpop.f32.mrf.mxu3  ;;  %v3260_v7 = vpop.f32.mrf.mxu0 }
 0x52c   :  { %v3447_v20 = vadd.f32 %v3446_v28, %v3382_v18  ;;  %v3325_v38 = vpop.f32.mrf.mxu1  ;;  %v3261_v19 = vadd.f32 %v3260_v7, %v5776_v15 }
 0x52d   :  { %3908 = vmatmul.f32.gmra.mxu2 %v3645_v36 }
 0x52e   :  { %v3574_v16 = vmul.f32 %v5739_v27, %v3447_v20  ;;  %3781 = vmatmul.f32.gmra.mxu0 %v3647_v33  ;;  %3846 = vmatmul.f32.gmra.mxu1 %v3648_v42  ;;  %vm3509_vm7 = vcmp.gt.f32.partialorder %v3447_v20, 0.0  ;;  %v3326_v40 = vadd.f32 %v3325_v38, %v3261_v19 }
 0x530   :  { %v3387_v60 = vpop.f32.mrf.mxu2  ;;  %v3638_v24 = vsel %vm3509_vm7, %v3447_v20, %v3574_v16 }
 0x531   :  { %3967 = vmatmul.f32.gmra.mxu3 %v3638_v24  ;;  %v3388_v49 = vadd.f32 %v3387_v60, %v3323_v57 }
 0x533   :  { %v3449_v10 = vpop.f32.mrf.mxu3  ;;  %v3263_v0 = vpop.f32.mrf.mxu0 }
 0x534   :  { %v3450_v35 = vadd.f32 %v3449_v10, %v3385_v48  ;;  %v3328_v39 = vpop.f32.mrf.mxu1  ;;  %v3264_v12 = vadd.f32 %v3263_v0, %v5776_v15  ;;  %v5980_v15 = vld [vmem:[%s6055_s9] ss:$0 sm:$0xff] }
 0x535   :  { %3911 = vmatmul.f32.gmra.mxu2 %v3649_v56 }
 0x536   :  { %v3578_v45 = vmul.f32 %v5739_v27, %v3450_v35  ;;  %3784 = vmatmul.f32.gmra.mxu0 %v3651_v58  ;;  %3849 = vmatmul.f32.gmra.mxu1 %v3652_v55  ;;  %vm3513_vm11 = vcmp.gt.f32.partialorder %v3450_v35, 0.0  ;;  %v3329_v31 = vadd.f32 %v3328_v39, %v3264_v12 }
 0x538   :  { %v3390_v2 = vpop.f32.mrf.mxu2  ;;  %v3642_v54 = vsel %vm3513_vm11, %v3450_v35, %v3578_v45 }
 0x539   :  { %3970 = vmatmul.f32.gmra.mxu3 %v3642_v54  ;;  %v3391_v44 = vadd.f32 %v3390_v2, %v3326_v40 }
 0x53b   :  { %v3452_v23 = vpop.f32.mrf.mxu3  ;;  %v3740_v29 = vpop.f32.mrf.mxu0 }
 0x53c   :  { %v3453_v63 = vadd.f32 %v3452_v23, %v3388_v49  ;;  %v3805_v13 = vpop.f32.mrf.mxu1  ;;  %v3741_v28 = vadd.f32 %v5980_v15, %v3740_v29 }
 0x53d   :  { %3914 = vmatmul.f32.gmra.mxu2 %v3653_v34 }
 0x53e   :  { %v3582_v8 = vmul.f32 %v5739_v27, %v3453_v63  ;;  %vm3517_vm13 = vcmp.gt.f32.partialorder %v3453_v63, 0.0  ;;  %v3806_v51 = vadd.f32 %v3805_v13, %v3741_v28 }
 0x540   :  { %v3393_v61 = vpop.f32.mrf.mxu2  ;;  %v3646_v26 = vsel %vm3517_vm13, %v3453_v63, %v3582_v8 }
 0x541   :  { %3973 = vmatmul.f32.gmra.mxu3 %v3646_v26  ;;  %v3394_v59 = vadd.f32 %v3393_v61, %v3329_v31 }
 0x543   :  { %v3455_v37 = vpop.f32.mrf.mxu3  ;;  %v3743_v32 = vpop.f32.mrf.mxu0 }
 0x544   :  { %v3456_v22 = vadd.f32 %v3455_v37, %v3391_v44  ;;  %v3808_v17 = vpop.f32.mrf.mxu1 }
 0x546   :  { %v3586_v46 = vmul.f32 %v5739_v27, %v3456_v22  ;;  %vm3521_vm14 = vcmp.gt.f32.partialorder %v3456_v22, 0.0 }
 0x548   :  { %v3870_v1 = vpop.f32.mrf.mxu2  ;;  %v3650_v5 = vsel %vm3521_vm14, %v3456_v22, %v3586_v46 }
 0x549   :  { %3976 = vmatmul.f32.gmra.mxu3 %v3650_v5  ;;  %v3871_v20 = vadd.f32 %v3870_v1, %v3806_v51 }
 0x54b   :  { %v3458_v3 = vpop.f32.mrf.mxu3  ;;  %v3746_v30 = vpop.f32.mrf.mxu0 }
 0x54c   :  { %v3459_v62 = vadd.f32 %v3458_v3, %v3394_v59  ;;  %v3811_v47 = vpop.f32.mrf.mxu1  ;;  %v3747_v52 = vadd.f32 %v5980_v15, %v3746_v30 }
 0x54e   :  { %v3590_v53 = vmul.f32 %v5739_v27, %v3459_v62  ;;  %vm3525_vm15 = vcmp.gt.f32.partialorder %v3459_v62, 0.0  ;;  %v3744_v27 = vadd.f32 %v5980_v15, %v3743_v32  ;;  %v3812_v48 = vadd.f32 %v3811_v47, %v3747_v52 }
 0x550   :  { %v3873_v50 = vpop.f32.mrf.mxu2  ;;  %v3654_v41 = vsel %vm3525_vm15, %v3459_v62, %v3590_v53  ;;  %v3809_v16 = vadd.f32 %v3808_v17, %v3744_v27 }
 0x551   :  { %3979 = vmatmul.f32.gmra.mxu3 %v3654_v41 }
 0x552   :  { %v3874_v60 = vadd.f32 %v3873_v50, %v3809_v16 }
 0x553   :  { %v3749_v18 = vpop.f32.mrf.mxu0 }
 0x554   :  { %v3814_v7 = vpop.f32.mrf.mxu1  ;;  %v3750_v21 = vadd.f32 %v5980_v15, %v3749_v18 }
 0x556   :  { %v3815_v58 = vadd.f32 %v3814_v7, %v3750_v21 }
 0x558   :  { %v3876_v11 = vpop.f32.mrf.mxu2 }
 0x559   :  { %v3877_v10 = vadd.f32 %v3876_v11, %v3812_v48 }
 0x55b   :  { %v3752_v38 = vpop.f32.mrf.mxu0 }
 0x55c   :  { %v3935_v36 = vpop.f32.mrf.mxu3  ;;  %v3817_v4 = vpop.f32.mrf.mxu1  ;;  %v3753_v57 = vadd.f32 %v5980_v15, %v3752_v38 }
 0x55d   :  { %v3936_v33 = vadd.f32 %v3935_v36, %v3871_v20 }
 0x55e   :  { %v3818_v49 = vadd.f32 %v3817_v4, %v3753_v57 }
 0x55f   :  { %3983 = vst [vmem:[%s6056_s10] sm:$0xff] %v3936_v33 }
 0x560   :  { %v3879_v42 = vpop.f32.mrf.mxu2 }
 0x561   :  { %v3880_v55 = vadd.f32 %v3879_v42, %v3815_v58 }
 0x563   :  { %v3755_v6 = vpop.f32.mrf.mxu0 }
 0x564   :  { %v3938_v24 = vpop.f32.mrf.mxu3  ;;  %v3820_v0 = vpop.f32.mrf.mxu1  ;;  %v3756_v63 = vadd.f32 %v5980_v15, %v3755_v6 }
 0x565   :  { %v3939_v43 = vadd.f32 %v3938_v24, %v3874_v60 }
 0x566   :  { %v3821_v40 = vadd.f32 %v3820_v0, %v3756_v63 }
 0x567   :  { %3984 = vst [vmem:[%s6056_s10 + $0x8] sm:$0xff] %v3939_v43 }
 0x568   :  { %v3882_v9 = vpop.f32.mrf.mxu2 }
 0x569   :  { %v3883_v29 = vadd.f32 %v3882_v9, %v3818_v49 }
 0x56b   :  { %v3758_v39 = vpop.f32.mrf.mxu0 }
 0x56c   :  { %v3941_v14 = vpop.f32.mrf.mxu3  ;;  %v3823_v2 = vpop.f32.mrf.mxu1  ;;  %v3759_v37 = vadd.f32 %v5980_v15, %v3758_v39 }
 0x56d   :  { %v3942_v35 = vadd.f32 %v3941_v14, %v3877_v10 }
 0x56e   :  { %v3824_v12 = vadd.f32 %v3823_v2, %v3759_v37 }
 0x56f   :  { %3985 = vst [vmem:[%s6056_s10 + $0x10] sm:$0xff] %v3942_v35 }
 0x570   :  { %v3885_v56 = vpop.f32.mrf.mxu2 }
 0x571   :  { %v3886_v61 = vadd.f32 %v3885_v56, %v3821_v40 }
 0x573   :  { %v3761_v23 = vpop.f32.mrf.mxu0 }
 0x574   :  { %v3944_v45 = vpop.f32.mrf.mxu3  ;;  %v3826_v34 = vpop.f32.mrf.mxu1  ;;  %v3762_v1 = vadd.f32 %v5980_v15, %v3761_v23 }
 0x575   :  { %v3945_v54 = vadd.f32 %v3944_v45, %v3880_v55 }
 0x576   :  { %v3827_v3 = vadd.f32 %v3826_v34, %v3762_v1 }
 0x577   :  { %3986 = vst [vmem:[%s6056_s10 + $0x18] sm:$0xff] %v3945_v54 }
 0x578   :  { %v3888_v25 = vpop.f32.mrf.mxu2 }
 0x579   :  { %v3889_v46 = vadd.f32 %v3888_v25, %v3824_v12 }
 0x57b   :  { %v3764_v26 = vpop.f32.mrf.mxu0 }
 0x57c   :  { %v3947_v19 = vpop.f32.mrf.mxu3  ;;  %v3829_v22 = vpop.f32.mrf.mxu1  ;;  %v3765_v50 = vadd.f32 %v5980_v15, %v3764_v26 }
 0x57d   :  { %v3948_v13 = vadd.f32 %v3947_v19, %v3883_v29 }
 0x57e   :  { %v3830_v28 = vadd.f32 %v3829_v22, %v3765_v50 }
 0x57f   :  { %3987 = vst [vmem:[%s6056_s10 + $0x20] sm:$0xff] %v3948_v13 }
 0x580   :  { %v3891_v8 = vpop.f32.mrf.mxu2 }
 0x581   :  { %v3892_v30 = vadd.f32 %v3891_v8, %v3827_v3 }
 0x583   :  { %v3767_v59 = vpop.f32.mrf.mxu0 }
 0x584   :  { %v3950_v44 = vpop.f32.mrf.mxu3  ;;  %v3832_v62 = vpop.f32.mrf.mxu1  ;;  %v3768_v51 = vadd.f32 %v5980_v15, %v3767_v59 }
 0x585   :  { %v3951_v32 = vadd.f32 %v3950_v44, %v3886_v61 }
 0x586   :  { %v3833_v27 = vadd.f32 %v3832_v62, %v3768_v51 }
 0x587   :  { %3988 = vst [vmem:[%s6056_s10 + $0x28] sm:$0xff] %v3951_v32 }
 0x588   :  { %v3894_v17 = vpop.f32.mrf.mxu2 }
 0x589   :  { %v3895_v7 = vadd.f32 %v3894_v17, %v3830_v28 }
 0x58b   :  { %v3770_v18 = vpop.f32.mrf.mxu0 }
 0x58c   :  { %v3953_v31 = vpop.f32.mrf.mxu3  ;;  %v3835_v20 = vpop.f32.mrf.mxu1  ;;  %v3771_v4 = vadd.f32 %v5980_v15, %v3770_v18 }
 0x58d   :  { %v3954_v5 = vadd.f32 %v3953_v31, %v3889_v46 }
 0x58e   :  { %v3836_v43 = vadd.f32 %v3835_v20, %v3771_v4 }
 0x58f   :  { %3989 = vst [vmem:[%s6056_s10 + $0x30] sm:$0xff] %v3954_v5 }
 0x590   :  { %v3897_v47 = vpop.f32.mrf.mxu2 }
 0x591   :  { %v3898_v42 = vadd.f32 %v3897_v47, %v3833_v27 }
 0x593   :  { %v3773_v33 = vpop.f32.mrf.mxu0 }
 0x594   :  { %v3956_v53 = vpop.f32.mrf.mxu3  ;;  %v3838_v24 = vpop.f32.mrf.mxu1  ;;  %v3774_v10 = vadd.f32 %v5980_v15, %v3773_v33 }
 0x595   :  { %v3957_v41 = vadd.f32 %v3956_v53, %v3892_v30 }
 0x596   :  { %v3839_v14 = vadd.f32 %v3838_v24, %v3774_v10 }
 0x597   :  { %3990 = vst [vmem:[%s6056_s10 + $0x38] sm:$0xff] %v3957_v41 }
 0x598   :  { %v3900_v36 = vpop.f32.mrf.mxu2 }
 0x599   :  { %v3901_v6 = vadd.f32 %v3900_v36, %v3836_v43 }
 0x59b   :  { %v3776_v9 = vpop.f32.mrf.mxu0 }
 0x59c   :  { %v3959_v11 = vpop.f32.mrf.mxu3  ;;  %v3841_v21 = vpop.f32.mrf.mxu1  ;;  %v3777_v58 = vadd.f32 %v5980_v15, %v3776_v9 }
 0x59d   :  { %v3960_v38 = vadd.f32 %v3959_v11, %v3895_v7 }
 0x59e   :  { %v3842_v57 = vadd.f32 %v3841_v21, %v3777_v58 }
 0x59f   :  { %3991 = vst [vmem:[%s6056_s10 + $0x40] sm:$0xff] %v3960_v38 }
 0x5a0   :  { %v3903_v52 = vpop.f32.mrf.mxu2 }
 0x5a1   :  { %v3904_v39 = vadd.f32 %v3903_v52, %v3839_v14 }
 0x5a3   :  { %v3779_v45 = vpop.f32.mrf.mxu0 }
 0x5a4   :  { %v3962_v16 = vpop.f32.mrf.mxu3  ;;  %v3844_v2 = vpop.f32.mrf.mxu1  ;;  %v3780_v23 = vadd.f32 %v5980_v15, %v3779_v45 }
 0x5a5   :  { %v3963_v60 = vadd.f32 %v3962_v16, %v3898_v42 }
 0x5a6   :  { %v3845_v63 = vadd.f32 %v3844_v2, %v3780_v23 }
 0x5a7   :  { %3992 = vst [vmem:[%s6056_s10 + $0x48] sm:$0xff] %v3963_v60 }
 0x5a8   :  { %v3906_v35 = vpop.f32.mrf.mxu2 }
 0x5a9   :  { %v3907_v54 = vadd.f32 %v3906_v35, %v3842_v57 }
 0x5ab   :  { %v3782_v19 = vpop.f32.mrf.mxu0 }
 0x5ac   :  { %v3965_v48 = vpop.f32.mrf.mxu3  ;;  %v3783_v8 = vadd.f32 %v5980_v15, %v3782_v19  ;;  %v3847_v61 = vpop.f32.mrf.mxu1 }
 0x5ad   :  { %v3966_v0 = vadd.f32 %v3965_v48, %v3901_v6 }
 0x5ae   :  { %v3848_v44 = vadd.f32 %v3847_v61, %v3783_v8 }
 0x5af   :  { %3993 = vst [vmem:[%s6056_s10 + $0x50] sm:$0xff] %v3966_v0 }
 0x5b0   :  { %v3909_v25 = vpop.f32.mrf.mxu2 }
 0x5b1   :  { %v3910_v13 = vadd.f32 %v3909_v25, %v3845_v63 }
 0x5b3   :  { %v3785_v37 = vpop.f32.mrf.mxu0 }
 0x5b4   :  { %v3968_v56 = vpop.f32.mrf.mxu3  ;;  %v3786_v22 = vadd.f32 %v5980_v15, %v3785_v37  ;;  %v3850_v46 = vpop.f32.mrf.mxu1 }
 0x5b5   :  { %v3969_v55 = vadd.f32 %v3968_v56, %v3904_v39 }
 0x5b6   :  { %v3851_v1 = vadd.f32 %v3850_v46, %v3786_v22 }
 0x5b7   :  { %3994 = vst [vmem:[%s6056_s10 + $0x58] sm:$0xff] %v3969_v55 }
 0x5b8   :  { %v3912_v26 = vpop.f32.mrf.mxu2 }
 0x5b9   :  { %v3913_v32 = vadd.f32 %v3912_v26, %v3848_v44 }
 0x5bc   :  { %v3971_v49 = vpop.f32.mrf.mxu3 }
 0x5bd   :  { %v3972_v29 = vadd.f32 %v3971_v49, %v3907_v54 }
 0x5bf   :  { %3995 = vst [vmem:[%s6056_s10 + $0x60] sm:$0xff] %v3972_v29 }
 0x5c0   :  { %v3915_v31 = vpop.f32.mrf.mxu2 }
 0x5c1   :  { %v3916_v5 = vadd.f32 %v3915_v31, %v3851_v1 }
 0x5c4   :  { %v3974_v34 = vpop.f32.mrf.mxu3 }
 0x5c5   :  { %v3975_v40 = vadd.f32 %v3974_v34, %v3910_v13 }
 0x5c7   :  { %3996 = vst [vmem:[%s6056_s10 + $0x68] sm:$0xff] %v3975_v40 }
 0x5cc   :  { %v3977_v12 = vpop.f32.mrf.mxu3 }
 0x5cd   :  { %v3978_v17 = vadd.f32 %v3977_v12, %v3913_v32 }
 0x5cf   :  { %3997 = vst [vmem:[%s6056_s10 + $0x70] sm:$0xff] %v3978_v17 }
 0x5d4   :  { %v3980_v59 = vpop.f32.mrf.mxu3 }
 0x5d5   :  { %v3981_v3 = vadd.f32 %v3980_v59, %v3916_v5 }
 0x5d7   :  { %3998 = vst [vmem:[%s6056_s10 + $0x78] sm:$0xff] %v3981_v3 }
 0x5d8   :  { %4003 = vsyncpa [#allocation3], 1 }
 0x5d9   :  { %4004 = vsyncpa [#allocation7], 1 }
 0x5da   :  { %4005 = vsyncpa [#allocation10], 1 }
 0x5db   :  { %4006 = vsyncpa [#allocation4], 1 }

</bundles_post_ra>
